<compile_context>
chip_gen: v7x
topology: tpu7x:2x2x1
jax: 0.10.0
libtpu: 0.0.40
codegen_flags: <defaults>
</compile_context>

<pallas_src>
import jax
import jax.numpy as jnp
from jax import lax
from jax.experimental import pallas as pl
from jax.experimental.pallas import tpu as pltpu

WPAD = 8  # left halo of the conv scratch (keeps the interior store sublane-aligned)


# --------------------------------------------------------------------------
# Pallas kernel (one grid point = one flow step applied to one sample)
# --------------------------------------------------------------------------
def _glow_fused_kernel(
    # inputs
    x_ref,      # (1, H, W, C)  input activations (read only at step 0)
    wp_ref,     # (C, C)        fused ActNorm+InvConv weight
    bp_ref,     # (1, C)        fused ActNorm+InvConv bias
    ldjc_ref,   # (1, 1)        (sum(an_logs) + slogdet(W)) * H * W
    inb_ref,    # (1, C)        in_norm bias (zeros on the change half)
    w1_ref,     # (9, C, M)     3x3 in_conv taps (in_norm scale folded in)
    w2_ref,     # (M, M)        1x1 mid_conv (mid_norm scale folded in)
    b2_ref,     # (1, M)        mid_norm bias folded through mid_conv
    outb_ref,   # (1, M)        out_norm bias
    w3_ref,     # (9, M, 2C)    merged 3x3 out_conv taps -> [s | t] (scale folded)
    b3_ref,     # (1, 2C)
    sels_ref,   # (2C, C)       constant selector picking the s half
    selt_ref,   # (2C, C)       constant selector picking the t half
    csc_ref,    # (1, C)        coupling scale (zeros on the identity half)
    # outputs (resident in VMEM across the step axis)
    xo_ref,     # (1, H, W, C)
    sldj_ref,   # (1, 1, 128)   per-sample log-det delta (replicated on lanes)
    # scratch
    pad_c,      # (1, H+2, W+WPAD+1, C)
    pad_m,      # (1, H+2, W+WPAD+1, M)
):
    step = pl.program_id(1)
    _, H, W, C = xo_ref.shape
    M = w2_ref.shape[0]
    HW = H * W

    @pl.when(step == 0)
    def _init():
        # Zero the conv halos once per sample; the interior is overwritten each
        # step and halo rows/cols are never written again.
        pad_c[...] = jnp.zeros_like(pad_c)
        pad_m[...] = jnp.zeros_like(pad_m)
        xo_ref[...] = x_ref[...]
        sldj_ref[...] = jnp.zeros_like(sldj_ref)

    def conv3x3(pad_ref, w9_ref, cin):
        # 3x3 "same" conv as 9 tap matmuls accumulated in f32 (v7x MRB can
        # accumulate in place; see TODO(synk) above re: im2col single matmul).
        acc = None
        for dy in range(3):
            for dx in range(3):
                off = WPAD - 1 + dx
                tap = pad_ref[:, dy:dy + H, off:off + W, :]          # (1,H,W,cin)
                p = jnp.dot(tap.reshape(HW, cin), w9_ref[3 * dy + dx],
                            preferred_element_type=jnp.float32)
                acc = p if acc is None else acc + p
        return acc                                                    # (HW, cout)

    x = xo_ref[...].reshape(HW, C)

    # ---------------- ActNorm + InvConv (fused: one matmul + bias) ----------
    x = jnp.dot(x, wp_ref[...], preferred_element_type=jnp.float32) + bp_ref[...]

    # ---------------- Affine coupling ---------------------------------------
    # Zero rows/cols in the packed weights keep the identity half untouched, so
    # everything runs full channel width (no lane-dim splits inside the kernel).
    xn = x + inb_ref[...]
    pad_c[:, 1:1 + H, WPAD:WPAD + W, :] = xn.reshape(1, H, W, C)
    h = jnp.maximum(conv3x3(pad_c, w1_ref, C), 0.0)                   # (HW, M)
    h = jnp.maximum(
        jnp.dot(h, w2_ref[...], preferred_element_type=jnp.float32) + b2_ref[...],
        0.0)                                                          # (HW, M)
    hn = h + outb_ref[...]
    pad_m[:, 1:1 + H, WPAD:WPAD + W, :] = hn.reshape(1, H, W, M)      # written once
    st = conv3x3(pad_m, w3_ref, M) + b3_ref[...]                      # (HW, 2C)

    s_pre = jnp.dot(st, sels_ref[...], preferred_element_type=jnp.float32)
    t = jnp.dot(st, selt_ref[...], preferred_element_type=jnp.float32)
    s = csc_ref[...] * jnp.tanh(s_pre)                                # (HW, C)

    # s and t are exactly zero on the identity half -> x_id is untouched.
    x = (x + t) * jnp.exp(s)
    xo_ref[...] = x.reshape(1, H, W, C).astype(xo_ref.dtype)

    ldj = jnp.sum(jnp.sum(s, axis=1, keepdims=True), axis=0, keepdims=True)  # (1,1)
    sldj_ref[...] = sldj_ref[...] + (ldj + ldjc_ref[...])


def _glow_pallas_call(x_nhwc, packed):
    N, H, W, C = x_nhwc.shape
    S = packed[0].shape[0]          # number of flow steps
    M = packed[5].shape[1]          # mid channels (w2 is (S, M, M))

    def step_spec(rest):
        return pl.BlockSpec((None,) + rest,
                            lambda n, s, _r=rest: (s,) + (0,) * len(_r))

    def const_spec(shape):
        return pl.BlockSpec(shape, lambda n, s, _k=len(shape): (0,) * _k)

    in_specs = [
        pl.BlockSpec((1, H, W, C), lambda n, s: (n, 0, 0, 0)),  # x
        step_spec((C, C)),           # wp
        step_spec((1, C)),           # bp
        step_spec((1, 1)),           # ldjc
        step_spec((1, C)),           # inb
        step_spec((9, C, M)),        # w1
        step_spec((M, M)),           # w2
        step_spec((1, M)),           # b2
        step_spec((1, M)),           # outb
        step_spec((9, M, 2 * C)),    # w3 (merged s|t)
        step_spec((1, 2 * C)),       # b3 (merged)
        const_spec((2 * C, C)),      # sel_s
        const_spec((2 * C, C)),      # sel_t
        step_spec((1, C)),           # csc
    ]
    out_specs = (
        pl.BlockSpec((1, H, W, C), lambda n, s: (n, 0, 0, 0)),   # resident over s
        pl.BlockSpec((1, 1, 128), lambda n, s: (n, 0, 0)),       # resident over s
    )
    out_shape = (jax.ShapeDtypeStruct((N, H, W, C), jnp.float32),
                 jax.ShapeDtypeStruct((N, 1, 128), jnp.float32))
    scratch = [
        pltpu.VMEM((1, H + 2, W + WPAD + 1, C), jnp.float32),
        pltpu.VMEM((1, H + 2, W + WPAD + 1, M), jnp.float32),
    ]
    xo, dldj = pl.pallas_call(
        _glow_fused_kernel,
        out_shape=out_shape,
        grid_spec=pltpu.PrefetchScalarGridSpec(
            num_scalar_prefetch=0,
            grid=(N, S),
            in_specs=in_specs,
            out_specs=out_specs,
            scratch_shapes=scratch),
        compiler_params=pltpu.CompilerParams(
            dimension_semantics=("parallel", "arbitrary"),
            vmem_limit_bytes=32 * 1024 * 1024),
    )(x_nhwc, *packed)
    return xo, dldj[:, 0, 0]


@jax.jit
def _glow_forward_jit(x_nchw, sldj, packed):
    x = jnp.transpose(x_nchw, (0, 2, 3, 1))          # NCHW -> NHWC
    xo, dldj = _glow_pallas_call(x, packed)
    return jnp.transpose(xo, (0, 3, 1, 2)), sldj + dldj


def glow_forward_pallas(x_nchw, sldj, packed, reverse=False):
    """_Glow.forward(x, sldj, reverse=False) with NCHW in/out."""
    assert not reverse, "reverse path not implemented"  # TODO(synk)
    return _glow_forward_jit(x_nchw, sldj, packed)


# --------------------------------------------------------------------------
# Parameter setup (deterministic) + one-time packing for the kernel
# --------------------------------------------------------------------------
def init_step_params(key, C, M):
    Ch = C // 2
    ks = jax.random.split(key, 14)
    p = {}
    p["an_bias"] = 0.1 * jax.random.normal(ks[0], (C,), jnp.float32)
    p["an_logs"] = 0.1 * jax.random.normal(ks[1], (C,), jnp.float32)
    q, _ = jnp.linalg.qr(jax.random.normal(ks[2], (C, C), jnp.float32))
    p["inv_w"] = q                                        # random orthogonal
    p["in_b"] = 0.1 * jax.random.normal(ks[3], (Ch,), jnp.float32)
    p["in_logs"] = 0.1 * jax.random.normal(ks[4], (Ch,), jnp.float32)
    p["w1"] = 0.05 * jax.random.normal(ks[5], (M, Ch, 3, 3), jnp.float32)
    p["mid_b"] = 0.1 * jax.random.normal(ks[6], (M,), jnp.float32)
    p["mid_logs"] = 0.1 * jax.random.normal(ks[7], (M,), jnp.float32)
    p["w2"] = 0.05 * jax.random.normal(ks[8], (M, M), jnp.float32)
    p["out_b"] = 0.1 * jax.random.normal(ks[9], (M,), jnp.float32)
    p["out_logs"] = 0.1 * jax.random.normal(ks[10], (M,), jnp.float32)
    # out_conv is zero-init in the reference module; small values keep the
    # coupling branch exercising real compute (still deterministic).
    p["w3"] = 0.05 * jax.random.normal(ks[11], (C, M, 3, 3), jnp.float32)
    p["b3"] = 0.05 * jax.random.normal(ks[12], (C,), jnp.float32)
    p["scale"] = jnp.ones((Ch,), jnp.float32)             # PyTorch init: ones
    return p


def _pack_step(p, hw):
    """Fold norms/exps/log-dets into per-step kernel weights (runs once)."""
    C = p["an_bias"].shape[0]
    Ch = C // 2
    M = p["mid_b"].shape[0]
    zc = jnp.zeros((Ch,), jnp.float32)

    # ActNorm folded into InvConv:  x' = x @ wp + bp
    an_scale = jnp.exp(p["an_logs"])
    wt = p["inv_w"].T                                     # (ci, co)
    wp = an_scale[:, None] * wt
    bp = (p["an_bias"] * an_scale)[None, :] @ wt
    ldjc = ((jnp.sum(p["an_logs"]) + jnp.linalg.slogdet(p["inv_w"])[1])
            * float(hw)).reshape(1, 1)

    # in_norm: bias stays explicit (zero-padded borders), scale folds into w1.
    inb = jnp.concatenate([zc, p["in_b"]]).reshape(1, C)
    in_scale = jnp.concatenate([jnp.ones((Ch,), jnp.float32),
                                jnp.exp(p["in_logs"])])
    w1 = jnp.transpose(p["w1"], (2, 3, 1, 0)).reshape(9, Ch, M)
    w1 = jnp.concatenate([jnp.zeros((9, Ch, M), jnp.float32), w1], axis=1)
    w1 = w1 * in_scale[None, :, None]                     # (9, C, M)

    # mid_norm folded fully through the 1x1 mid conv (no padding involved).
    mid_scale = jnp.exp(p["mid_logs"])
    w2t = p["w2"].T
    w2 = mid_scale[:, None] * w2t                         # (M, M)
    b2 = (p["mid_b"] * mid_scale)[None, :] @ w2t          # (1, M)

    # out_norm: bias explicit, scale folded into the merged out conv.
    outb = p["out_b"].reshape(1, M)
    out_scale = jnp.exp(p["out_logs"])
    w3 = jnp.transpose(p["w3"], (2, 3, 1, 0)).reshape(9, M, C)
    w3 = w3 * out_scale[None, :, None]
    z9 = jnp.zeros((9, M, Ch), jnp.float32)
    # merged output columns: [ s(change) | zeros | t(change) | zeros ]
    w3m = jnp.concatenate([w3[:, :, 0::2], z9, w3[:, :, 1::2], z9], axis=2)
    b3m = jnp.concatenate([p["b3"][0::2], zc, p["b3"][1::2], zc]).reshape(1, 2 * C)
    csc = jnp.concatenate([p["scale"], zc]).reshape(1, C)

    return dict(wp=wp, bp=bp, ldjc=ldjc, inb=inb, w1=w1, w2=w2, b2=b2,
                outb=outb, w3=w3m, b3=b3m, csc=csc)


def pack_glow_params(params, H, W, C):
    per = [_pack_step(p, H * W) for p in params]
    stk = lambda k: jnp.stack([d[k] for d in per]).astype(jnp.float32)
    eye = jnp.eye(C, dtype=jnp.float32)
    zeros = jnp.zeros((C, C), jnp.float32)
    sel_s = jnp.concatenate([eye, zeros], axis=0)         # picks first C cols
    sel_t = jnp.concatenate([zeros, eye], axis=0)         # picks last C cols
    return (stk("wp"), stk("bp"), stk("ldjc"), stk("inb"), stk("w1"),
            stk("w2"), stk("b2"), stk("outb"), stk("w3"), stk("b3"),
            sel_s, sel_t, stk("csc"))


# --------------------------------------------------------------------------
# Pure-JAX reference (PyTorch NCHW semantics) for cross-checking
# --------------------------------------------------------------------------
def _affine_norm_nchw(x, b, logs):
    return (x + b[None, :, None, None]) * jnp.exp(logs[None, :, None, None])


def reference_step(x, sldj, p):
    N, C, H, W = x.shape
    Ch = C // 2
    M = p["mid_b"].shape[0]
    hp = lax.Precision.HIGHEST
    dn = ("NCHW", "OIHW", "NCHW")
    # ActNorm
    x = _affine_norm_nchw(x, p["an_bias"], p["an_logs"])
    sldj = sldj + jnp.sum(p["an_logs"]) * H * W
    # InvConv (1x1)
    x = lax.conv_general_dilated(x, p["inv_w"].reshape(C, C, 1, 1), (1, 1),
                                 "VALID", dimension_numbers=dn, precision=hp)
    sldj = sldj + jnp.linalg.slogdet(p["inv_w"])[1] * H * W
    # Affine coupling
    x_change, x_id = x[:, :Ch], x[:, Ch:]
    h = _affine_norm_nchw(x_id, p["in_b"], p["in_logs"])
    h = jax.nn.relu(lax.conv_general_dilated(h, p["w1"], (1, 1), "SAME",
                                             dimension_numbers=dn, precision=hp))
    h = _affine_norm_nchw(h, p["mid_b"], p["mid_logs"])
    h = jax.nn.relu(lax.conv_general_dilated(h, p["w2"].reshape(M, M, 1, 1),
                                             (1, 1), "VALID",
                                             dimension_numbers=dn, precision=hp))
    h = _affine_norm_nchw(h, p["out_b"], p["out_logs"])
    st = lax.conv_general_dilated(h, p["w3"], (1, 1), "SAME",
                                  dimension_numbers=dn, precision=hp)
    st = st + p["b3"][None, :, None, None]
    s, t = st[:, 0::2], st[:, 1::2]
    s = p["scale"][None, :, None, None] * jnp.tanh(s)
    x_change = (x_change + t) * jnp.exp(s)
    sldj = sldj + jnp.sum(s.reshape(N, -1), axis=1)
    x = jnp.concatenate([x_change, x_id], axis=1)
    return x, sldj


# --------------------------------------------------------------------------
if __name__ == "__main__":
    key = jax.random.PRNGKey(0)
    N, C, H, W = 2, 4, 16, 16          # x: NCHW like the PyTorch module
    mid_channels = 32
    num_steps = 2

    kx, kp = jax.random.split(key)
    x = jax.random.normal(kx, (N, C, H, W), jnp.float32)
    sldj = jnp.zeros((N,), jnp.float32)
    params = [init_step_params(k, C, mid_channels)
              for k in jax.random.split(kp, num_steps)]

    # Pack once (outside the jitted call).
    packed = pack_glow_params(params, H, W, C)
    packed = jax.block_until_ready(packed)

    y, out_sldj = glow_forward_pallas(x, sldj, packed, reverse=False)
    y = jax.block_until_ready(y)
    out_sldj = jax.block_until_ready(out_sldj)

    # Cross-check against the pure-JAX NCHW reference.
    yr, sr = x, sldj
    for p in params:
        yr, sr = reference_step(yr, sr, p)
    assert y.shape == (N, C, H, W) and out_sldj.shape == (N,)
    assert jnp.allclose(y, yr, atol=1e-2, rtol=1e-2), \
        f"x mismatch: max abs diff {jnp.max(jnp.abs(y - yr))}"
    assert jnp.allclose(out_sldj, sr, atol=1e-2, rtol=1e-2), \
        f"sldj mismatch: {out_sldj} vs {sr}"

    print("KERNEL_OK")
</pallas_src>

<mosaic_0001>
module attributes {stable_mosaic.version = 11 : i64} {
  func.func @_glow_fused_kernel(%arg0: i32, %arg1: i32, %arg2: memref<1x16x16x4xf32, #tpu.memory_space<vmem>>, %arg3: memref<1x4x4xf32, #tpu.memory_space<vmem>>, %arg4: memref<1x1x4xf32, #tpu.memory_space<vmem>>, %arg5: memref<1x1x1xf32, #tpu.memory_space<vmem>>, %arg6: memref<1x1x4xf32, #tpu.memory_space<vmem>>, %arg7: memref<1x9x4x32xf32, #tpu.memory_space<vmem>>, %arg8: memref<1x32x32xf32, #tpu.memory_space<vmem>>, %arg9: memref<1x1x32xf32, #tpu.memory_space<vmem>>, %arg10: memref<1x1x32xf32, #tpu.memory_space<vmem>>, %arg11: memref<1x9x32x8xf32, #tpu.memory_space<vmem>>, %arg12: memref<1x1x8xf32, #tpu.memory_space<vmem>>, %arg13: memref<8x4xf32, #tpu.memory_space<vmem>>, %arg14: memref<8x4xf32, #tpu.memory_space<vmem>>, %arg15: memref<1x1x4xf32, #tpu.memory_space<vmem>>, %arg16: memref<1x16x16x4xf32, #tpu.memory_space<vmem>>, %arg17: memref<1x1x128xf32, #tpu.memory_space<vmem>>, %arg18: memref<1x18x25x4xf32, #tpu.memory_space<vmem>>, %arg19: memref<1x18x25x32xf32, #tpu.memory_space<vmem>>) attributes {dimension_semantics = [#tpu.dimension_semantics<parallel>, #tpu.dimension_semantics<arbitrary>], iteration_bounds = array<i64: 2, 2>, scalar_prefetch = 0 : i64, scratch_operands = 2 : i64, tpu.core_type = #tpu.core_type<tc>, window_params = [{transform_indices = @transform_0, window_bounds = array<i64: 1, 16, 16, 4>}, {transform_indices = @transform_1, window_bounds = array<i64: 1, 4, 4>}, {transform_indices = @transform_2, window_bounds = array<i64: 1, 1, 4>}, {transform_indices = @transform_3, window_bounds = array<i64: 1, 1, 1>}, {transform_indices = @transform_4, window_bounds = array<i64: 1, 1, 4>}, {transform_indices = @transform_5, window_bounds = array<i64: 1, 9, 4, 32>}, {transform_indices = @transform_6, window_bounds = array<i64: 1, 32, 32>}, {transform_indices = @transform_7, window_bounds = array<i64: 1, 1, 32>}, {transform_indices = @transform_8, window_bounds = array<i64: 1, 1, 32>}, {transform_indices = @transform_9, window_bounds = array<i64: 1, 9, 32, 8>}, {transform_indices = @transform_10, window_bounds = array<i64: 1, 1, 8>}, {pipeline_mode = #tpu.pipeline_mode<synchronous>, transform_indices = @transform_11, window_bounds = array<i64: 8, 4>}, {pipeline_mode = #tpu.pipeline_mode<synchronous>, transform_indices = @transform_12, window_bounds = array<i64: 8, 4>}, {transform_indices = @transform_13, window_bounds = array<i64: 1, 1, 4>}, {transform_indices = @transform_14, window_bounds = array<i64: 1, 16, 16, 4>}, {transform_indices = @transform_15, window_bounds = array<i64: 1, 1, 128>}]} {
    %c0_i32 = arith.constant 0 : i32
    %0 = arith.cmpi eq, %arg1, %c0_i32 : i32
    %1 = arith.extui %0 : i1 to i32
    %c0_i32_0 = arith.constant 0 : i32
    %2 = arith.cmpi ne, %1, %c0_i32_0 : i32
    scf.if %2 {
      %cst_213 = arith.constant 0.000000e+00 : f32
      %171 = vector.broadcast %cst_213 : f32 to vector<1x18x25x4xf32>
      %c0_214 = arith.constant 0 : index
      %c0_215 = arith.constant 0 : index
      %c0_216 = arith.constant 0 : index
      %c0_217 = arith.constant 0 : index
      %172 = vector.load %arg18[%c0_214, %c0_215, %c0_216, %c0_217] : memref<1x18x25x4xf32, #tpu.memory_space<vmem>>, vector<1x18x25x4xf32>
      tpu.vector_store %arg18[%c0_214, %c0_215, %c0_216, %c0_217], %171 {strides = array<i32>} : memref<1x18x25x4xf32, #tpu.memory_space<vmem>>, vector<1x18x25x4xf32>,
      %cst_218 = arith.constant 0.000000e+00 : f32
      %173 = vector.broadcast %cst_218 : f32 to vector<1x18x25x32xf32>
      %c0_219 = arith.constant 0 : index
      %c0_220 = arith.constant 0 : index
      %c0_221 = arith.constant 0 : index
      %c0_222 = arith.constant 0 : index
      %174 = vector.load %arg19[%c0_219, %c0_220, %c0_221, %c0_222] : memref<1x18x25x32xf32, #tpu.memory_space<vmem>>, vector<1x18x25x32xf32>
      tpu.vector_store %arg19[%c0_219, %c0_220, %c0_221, %c0_222], %173 {strides = array<i32>} : memref<1x18x25x32xf32, #tpu.memory_space<vmem>>, vector<1x18x25x32xf32>,
      %c0_223 = arith.constant 0 : index
      %c0_224 = arith.constant 0 : index
      %c0_225 = arith.constant 0 : index
      %c0_226 = arith.constant 0 : index
      %175 = vector.load %arg2[%c0_223, %c0_224, %c0_225, %c0_226] : memref<1x16x16x4xf32, #tpu.memory_space<vmem>>, vector<1x16x16x4xf32>
      %c0_227 = arith.constant 0 : index
      %c0_228 = arith.constant 0 : index
      %c0_229 = arith.constant 0 : index
      %c0_230 = arith.constant 0 : index
      %176 = vector.load %arg16[%c0_227, %c0_228, %c0_229, %c0_230] : memref<1x16x16x4xf32, #tpu.memory_space<vmem>>, vector<1x16x16x4xf32>
      tpu.vector_store %arg16[%c0_227, %c0_228, %c0_229, %c0_230], %175 {strides = array<i32>} : memref<1x16x16x4xf32, #tpu.memory_space<vmem>>, vector<1x16x16x4xf32>,
      %cst_231 = arith.constant 0.000000e+00 : f32
      %177 = vector.broadcast %cst_231 : f32 to vector<1x1x128xf32>
      %c0_232 = arith.constant 0 : index
      %c0_233 = arith.constant 0 : index
      %c0_234 = arith.constant 0 : index
      %178 = vector.load %arg17[%c0_232, %c0_233, %c0_234] : memref<1x1x128xf32, #tpu.memory_space<vmem>>, vector<1x1x128xf32>
      tpu.vector_store %arg17[%c0_232, %c0_233, %c0_234], %177 {strides = array<i32>} : memref<1x1x128xf32, #tpu.memory_space<vmem>>, vector<1x1x128xf32>,
    } else {
    }
    %c0 = arith.constant 0 : index
    %c0_1 = arith.constant 0 : index
    %c0_2 = arith.constant 0 : index
    %c0_3 = arith.constant 0 : index
    %3 = vector.load %arg16[%c0, %c0_1, %c0_2, %c0_3] : memref<1x16x16x4xf32, #tpu.memory_space<vmem>>, vector<1x16x16x4xf32>
    %4 = vector.shape_cast %3 : vector<1x16x16x4xf32> to vector<256x4xf32>
    %c0_4 = arith.constant 0 : index
    %c0_5 = arith.constant 0 : index
    %c0_6 = arith.constant 0 : index
    %5 = vector.load %arg3[%c0_4, %c0_5, %c0_6] : memref<1x4x4xf32, #tpu.memory_space<vmem>>, vector<1x4x4xf32>
    %6 = vector.shape_cast %5 : vector<1x4x4xf32> to vector<4x4xf32>
    %cst = arith.constant dense<0.000000e+00> : vector<256x4xf32>
    %7 = tpu.matmul %4, %6, %cst {dimension_numbers = #tpu.dot_dimension_numbers<[1], [0], [0], [1], [0, 0, 1, 1], [], []>} : vector<256x4xf32>, vector<4x4xf32>, vector<256x4xf32> -> vector<256x4xf32>
    %c0_7 = arith.constant 0 : index
    %c0_8 = arith.constant 0 : index
    %c0_9 = arith.constant 0 : index
    %8 = vector.load %arg4[%c0_7, %c0_8, %c0_9] : memref<1x1x4xf32, #tpu.memory_space<vmem>>, vector<1x1x4xf32>
    %9 = vector.shape_cast %8 : vector<1x1x4xf32> to vector<1x4xf32>
    %10 = vector.broadcast %9 : vector<1x4xf32> to vector<256x4xf32>
    %11 = arith.addf %7, %10 : vector<256x4xf32>
    %c0_10 = arith.constant 0 : index
    %c0_11 = arith.constant 0 : index
    %c0_12 = arith.constant 0 : index
    %12 = vector.load %arg6[%c0_10, %c0_11, %c0_12] : memref<1x1x4xf32, #tpu.memory_space<vmem>>, vector<1x1x4xf32>
    %13 = vector.shape_cast %12 : vector<1x1x4xf32> to vector<1x4xf32>
    %14 = vector.broadcast %13 : vector<1x4xf32> to vector<256x4xf32>
    %15 = arith.addf %11, %14 : vector<256x4xf32>
    %16 = vector.shape_cast %15 : vector<256x4xf32> to vector<1x16x16x4xf32>
    %c0_13 = arith.constant 0 : index
    %c1 = arith.constant 1 : index
    %c8 = arith.constant 8 : index
    %c0_14 = arith.constant 0 : index
    %17 = vector.load %arg18[%c0_13, %c1, %c8, %c0_14] : memref<1x18x25x4xf32, #tpu.memory_space<vmem>>, vector<1x16x16x4xf32>
    tpu.vector_store %arg18[%c0_13, %c1, %c8, %c0_14], %16 {strides = array<i32>} : memref<1x18x25x4xf32, #tpu.memory_space<vmem>>, vector<1x16x16x4xf32>,
    %c0_15 = arith.constant 0 : index
    %c0_16 = arith.constant 0 : index
    %c7 = arith.constant 7 : index
    %c0_17 = arith.constant 0 : index
    %18 = vector.load %arg18[%c0_15, %c0_16, %c7, %c0_17] : memref<1x18x25x4xf32, #tpu.memory_space<vmem>>, vector<1x16x16x4xf32>
    %19 = vector.shape_cast %18 : vector<1x16x16x4xf32> to vector<256x4xf32>
    %c0_18 = arith.constant 0 : index
    %c0_19 = arith.constant 0 : index
    %c0_20 = arith.constant 0 : index
    %c0_21 = arith.constant 0 : index
    %20 = vector.load %arg7[%c0_18, %c0_19, %c0_20, %c0_21] : memref<1x9x4x32xf32, #tpu.memory_space<vmem>>, vector<1x1x4x32xf32>
    %21 = vector.shape_cast %20 : vector<1x1x4x32xf32> to vector<4x32xf32>
    %cst_22 = arith.constant dense<0.000000e+00> : vector<256x32xf32>
    %22 = tpu.matmul %19, %21, %cst_22 {dimension_numbers = #tpu.dot_dimension_numbers<[1], [0], [0], [1], [0, 0, 1, 1], [], []>} : vector<256x4xf32>, vector<4x32xf32>, vector<256x32xf32> -> vector<256x32xf32>
    %c0_23 = arith.constant 0 : index
    %c0_24 = arith.constant 0 : index
    %c8_25 = arith.constant 8 : index
    %c0_26 = arith.constant 0 : index
    %23 = vector.load %arg18[%c0_23, %c0_24, %c8_25, %c0_26] : memref<1x18x25x4xf32, #tpu.memory_space<vmem>>, vector<1x16x16x4xf32>
    %24 = vector.shape_cast %23 : vector<1x16x16x4xf32> to vector<256x4xf32>
    %c0_27 = arith.constant 0 : index
    %c1_28 = arith.constant 1 : index
    %c0_29 = arith.constant 0 : index
    %c0_30 = arith.constant 0 : index
    %25 = vector.load %arg7[%c0_27, %c1_28, %c0_29, %c0_30] : memref<1x9x4x32xf32, #tpu.memory_space<vmem>>, vector<1x1x4x32xf32>
    %26 = vector.shape_cast %25 : vector<1x1x4x32xf32> to vector<4x32xf32>
    %cst_31 = arith.constant dense<0.000000e+00> : vector<256x32xf32>
    %27 = tpu.matmul %24, %26, %cst_31 {dimension_numbers = #tpu.dot_dimension_numbers<[1], [0], [0], [1], [0, 0, 1, 1], [], []>} : vector<256x4xf32>, vector<4x32xf32>, vector<256x32xf32> -> vector<256x32xf32>
    %28 = arith.addf %22, %27 : vector<256x32xf32>
    %c0_32 = arith.constant 0 : index
    %c0_33 = arith.constant 0 : index
    %c9 = arith.constant 9 : index
    %c0_34 = arith.constant 0 : index
    %29 = vector.load %arg18[%c0_32, %c0_33, %c9, %c0_34] : memref<1x18x25x4xf32, #tpu.memory_space<vmem>>, vector<1x16x16x4xf32>
    %30 = vector.shape_cast %29 : vector<1x16x16x4xf32> to vector<256x4xf32>
    %c0_35 = arith.constant 0 : index
    %c2 = arith.constant 2 : index
    %c0_36 = arith.constant 0 : index
    %c0_37 = arith.constant 0 : index
    %31 = vector.load %arg7[%c0_35, %c2, %c0_36, %c0_37] : memref<1x9x4x32xf32, #tpu.memory_space<vmem>>, vector<1x1x4x32xf32>
    %32 = vector.shape_cast %31 : vector<1x1x4x32xf32> to vector<4x32xf32>
    %cst_38 = arith.constant dense<0.000000e+00> : vector<256x32xf32>
    %33 = tpu.matmul %30, %32, %cst_38 {dimension_numbers = #tpu.dot_dimension_numbers<[1], [0], [0], [1], [0, 0, 1, 1], [], []>} : vector<256x4xf32>, vector<4x32xf32>, vector<256x32xf32> -> vector<256x32xf32>
    %34 = arith.addf %28, %33 : vector<256x32xf32>
    %c0_39 = arith.constant 0 : index
    %c1_40 = arith.constant 1 : index
    %c7_41 = arith.constant 7 : index
    %c0_42 = arith.constant 0 : index
    %35 = vector.load %arg18[%c0_39, %c1_40, %c7_41, %c0_42] : memref<1x18x25x4xf32, #tpu.memory_space<vmem>>, vector<1x16x16x4xf32>
    %36 = vector.shape_cast %35 : vector<1x16x16x4xf32> to vector<256x4xf32>
    %c0_43 = arith.constant 0 : index
    %c3 = arith.constant 3 : index
    %c0_44 = arith.constant 0 : index
    %c0_45 = arith.constant 0 : index
    %37 = vector.load %arg7[%c0_43, %c3, %c0_44, %c0_45] : memref<1x9x4x32xf32, #tpu.memory_space<vmem>>, vector<1x1x4x32xf32>
    %38 = vector.shape_cast %37 : vector<1x1x4x32xf32> to vector<4x32xf32>
    %cst_46 = arith.constant dense<0.000000e+00> : vector<256x32xf32>
    %39 = tpu.matmul %36, %38, %cst_46 {dimension_numbers = #tpu.dot_dimension_numbers<[1], [0], [0], [1], [0, 0, 1, 1], [], []>} : vector<256x4xf32>, vector<4x32xf32>, vector<256x32xf32> -> vector<256x32xf32>
    %40 = arith.addf %34, %39 : vector<256x32xf32>
    %c0_47 = arith.constant 0 : index
    %c1_48 = arith.constant 1 : index
    %c8_49 = arith.constant 8 : index
    %c0_50 = arith.constant 0 : index
    %41 = vector.load %arg18[%c0_47, %c1_48, %c8_49, %c0_50] : memref<1x18x25x4xf32, #tpu.memory_space<vmem>>, vector<1x16x16x4xf32>
    %42 = vector.shape_cast %41 : vector<1x16x16x4xf32> to vector<256x4xf32>
    %c0_51 = arith.constant 0 : index
    %c4 = arith.constant 4 : index
    %c0_52 = arith.constant 0 : index
    %c0_53 = arith.constant 0 : index
    %43 = vector.load %arg7[%c0_51, %c4, %c0_52, %c0_53] : memref<1x9x4x32xf32, #tpu.memory_space<vmem>>, vector<1x1x4x32xf32>
    %44 = vector.shape_cast %43 : vector<1x1x4x32xf32> to vector<4x32xf32>
    %cst_54 = arith.constant dense<0.000000e+00> : vector<256x32xf32>
    %45 = tpu.matmul %42, %44, %cst_54 {dimension_numbers = #tpu.dot_dimension_numbers<[1], [0], [0], [1], [0, 0, 1, 1], [], []>} : vector<256x4xf32>, vector<4x32xf32>, vector<256x32xf32> -> vector<256x32xf32>
    %46 = arith.addf %40, %45 : vector<256x32xf32>
    %c0_55 = arith.constant 0 : index
    %c1_56 = arith.constant 1 : index
    %c9_57 = arith.constant 9 : index
    %c0_58 = arith.constant 0 : index
    %47 = vector.load %arg18[%c0_55, %c1_56, %c9_57, %c0_58] : memref<1x18x25x4xf32, #tpu.memory_space<vmem>>, vector<1x16x16x4xf32>
    %48 = vector.shape_cast %47 : vector<1x16x16x4xf32> to vector<256x4xf32>
    %c0_59 = arith.constant 0 : index
    %c5 = arith.constant 5 : index
    %c0_60 = arith.constant 0 : index
    %c0_61 = arith.constant 0 : index
    %49 = vector.load %arg7[%c0_59, %c5, %c0_60, %c0_61] : memref<1x9x4x32xf32, #tpu.memory_space<vmem>>, vector<1x1x4x32xf32>
    %50 = vector.shape_cast %49 : vector<1x1x4x32xf32> to vector<4x32xf32>
    %cst_62 = arith.constant dense<0.000000e+00> : vector<256x32xf32>
    %51 = tpu.matmul %48, %50, %cst_62 {dimension_numbers = #tpu.dot_dimension_numbers<[1], [0], [0], [1], [0, 0, 1, 1], [], []>} : vector<256x4xf32>, vector<4x32xf32>, vector<256x32xf32> -> vector<256x32xf32>
    %52 = arith.addf %46, %51 : vector<256x32xf32>
    %c0_63 = arith.constant 0 : index
    %c2_64 = arith.constant 2 : index
    %c7_65 = arith.constant 7 : index
    %c0_66 = arith.constant 0 : index
    %53 = vector.load %arg18[%c0_63, %c2_64, %c7_65, %c0_66] : memref<1x18x25x4xf32, #tpu.memory_space<vmem>>, vector<1x16x16x4xf32>
    %54 = vector.shape_cast %53 : vector<1x16x16x4xf32> to vector<256x4xf32>
    %c0_67 = arith.constant 0 : index
    %c6 = arith.constant 6 : index
    %c0_68 = arith.constant 0 : index
    %c0_69 = arith.constant 0 : index
    %55 = vector.load %arg7[%c0_67, %c6, %c0_68, %c0_69] : memref<1x9x4x32xf32, #tpu.memory_space<vmem>>, vector<1x1x4x32xf32>
    %56 = vector.shape_cast %55 : vector<1x1x4x32xf32> to vector<4x32xf32>
    %cst_70 = arith.constant dense<0.000000e+00> : vector<256x32xf32>
    %57 = tpu.matmul %54, %56, %cst_70 {dimension_numbers = #tpu.dot_dimension_numbers<[1], [0], [0], [1], [0, 0, 1, 1], [], []>} : vector<256x4xf32>, vector<4x32xf32>, vector<256x32xf32> -> vector<256x32xf32>
    %58 = arith.addf %52, %57 : vector<256x32xf32>
    %c0_71 = arith.constant 0 : index
    %c2_72 = arith.constant 2 : index
    %c8_73 = arith.constant 8 : index
    %c0_74 = arith.constant 0 : index
    %59 = vector.load %arg18[%c0_71, %c2_72, %c8_73, %c0_74] : memref<1x18x25x4xf32, #tpu.memory_space<vmem>>, vector<1x16x16x4xf32>
    %60 = vector.shape_cast %59 : vector<1x16x16x4xf32> to vector<256x4xf32>
    %c0_75 = arith.constant 0 : index
    %c7_76 = arith.constant 7 : index
    %c0_77 = arith.constant 0 : index
    %c0_78 = arith.constant 0 : index
    %61 = vector.load %arg7[%c0_75, %c7_76, %c0_77, %c0_78] : memref<1x9x4x32xf32, #tpu.memory_space<vmem>>, vector<1x1x4x32xf32>
    %62 = vector.shape_cast %61 : vector<1x1x4x32xf32> to vector<4x32xf32>
    %cst_79 = arith.constant dense<0.000000e+00> : vector<256x32xf32>
    %63 = tpu.matmul %60, %62, %cst_79 {dimension_numbers = #tpu.dot_dimension_numbers<[1], [0], [0], [1], [0, 0, 1, 1], [], []>} : vector<256x4xf32>, vector<4x32xf32>, vector<256x32xf32> -> vector<256x32xf32>
    %64 = arith.addf %58, %63 : vector<256x32xf32>
    %c0_80 = arith.constant 0 : index
    %c2_81 = arith.constant 2 : index
    %c9_82 = arith.constant 9 : index
    %c0_83 = arith.constant 0 : index
    %65 = vector.load %arg18[%c0_80, %c2_81, %c9_82, %c0_83] : memref<1x18x25x4xf32, #tpu.memory_space<vmem>>, vector<1x16x16x4xf32>
    %66 = vector.shape_cast %65 : vector<1x16x16x4xf32> to vector<256x4xf32>
    %c0_84 = arith.constant 0 : index
    %c8_85 = arith.constant 8 : index
    %c0_86 = arith.constant 0 : index
    %c0_87 = arith.constant 0 : index
    %67 = vector.load %arg7[%c0_84, %c8_85, %c0_86, %c0_87] : memref<1x9x4x32xf32, #tpu.memory_space<vmem>>, vector<1x1x4x32xf32>
    %68 = vector.shape_cast %67 : vector<1x1x4x32xf32> to vector<4x32xf32>
    %cst_88 = arith.constant dense<0.000000e+00> : vector<256x32xf32>
    %69 = tpu.matmul %66, %68, %cst_88 {dimension_numbers = #tpu.dot_dimension_numbers<[1], [0], [0], [1], [0, 0, 1, 1], [], []>} : vector<256x4xf32>, vector<4x32xf32>, vector<256x32xf32> -> vector<256x32xf32>
    %70 = arith.addf %64, %69 : vector<256x32xf32>
    %cst_89 = arith.constant 0.000000e+00 : f32
    %71 = vector.broadcast %cst_89 : f32 to vector<256x32xf32>
    %72 = arith.maximumf %70, %71 : vector<256x32xf32>
    %c0_90 = arith.constant 0 : index
    %c0_91 = arith.constant 0 : index
    %c0_92 = arith.constant 0 : index
    %73 = vector.load %arg8[%c0_90, %c0_91, %c0_92] : memref<1x32x32xf32, #tpu.memory_space<vmem>>, vector<1x32x32xf32>
    %74 = vector.shape_cast %73 : vector<1x32x32xf32> to vector<32x32xf32>
    %cst_93 = arith.constant dense<0.000000e+00> : vector<256x32xf32>
    %75 = tpu.matmul %72, %74, %cst_93 {dimension_numbers = #tpu.dot_dimension_numbers<[1], [0], [0], [1], [0, 0, 1, 1], [], []>} : vector<256x32xf32>, vector<32x32xf32>, vector<256x32xf32> -> vector<256x32xf32>
    %c0_94 = arith.constant 0 : index
    %c0_95 = arith.constant 0 : index
    %c0_96 = arith.constant 0 : index
    %76 = vector.load %arg9[%c0_94, %c0_95, %c0_96] : memref<1x1x32xf32, #tpu.memory_space<vmem>>, vector<1x1x32xf32>
    %77 = vector.shape_cast %76 : vector<1x1x32xf32> to vector<1x32xf32>
    %78 = vector.broadcast %77 : vector<1x32xf32> to vector<256x32xf32>
    %79 = arith.addf %75, %78 : vector<256x32xf32>
    %cst_97 = arith.constant 0.000000e+00 : f32
    %80 = vector.broadcast %cst_97 : f32 to vector<256x32xf32>
    %81 = arith.maximumf %79, %80 : vector<256x32xf32>
    %c0_98 = arith.constant 0 : index
    %c0_99 = arith.constant 0 : index
    %c0_100 = arith.constant 0 : index
    %82 = vector.load %arg10[%c0_98, %c0_99, %c0_100] : memref<1x1x32xf32, #tpu.memory_space<vmem>>, vector<1x1x32xf32>
    %83 = vector.shape_cast %82 : vector<1x1x32xf32> to vector<1x32xf32>
    %84 = vector.broadcast %83 : vector<1x32xf32> to vector<256x32xf32>
    %85 = arith.addf %81, %84 : vector<256x32xf32>
    %86 = vector.shape_cast %85 : vector<256x32xf32> to vector<1x16x16x32xf32>
    %c0_101 = arith.constant 0 : index
    %c1_102 = arith.constant 1 : index
    %c8_103 = arith.constant 8 : index
    %c0_104 = arith.constant 0 : index
    %87 = vector.load %arg19[%c0_101, %c1_102, %c8_103, %c0_104] : memref<1x18x25x32xf32, #tpu.memory_space<vmem>>, vector<1x16x16x32xf32>
    tpu.vector_store %arg19[%c0_101, %c1_102, %c8_103, %c0_104], %86 {strides = array<i32>} : memref<1x18x25x32xf32, #tpu.memory_space<vmem>>, vector<1x16x16x32xf32>,
    %c0_105 = arith.constant 0 : index
    %c0_106 = arith.constant 0 : index
    %c7_107 = arith.constant 7 : index
    %c0_108 = arith.constant 0 : index
    %88 = vector.load %arg19[%c0_105, %c0_106, %c7_107, %c0_108] : memref<1x18x25x32xf32, #tpu.memory_space<vmem>>, vector<1x16x16x32xf32>
    %89 = vector.shape_cast %88 : vector<1x16x16x32xf32> to vector<256x32xf32>
    %c0_109 = arith.constant 0 : index
    %c0_110 = arith.constant 0 : index
    %c0_111 = arith.constant 0 : index
    %c0_112 = arith.constant 0 : index
    %90 = vector.load %arg11[%c0_109, %c0_110, %c0_111, %c0_112] : memref<1x9x32x8xf32, #tpu.memory_space<vmem>>, vector<1x1x32x8xf32>
    %91 = vector.shape_cast %90 : vector<1x1x32x8xf32> to vector<32x8xf32>
    %cst_113 = arith.constant dense<0.000000e+00> : vector<256x8xf32>
    %92 = tpu.matmul %89, %91, %cst_113 {dimension_numbers = #tpu.dot_dimension_numbers<[1], [0], [0], [1], [0, 0, 1, 1], [], []>} : vector<256x32xf32>, vector<32x8xf32>, vector<256x8xf32> -> vector<256x8xf32>
    %c0_114 = arith.constant 0 : index
    %c0_115 = arith.constant 0 : index
    %c8_116 = arith.constant 8 : index
    %c0_117 = arith.constant 0 : index
    %93 = vector.load %arg19[%c0_114, %c0_115, %c8_116, %c0_117] : memref<1x18x25x32xf32, #tpu.memory_space<vmem>>, vector<1x16x16x32xf32>
    %94 = vector.shape_cast %93 : vector<1x16x16x32xf32> to vector<256x32xf32>
    %c0_118 = arith.constant 0 : index
    %c1_119 = arith.constant 1 : index
    %c0_120 = arith.constant 0 : index
    %c0_121 = arith.constant 0 : index
    %95 = vector.load %arg11[%c0_118, %c1_119, %c0_120, %c0_121] : memref<1x9x32x8xf32, #tpu.memory_space<vmem>>, vector<1x1x32x8xf32>
    %96 = vector.shape_cast %95 : vector<1x1x32x8xf32> to vector<32x8xf32>
    %cst_122 = arith.constant dense<0.000000e+00> : vector<256x8xf32>
    %97 = tpu.matmul %94, %96, %cst_122 {dimension_numbers = #tpu.dot_dimension_numbers<[1], [0], [0], [1], [0, 0, 1, 1], [], []>} : vector<256x32xf32>, vector<32x8xf32>, vector<256x8xf32> -> vector<256x8xf32>
    %98 = arith.addf %92, %97 : vector<256x8xf32>
    %c0_123 = arith.constant 0 : index
    %c0_124 = arith.constant 0 : index
    %c9_125 = arith.constant 9 : index
    %c0_126 = arith.constant 0 : index
    %99 = vector.load %arg19[%c0_123, %c0_124, %c9_125, %c0_126] : memref<1x18x25x32xf32, #tpu.memory_space<vmem>>, vector<1x16x16x32xf32>
    %100 = vector.shape_cast %99 : vector<1x16x16x32xf32> to vector<256x32xf32>
    %c0_127 = arith.constant 0 : index
    %c2_128 = arith.constant 2 : index
    %c0_129 = arith.constant 0 : index
    %c0_130 = arith.constant 0 : index
    %101 = vector.load %arg11[%c0_127, %c2_128, %c0_129, %c0_130] : memref<1x9x32x8xf32, #tpu.memory_space<vmem>>, vector<1x1x32x8xf32>
    %102 = vector.shape_cast %101 : vector<1x1x32x8xf32> to vector<32x8xf32>
    %cst_131 = arith.constant dense<0.000000e+00> : vector<256x8xf32>
    %103 = tpu.matmul %100, %102, %cst_131 {dimension_numbers = #tpu.dot_dimension_numbers<[1], [0], [0], [1], [0, 0, 1, 1], [], []>} : vector<256x32xf32>, vector<32x8xf32>, vector<256x8xf32> -> vector<256x8xf32>
    %104 = arith.addf %98, %103 : vector<256x8xf32>
    %c0_132 = arith.constant 0 : index
    %c1_133 = arith.constant 1 : index
    %c7_134 = arith.constant 7 : index
    %c0_135 = arith.constant 0 : index
    %105 = vector.load %arg19[%c0_132, %c1_133, %c7_134, %c0_135] : memref<1x18x25x32xf32, #tpu.memory_space<vmem>>, vector<1x16x16x32xf32>
    %106 = vector.shape_cast %105 : vector<1x16x16x32xf32> to vector<256x32xf32>
    %c0_136 = arith.constant 0 : index
    %c3_137 = arith.constant 3 : index
    %c0_138 = arith.constant 0 : index
    %c0_139 = arith.constant 0 : index
    %107 = vector.load %arg11[%c0_136, %c3_137, %c0_138, %c0_139] : memref<1x9x32x8xf32, #tpu.memory_space<vmem>>, vector<1x1x32x8xf32>
    %108 = vector.shape_cast %107 : vector<1x1x32x8xf32> to vector<32x8xf32>
    %cst_140 = arith.constant dense<0.000000e+00> : vector<256x8xf32>
    %109 = tpu.matmul %106, %108, %cst_140 {dimension_numbers = #tpu.dot_dimension_numbers<[1], [0], [0], [1], [0, 0, 1, 1], [], []>} : vector<256x32xf32>, vector<32x8xf32>, vector<256x8xf32> -> vector<256x8xf32>
    %110 = arith.addf %104, %109 : vector<256x8xf32>
    %c0_141 = arith.constant 0 : index
    %c1_142 = arith.constant 1 : index
    %c8_143 = arith.constant 8 : index
    %c0_144 = arith.constant 0 : index
    %111 = vector.load %arg19[%c0_141, %c1_142, %c8_143, %c0_144] : memref<1x18x25x32xf32, #tpu.memory_space<vmem>>, vector<1x16x16x32xf32>
    %112 = vector.shape_cast %111 : vector<1x16x16x32xf32> to vector<256x32xf32>
    %c0_145 = arith.constant 0 : index
    %c4_146 = arith.constant 4 : index
    %c0_147 = arith.constant 0 : index
    %c0_148 = arith.constant 0 : index
    %113 = vector.load %arg11[%c0_145, %c4_146, %c0_147, %c0_148] : memref<1x9x32x8xf32, #tpu.memory_space<vmem>>, vector<1x1x32x8xf32>
    %114 = vector.shape_cast %113 : vector<1x1x32x8xf32> to vector<32x8xf32>
    %cst_149 = arith.constant dense<0.000000e+00> : vector<256x8xf32>
    %115 = tpu.matmul %112, %114, %cst_149 {dimension_numbers = #tpu.dot_dimension_numbers<[1], [0], [0], [1], [0, 0, 1, 1], [], []>} : vector<256x32xf32>, vector<32x8xf32>, vector<256x8xf32> -> vector<256x8xf32>
    %116 = arith.addf %110, %115 : vector<256x8xf32>
    %c0_150 = arith.constant 0 : index
    %c1_151 = arith.constant 1 : index
    %c9_152 = arith.constant 9 : index
    %c0_153 = arith.constant 0 : index
    %117 = vector.load %arg19[%c0_150, %c1_151, %c9_152, %c0_153] : memref<1x18x25x32xf32, #tpu.memory_space<vmem>>, vector<1x16x16x32xf32>
    %118 = vector.shape_cast %117 : vector<1x16x16x32xf32> to vector<256x32xf32>
    %c0_154 = arith.constant 0 : index
    %c5_155 = arith.constant 5 : index
    %c0_156 = arith.constant 0 : index
    %c0_157 = arith.constant 0 : index
    %119 = vector.load %arg11[%c0_154, %c5_155, %c0_156, %c0_157] : memref<1x9x32x8xf32, #tpu.memory_space<vmem>>, vector<1x1x32x8xf32>
    %120 = vector.shape_cast %119 : vector<1x1x32x8xf32> to vector<32x8xf32>
    %cst_158 = arith.constant dense<0.000000e+00> : vector<256x8xf32>
    %121 = tpu.matmul %118, %120, %cst_158 {dimension_numbers = #tpu.dot_dimension_numbers<[1], [0], [0], [1], [0, 0, 1, 1], [], []>} : vector<256x32xf32>, vector<32x8xf32>, vector<256x8xf32> -> vector<256x8xf32>
    %122 = arith.addf %116, %121 : vector<256x8xf32>
    %c0_159 = arith.constant 0 : index
    %c2_160 = arith.constant 2 : index
    %c7_161 = arith.constant 7 : index
    %c0_162 = arith.constant 0 : index
    %123 = vector.load %arg19[%c0_159, %c2_160, %c7_161, %c0_162] : memref<1x18x25x32xf32, #tpu.memory_space<vmem>>, vector<1x16x16x32xf32>
    %124 = vector.shape_cast %123 : vector<1x16x16x32xf32> to vector<256x32xf32>
    %c0_163 = arith.constant 0 : index
    %c6_164 = arith.constant 6 : index
    %c0_165 = arith.constant 0 : index
    %c0_166 = arith.constant 0 : index
    %125 = vector.load %arg11[%c0_163, %c6_164, %c0_165, %c0_166] : memref<1x9x32x8xf32, #tpu.memory_space<vmem>>, vector<1x1x32x8xf32>
    %126 = vector.shape_cast %125 : vector<1x1x32x8xf32> to vector<32x8xf32>
    %cst_167 = arith.constant dense<0.000000e+00> : vector<256x8xf32>
    %127 = tpu.matmul %124, %126, %cst_167 {dimension_numbers = #tpu.dot_dimension_numbers<[1], [0], [0], [1], [0, 0, 1, 1], [], []>} : vector<256x32xf32>, vector<32x8xf32>, vector<256x8xf32> -> vector<256x8xf32>
    %128 = arith.addf %122, %127 : vector<256x8xf32>
    %c0_168 = arith.constant 0 : index
    %c2_169 = arith.constant 2 : index
    %c8_170 = arith.constant 8 : index
    %c0_171 = arith.constant 0 : index
    %129 = vector.load %arg19[%c0_168, %c2_169, %c8_170, %c0_171] : memref<1x18x25x32xf32, #tpu.memory_space<vmem>>, vector<1x16x16x32xf32>
    %130 = vector.shape_cast %129 : vector<1x16x16x32xf32> to vector<256x32xf32>
    %c0_172 = arith.constant 0 : index
    %c7_173 = arith.constant 7 : index
    %c0_174 = arith.constant 0 : index
    %c0_175 = arith.constant 0 : index
    %131 = vector.load %arg11[%c0_172, %c7_173, %c0_174, %c0_175] : memref<1x9x32x8xf32, #tpu.memory_space<vmem>>, vector<1x1x32x8xf32>
    %132 = vector.shape_cast %131 : vector<1x1x32x8xf32> to vector<32x8xf32>
    %cst_176 = arith.constant dense<0.000000e+00> : vector<256x8xf32>
    %133 = tpu.matmul %130, %132, %cst_176 {dimension_numbers = #tpu.dot_dimension_numbers<[1], [0], [0], [1], [0, 0, 1, 1], [], []>} : vector<256x32xf32>, vector<32x8xf32>, vector<256x8xf32> -> vector<256x8xf32>
    %134 = arith.addf %128, %133 : vector<256x8xf32>
    %c0_177 = arith.constant 0 : index
    %c2_178 = arith.constant 2 : index
    %c9_179 = arith.constant 9 : index
    %c0_180 = arith.constant 0 : index
    %135 = vector.load %arg19[%c0_177, %c2_178, %c9_179, %c0_180] : memref<1x18x25x32xf32, #tpu.memory_space<vmem>>, vector<1x16x16x32xf32>
    %136 = vector.shape_cast %135 : vector<1x16x16x32xf32> to vector<256x32xf32>
    %c0_181 = arith.constant 0 : index
    %c8_182 = arith.constant 8 : index
    %c0_183 = arith.constant 0 : index
    %c0_184 = arith.constant 0 : index
    %137 = vector.load %arg11[%c0_181, %c8_182, %c0_183, %c0_184] : memref<1x9x32x8xf32, #tpu.memory_space<vmem>>, vector<1x1x32x8xf32>
    %138 = vector.shape_cast %137 : vector<1x1x32x8xf32> to vector<32x8xf32>
    %cst_185 = arith.constant dense<0.000000e+00> : vector<256x8xf32>
    %139 = tpu.matmul %136, %138, %cst_185 {dimension_numbers = #tpu.dot_dimension_numbers<[1], [0], [0], [1], [0, 0, 1, 1], [], []>} : vector<256x32xf32>, vector<32x8xf32>, vector<256x8xf32> -> vector<256x8xf32>
    %140 = arith.addf %134, %139 : vector<256x8xf32>
    %c0_186 = arith.constant 0 : index
    %c0_187 = arith.constant 0 : index
    %c0_188 = arith.constant 0 : index
    %141 = vector.load %arg12[%c0_186, %c0_187, %c0_188] : memref<1x1x8xf32, #tpu.memory_space<vmem>>, vector<1x1x8xf32>
    %142 = vector.shape_cast %141 : vector<1x1x8xf32> to vector<1x8xf32>
    %143 = vector.broadcast %142 : vector<1x8xf32> to vector<256x8xf32>
    %144 = arith.addf %140, %143 : vector<256x8xf32>
    %c0_189 = arith.constant 0 : index
    %c0_190 = arith.constant 0 : index
    %145 = vector.load %arg13[%c0_189, %c0_190] : memref<8x4xf32, #tpu.memory_space<vmem>>, vector<8x4xf32>
    %cst_191 = arith.constant dense<0.000000e+00> : vector<256x4xf32>
    %146 = tpu.matmul %144, %145, %cst_191 {dimension_numbers = #tpu.dot_dimension_numbers<[1], [0], [0], [1], [0, 0, 1, 1], [], []>} : vector<256x8xf32>, vector<8x4xf32>, vector<256x4xf32> -> vector<256x4xf32>
    %c0_192 = arith.constant 0 : index
    %c0_193 = arith.constant 0 : index
    %147 = vector.load %arg14[%c0_192, %c0_193] : memref<8x4xf32, #tpu.memory_space<vmem>>, vector<8x4xf32>
    %cst_194 = arith.constant dense<0.000000e+00> : vector<256x4xf32>
    %148 = tpu.matmul %144, %147, %cst_194 {dimension_numbers = #tpu.dot_dimension_numbers<[1], [0], [0], [1], [0, 0, 1, 1], [], []>} : vector<256x8xf32>, vector<8x4xf32>, vector<256x4xf32> -> vector<256x4xf32>
    %c0_195 = arith.constant 0 : index
    %c0_196 = arith.constant 0 : index
    %c0_197 = arith.constant 0 : index
    %149 = vector.load %arg15[%c0_195, %c0_196, %c0_197] : memref<1x1x4xf32, #tpu.memory_space<vmem>>, vector<1x1x4xf32>
    %150 = vector.shape_cast %149 : vector<1x1x4xf32> to vector<1x4xf32>
    %151 = math.tanh %146 : vector<256x4xf32>
    %152 = vector.broadcast %150 : vector<1x4xf32> to vector<256x4xf32>
    %153 = arith.mulf %152, %151 : vector<256x4xf32>
    %154 = arith.addf %11, %148 : vector<256x4xf32>
    %155 = math.exp %153 : vector<256x4xf32>
    %156 = arith.mulf %154, %155 : vector<256x4xf32>
    %157 = vector.shape_cast %156 : vector<256x4xf32> to vector<1x16x16x4xf32>
    %c0_198 = arith.constant 0 : index
    %c0_199 = arith.constant 0 : index
    %c0_200 = arith.constant 0 : index
    %c0_201 = arith.constant 0 : index
    %158 = vector.load %arg16[%c0_198, %c0_199, %c0_200, %c0_201] : memref<1x16x16x4xf32, #tpu.memory_space<vmem>>, vector<1x16x16x4xf32>
    tpu.vector_store %arg16[%c0_198, %c0_199, %c0_200, %c0_201], %157 {strides = array<i32>} : memref<1x16x16x4xf32, #tpu.memory_space<vmem>>, vector<1x16x16x4xf32>,
    %cst_202 = arith.constant dense<0.000000e+00> : vector<256xf32>
    %159 = vector.multi_reduction <add>, %153, %cst_202 [1] : vector<256x4xf32> to vector<256xf32>
    %160 = vector.shape_cast %159 : vector<256xf32> to vector<256x1xf32>
    %cst_203 = arith.constant dense<0.000000e+00> : vector<1xf32>
    %161 = vector.multi_reduction <add>, %160, %cst_203 [0] : vector<256x1xf32> to vector<1xf32>
    %162 = vector.shape_cast %161 : vector<1xf32> to vector<1x1xf32>
    %c0_204 = arith.constant 0 : index
    %c0_205 = arith.constant 0 : index
    %c0_206 = arith.constant 0 : index
    %163 = vector.load %arg17[%c0_204, %c0_205, %c0_206] : memref<1x1x128xf32, #tpu.memory_space<vmem>>, vector<1x1x128xf32>
    %c0_207 = arith.constant 0 : index
    %c0_208 = arith.constant 0 : index
    %c0_209 = arith.constant 0 : index
    %164 = vector.load %arg5[%c0_207, %c0_208, %c0_209] : memref<1x1x1xf32, #tpu.memory_space<vmem>>, vector<1x1x1xf32>
    %165 = vector.shape_cast %164 : vector<1x1x1xf32> to vector<1x1xf32>
    %166 = arith.addf %162, %165 : vector<1x1xf32>
    %167 = vector.shape_cast %166 : vector<1x1xf32> to vector<1x1x1xf32>
    %168 = vector.broadcast %167 : vector<1x1x1xf32> to vector<1x1x128xf32>
    %169 = arith.addf %163, %168 : vector<1x1x128xf32>
    %c0_210 = arith.constant 0 : index
    %c0_211 = arith.constant 0 : index
    %c0_212 = arith.constant 0 : index
    %170 = vector.load %arg17[%c0_210, %c0_211, %c0_212] : memref<1x1x128xf32, #tpu.memory_space<vmem>>, vector<1x1x128xf32>
    tpu.vector_store %arg17[%c0_210, %c0_211, %c0_212], %169 {strides = array<i32>} : memref<1x1x128xf32, #tpu.memory_space<vmem>>, vector<1x1x128xf32>,
    return
  }
  func.func @transform_0(%arg0: i32, %arg1: i32) -> (i32, i32, i32, i32) {
    %c0_i32 = arith.constant 0 : i32
    %c0_i32_0 = arith.constant 0 : i32
    %c0_i32_1 = arith.constant 0 : i32
    %c0_i32_2 = arith.constant 0 : i32
    return %arg0, %c0_i32, %c0_i32_0, %c0_i32_1 : i32, i32, i32, i32
  }
  func.func @transform_1(%arg0: i32, %arg1: i32) -> (i32, i32, i32) {
    %c0_i32 = arith.constant 0 : i32
    %c0_i32_0 = arith.constant 0 : i32
    %c0_i32_1 = arith.constant 0 : i32
    return %arg1, %c0_i32, %c0_i32_0 : i32, i32, i32
  }
  func.func @transform_2(%arg0: i32, %arg1: i32) -> (i32, i32, i32) {
    %c0_i32 = arith.constant 0 : i32
    %c0_i32_0 = arith.constant 0 : i32
    %c0_i32_1 = arith.constant 0 : i32
    return %arg1, %c0_i32, %c0_i32_0 : i32, i32, i32
  }
  func.func @transform_3(%arg0: i32, %arg1: i32) -> (i32, i32, i32) {
    %c0_i32 = arith.constant 0 : i32
    %c0_i32_0 = arith.constant 0 : i32
    %c0_i32_1 = arith.constant 0 : i32
    return %arg1, %c0_i32, %c0_i32_0 : i32, i32, i32
  }
  func.func @transform_4(%arg0: i32, %arg1: i32) -> (i32, i32, i32) {
    %c0_i32 = arith.constant 0 : i32
    %c0_i32_0 = arith.constant 0 : i32
    %c0_i32_1 = arith.constant 0 : i32
    return %arg1, %c0_i32, %c0_i32_0 : i32, i32, i32
  }
  func.func @transform_5(%arg0: i32, %arg1: i32) -> (i32, i32, i32, i32) {
    %c0_i32 = arith.constant 0 : i32
    %c0_i32_0 = arith.constant 0 : i32
    %c0_i32_1 = arith.constant 0 : i32
    %c0_i32_2 = arith.constant 0 : i32
    return %arg1, %c0_i32, %c0_i32_0, %c0_i32_1 : i32, i32, i32, i32
  }
  func.func @transform_6(%arg0: i32, %arg1: i32) -> (i32, i32, i32) {
    %c0_i32 = arith.constant 0 : i32
    %c0_i32_0 = arith.constant 0 : i32
    %c0_i32_1 = arith.constant 0 : i32
    return %arg1, %c0_i32, %c0_i32_0 : i32, i32, i32
  }
  func.func @transform_7(%arg0: i32, %arg1: i32) -> (i32, i32, i32) {
    %c0_i32 = arith.constant 0 : i32
    %c0_i32_0 = arith.constant 0 : i32
    %c0_i32_1 = arith.constant 0 : i32
    return %arg1, %c0_i32, %c0_i32_0 : i32, i32, i32
  }
  func.func @transform_8(%arg0: i32, %arg1: i32) -> (i32, i32, i32) {
    %c0_i32 = arith.constant 0 : i32
    %c0_i32_0 = arith.constant 0 : i32
    %c0_i32_1 = arith.constant 0 : i32
    return %arg1, %c0_i32, %c0_i32_0 : i32, i32, i32
  }
  func.func @transform_9(%arg0: i32, %arg1: i32) -> (i32, i32, i32, i32) {
    %c0_i32 = arith.constant 0 : i32
    %c0_i32_0 = arith.constant 0 : i32
    %c0_i32_1 = arith.constant 0 : i32
    %c0_i32_2 = arith.constant 0 : i32
    return %arg1, %c0_i32, %c0_i32_0, %c0_i32_1 : i32, i32, i32, i32
  }
  func.func @transform_10(%arg0: i32, %arg1: i32) -> (i32, i32, i32) {
    %c0_i32 = arith.constant 0 : i32
    %c0_i32_0 = arith.constant 0 : i32
    %c0_i32_1 = arith.constant 0 : i32
    return %arg1, %c0_i32, %c0_i32_0 : i32, i32, i32
  }
  func.func @transform_11(%arg0: i32, %arg1: i32) -> (i32, i32) {
    %c0_i32 = arith.constant 0 : i32
    %c0_i32_0 = arith.constant 0 : i32
    %c0_i32_1 = arith.constant 0 : i32
    return %c0_i32, %c0_i32_0 : i32, i32
  }
  func.func @transform_12(%arg0: i32, %arg1: i32) -> (i32, i32) {
    %c0_i32 = arith.constant 0 : i32
    %c0_i32_0 = arith.constant 0 : i32
    %c0_i32_1 = arith.constant 0 : i32
    return %c0_i32, %c0_i32_0 : i32, i32
  }
  func.func @transform_13(%arg0: i32, %arg1: i32) -> (i32, i32, i32) {
    %c0_i32 = arith.constant 0 : i32
    %c0_i32_0 = arith.constant 0 : i32
    %c0_i32_1 = arith.constant 0 : i32
    return %arg1, %c0_i32, %c0_i32_0 : i32, i32, i32
  }
  func.func @transform_14(%arg0: i32, %arg1: i32) -> (i32, i32, i32, i32) {
    %c0_i32 = arith.constant 0 : i32
    %c0_i32_0 = arith.constant 0 : i32
    %c0_i32_1 = arith.constant 0 : i32
    %c0_i32_2 = arith.constant 0 : i32
    return %arg0, %c0_i32, %c0_i32_0, %c0_i32_1 : i32, i32, i32, i32
  }
  func.func @transform_15(%arg0: i32, %arg1: i32) -> (i32, i32, i32) {
    %c0_i32 = arith.constant 0 : i32
    %c0_i32_0 = arith.constant 0 : i32
    %c0_i32_1 = arith.constant 0 : i32
    return %arg0, %c0_i32, %c0_i32_0 : i32, i32, i32
  }
}

</mosaic_0001>

<bundles_post_ra>
// kernel: _glow_forward_jit.1
= control target key start
LH: loop header
LB: loop body
LE: loop exit
PB: predicated region body
PF: predicated region fallthrough
CT: control target
= control target key end

     0   :  { %s13458_s18 = smov 0   ;;  %s13460_s19 = smov 0   ;;  %s16431_s0 = inlined_call_operand.vmem [shape: f32[2,16,16,4], index: 0, kind: input, shape index: {}]   ;;  %s16432_s1 = inlined_call_operand.vmem [shape: f32[2,4,4], index: 1, kind: input, shape index: {}]   ;;  %s16433_s2 = inlined_call_operand.vmem [shape: f32[2,1,4], index: 2, kind: input, shape index: {}]   ;;  %s16434_s3 = inlined_call_operand.vmem [shape: f32[2,1,1], index: 3, kind: input, shape index: {}]   ;;  %s16435_s4 = inlined_call_operand.vmem [shape: f32[2,1,4], index: 4, kind: input, shape index: {}]   ;;  %s16436_s5 = inlined_call_operand.vmem [shape: f32[2,9,4,32], index: 5, kind: input, shape index: {}]   ;;  %s16437_s6 = inlined_call_operand.vmem [shape: f32[2,32,32], index: 6, kind: input, shape index: {}]   ;;  %s16438_s7 = inlined_call_operand.vmem [shape: f32[2,1,32], index: 7, kind: input, shape index: {}]   ;;  %s16439_s8 = inlined_call_operand.vmem [shape: f32[2,1,32], index: 8, kind: input, shape index: {}]   ;;  %s16440_s9 = inlined_call_operand.vmem [shape: f32[2,9,32,8], index: 9, kind: input, shape index: {}]   ;;  %s16441_s10 = inlined_call_operand.vmem [shape: f32[2,1,8], index: 10, kind: input, shape index: {}]   ;;  %s16442_s11 = inlined_call_operand.vmem [shape: f32[8,4], index: 11, kind: input, shape index: {}]   ;;  %s16443_s12 = inlined_call_operand.vmem [shape: f32[8,4], index: 12, kind: input, shape index: {}]   ;;  %s16444_s13 = inlined_call_operand.vmem [shape: f32[2,1,4], index: 13, kind: input, shape index: {}]   ;;  %s16445_s14 = inlined_call_operand.vmem [shape: f32[2,16,16,4], index: 14, kind: output, shape index: {0}]   ;;  %s16446_s15 = inlined_call_operand.vmem [shape: f32[2,1,128], index: 15, kind: output, shape index: {1}]  }
   0x1   :  { %16608 = sst [smem:[#allocation78_spill]] %s16431_s0  ;;  %s13462_s20 = smov 0  }
   0x2   :  { %16609 = sst [smem:[#allocation79_spill]] %s16432_s1  ;;  %s13464_s21 = smov 0  }
   0x3   :  { %16610 = sst [smem:[#allocation80_spill]] %s16437_s6  ;;  %s13466_s22 = smov 0  }
   0x4   :  { %16611 = sst [smem:[#allocation81_spill]] %s16442_s11 }
   0x5   :  { %16612 = sst [smem:[#allocation82_spill]] %s16443_s12 }
   0x6   :  { %16613 = sst [smem:[#allocation83_spill]] %s16446_s15 }
   0x7 LB: > { %16614 = sst [smem:[#allocation4_spill]] %s13358_s18  ;;  %s35_s23 = sadd.s32 1, %s13366_s20  ;;  %s13374_s22 = sphi %s13466_s22, %s26_s22   ;;  %s13370_s21 = sphi %s13464_s21, %s16859_s21   ;;  %s13366_s20 = sphi %s13462_s20, %s16858_s20   ;;  %s13362_s19 = sphi %s13460_s19, %s16857_s19   ;;  %s13358_s18 = sphi %s13458_s18, %s16856_s18  }
   0x8   : > { %16615 = sst [smem:[#allocation5_spill]] %s13366_s20  ;;  %s38_s24 = sadd.s32 1, %s13370_s21 }
   0x9   : > { %16616 = sst [smem:[#allocation6_spill]] %s13370_s21  ;;  %p36_p0 = scmp.ge.s32.totalorder %s35_s23, 2 }
   0xa   : > { %16617 = sst [smem:[#allocation7_spill]] %s13374_s22  ;;  %p9879_p1 = scmp.ge.s32.totalorder %s13374_s22, 1 }
   0xb   : > { %p547_p2 = scmp.lt.s32.totalorder %s13374_s22, 5  ;;  %s16861_s23 = smov (%p36_p0, %s35_s23), 0 }
   0xc   : > { %16618 = sst [smem:[#allocation8_spill]] %s16861_s23  ;;  %s16863_s24 = smov (!%p36_p0, %s38_s24), %s13370_s21 }
   0xd   : > { %p548_p3 = pnand %p9879_p1, %p547_p2  ;;  %p40_p4 = scmp.ge.s32.totalorder %s16863_s24, 2 }
   0xf   : > { %s16865_s24 = smov (%p40_p4, %s16863_s24), 0  ;;  %551 = sbr.rel (%p548_p3) target bundleno = 2619 (0xa3b), region = 76 }
  0x10   : > { %16619 = sst [smem:[#allocation9_spill]] %s16865_s24 }
  0x16   : > { %p638_p5 = scmp.lt.s32.totalorder %s13362_s19, 1  ;;  %p643_p6 = scmp.lt.s32.totalorder %s13358_s18, 1 }
  0x17   : > { %s16620_s15 = sld [smem:[#allocation83_spill]]  ;;  %s16622_s0 = sld [smem:[#allocation78_spill]] }
  0x18   : > { %s16867_s19 = smov (!%p638_p5, %s13362_s19), 1  ;;  %s16624_s1 = sld [smem:[#allocation79_spill]] }
  0x19   : > { %s13492_s25 = scalar_select %p643_p6, %s13358_s18, 1 }
  0x1a   : > { %s10652_s26 = sshll.u32 %s16867_s19, 8  ;;  %s16625_s6 = sld [smem:[#allocation80_spill]] }
  0x1b   : > { %s9882_s24 = sshll.u32 %s13492_s25, 2  ;;  %s13163_s16 = smul.u32 36, %s13492_s25 }
  0x1c   : > { %s13164_s28 = smul.u32 288, %s13492_s25  ;;  %s13554_s12 = scalar_lea.vmem %s16445_s14, %s10652_s26 }
  0x1d   : > { %s13497_s29 = scalar_lea.vmem %s16620_s15, %s16867_s19  ;;  %s13502_s17 = scalar_lea.vmem %s16622_s0, %s10652_s26 }
  0x1e   : > { %16621 = sst [smem:[#allocation10_spill]] %s13497_s29  ;;  %s13508_s20 = scalar_lea.vmem %s16624_s1, %s9882_s24 }
  0x1f   : > { %16623 = sst [smem:[#allocation11_spill]] %s13502_s17  ;;  %s10653_s0 = sshll.u32 %s13492_s25, 5 }
  0x20   : > { %s13527_s21 = scalar_lea.vmem %s16625_s6, %s10653_s0  ;;  %s13536_s18 = scalar_lea.vmem %s16436_s5, %s13163_s16 }
  0x21   : > { %s671_s15 = scalar_lea.vmem %s16439_s8, %s13492_s25  ;;  %s679_s29 = scalar_lea.vmem %s16441_s10, %s13492_s25 }
  0x22   : > { %s682_s6 = scalar_lea.vmem %s16444_s13, %s13492_s25  ;;  %s13559_s22 = scalar_lea.vmem %s16440_s9, %s13164_s28 }
  0x23   : > { %s16626_s19 = sld [smem:[#allocation4_spill]] }
  0x29   : > { %p9889_p7 = scmp.ne.s32.totalorder %s16626_s19, 0 }
  0x2a   : > { %vm695_vm0 = vcmask (!%p9889_p7), 31744   ;;  %s16627_s1 = sld [smem:[#allocation11_spill]] (!%p9889_p7)  ;;  %vm699_vm1 = vcmask (!%p9889_p7), 24576   ;;  %vm769_vm2 = vcmask (!%p9889_p7), 261120   ;;  %v13376_v2 = vmov (!%p9889_p7), 0.0   ;;  %s16628_s26 = sld [smem:[#allocation10_spill]] (!%p9889_p7) }
  0x2b   : > { %694 = sbr.rel (%p9889_p7) target bundleno = 132 (0x84), region = 80  ;;  %696 = vst.msk [vmem:[#allocation2] sm:$0xff] (!%p9889_p7), %vm695_vm0, %v13376_v2  ;;  %697 = vst.msk [vmem:[#allocation2 + $0x8] sm:$0xff] (!%p9889_p7), %vm695_vm0, %v13376_v2  ;;  %vm773_vm3 = vcmask (!%p9889_p7), 253952  }
  0x2c   : > { %698 = vst.msk [vmem:[#allocation2 + $0x10] sm:$0xff] (!%p9889_p7), %vm695_vm0, %v13376_v2  ;;  %701 = vst.msk [vmem:[#allocation2 + $0x20] sm:$0xff] (!%p9889_p7), %vm695_vm0, %v13376_v2 }
  0x2d   : > { %702 = vst.msk [vmem:[#allocation2 + $0x28] sm:$0xff] (!%p9889_p7), %vm695_vm0, %v13376_v2  ;;  %703 = vst.msk [vmem:[#allocation2 + $0x30] sm:$0xff] (!%p9889_p7), %vm695_vm0, %v13376_v2 }
  0x2e   : > { %705 = vst.msk [vmem:[#allocation2 + $0x40] sm:$0xff] (!%p9889_p7), %vm695_vm0, %v13376_v2  ;;  %706 = vst.msk [vmem:[#allocation2 + $0x48] sm:$0xff] (!%p9889_p7), %vm695_vm0, %v13376_v2 }
  0x2f   : > { %707 = vst.msk [vmem:[#allocation2 + $0x50] sm:$0xff] (!%p9889_p7), %vm695_vm0, %v13376_v2  ;;  %709 = vst.msk [vmem:[#allocation2 + $0x60] sm:$0xff] (!%p9889_p7), %vm695_vm0, %v13376_v2 }
  0x30   : > { %v13563_v0 = vld [vmem:[%s16627_s1] sm:$0xff] (!%p9889_p7)  ;;  %v13566_v1 = vld [vmem:[%s16627_s1 + $0x8] sm:$0xff] (!%p9889_p7)  ;;  %710 = vst.msk [vmem:[#allocation2 + $0x68] sm:$0xff] (!%p9889_p7), %vm695_vm0, %v13376_v2  ;;  %711 = vst.msk [vmem:[#allocation2 + $0x70] sm:$0xff] (!%p9889_p7), %vm695_vm0, %v13376_v2 }
  0x31   : > { %713 = vst.msk [vmem:[#allocation2 + $0x80] sm:$0xff] (!%p9889_p7), %vm695_vm0, %v13376_v2  ;;  %714 = vst.msk [vmem:[#allocation2 + $0x88] sm:$0xff] (!%p9889_p7), %vm695_vm0, %v13376_v2  ;;  %v845_v3 = vld [vmem:[%s16627_s1 + $0x10] sm:$0xff] (!%p9889_p7)  ;;  %v846_v4 = vld [vmem:[%s16627_s1 + $0x18] sm:$0xff] (!%p9889_p7) }
  0x32   : > { %715 = vst.msk [vmem:[#allocation2 + $0x90] sm:$0xff] %vm695_vm0, %v13376_v2  ;;  %717 = vst.msk [vmem:[#allocation2 + $0xa0] sm:$0xff] %vm695_vm0, %v13376_v2  ;;  %v847_v5 = vld [vmem:[%s16627_s1 + $0x20] sm:$0xff]  ;;  %v848_v6 = vld [vmem:[%s16627_s1 + $0x28] sm:$0xff] }
  0x33   : > { %718 = vst.msk [vmem:[#allocation2 + $0xa8] sm:$0xff] %vm695_vm0, %v13376_v2  ;;  %719 = vst.msk [vmem:[#allocation2 + $0xb0] sm:$0xff] %vm695_vm0, %v13376_v2  ;;  %v849_v7 = vld [vmem:[%s16627_s1 + $0x30] sm:$0xff]  ;;  %v850_v8 = vld [vmem:[%s16627_s1 + $0x38] sm:$0xff] }
  0x34   : > { %721 = vst.msk [vmem:[#allocation2 + $0xc0] sm:$0xff] %vm695_vm0, %v13376_v2  ;;  %722 = vst.msk [vmem:[#allocation2 + $0xc8] sm:$0xff] %vm695_vm0, %v13376_v2  ;;  %v851_v9 = vld [vmem:[%s16627_s1 + $0x40] sm:$0xff]  ;;  %v852_v10 = vld [vmem:[%s16627_s1 + $0x48] sm:$0xff] }
  0x35   : > { %723 = vst.msk [vmem:[#allocation2 + $0xd0] sm:$0xff] %vm695_vm0, %v13376_v2  ;;  %725 = vst.msk [vmem:[#allocation2 + $0xe0] sm:$0xff] %vm695_vm0, %v13376_v2  ;;  %v853_v11 = vld [vmem:[%s16627_s1 + $0x50] sm:$0xff]  ;;  %v854_v12 = vld [vmem:[%s16627_s1 + $0x58] sm:$0xff] }
  0x36   : > { %726 = vst.msk [vmem:[#allocation2 + $0xe8] sm:$0xff] %vm695_vm0, %v13376_v2  ;;  %727 = vst.msk [vmem:[#allocation2 + $0xf0] sm:$0xff] %vm695_vm0, %v13376_v2  ;;  %v855_v13 = vld [vmem:[%s16627_s1 + $0x60] sm:$0xff]  ;;  %v856_v14 = vld [vmem:[%s16627_s1 + $0x68] sm:$0xff] }
  0x37   : > { %729 = vst.msk [vmem:[#allocation2 + $0x100] sm:$0xff] %vm695_vm0, %v13376_v2  ;;  %730 = vst.msk [vmem:[#allocation2 + $0x108] sm:$0xff] %vm695_vm0, %v13376_v2  ;;  %v857_v15 = vld [vmem:[%s16627_s1 + $0x70] sm:$0xff]  ;;  %v858_v16 = vld [vmem:[%s16627_s1 + $0x78] sm:$0xff] }
  0x38   : > { %731 = vst.msk [vmem:[#allocation2 + $0x110] sm:$0xff] %vm695_vm0, %v13376_v2  ;;  %733 = vst.msk [vmem:[#allocation2 + $0x120] sm:$0xff] %vm695_vm0, %v13376_v2  ;;  %v859_v17 = vld [vmem:[%s16627_s1 + $0x80] sm:$0xff]  ;;  %v860_v18 = vld [vmem:[%s16627_s1 + $0x88] sm:$0xff] }
  0x39   : > { %734 = vst.msk [vmem:[#allocation2 + $0x128] sm:$0xff] %vm695_vm0, %v13376_v2  ;;  %735 = vst.msk [vmem:[#allocation2 + $0x130] sm:$0xff] %vm695_vm0, %v13376_v2  ;;  %v861_v19 = vld [vmem:[%s16627_s1 + $0x90] sm:$0xff]  ;;  %v862_v20 = vld [vmem:[%s16627_s1 + $0x98] sm:$0xff] }
  0x3a   : > { %737 = vst.msk [vmem:[#allocation2 + $0x140] sm:$0xff] %vm695_vm0, %v13376_v2  ;;  %738 = vst.msk [vmem:[#allocation2 + $0x148] sm:$0xff] %vm695_vm0, %v13376_v2  ;;  %v863_v21 = vld [vmem:[%s16627_s1 + $0xa0] sm:$0xff]  ;;  %v864_v22 = vld [vmem:[%s16627_s1 + $0xa8] sm:$0xff] }
  0x3b   : > { %739 = vst.msk [vmem:[#allocation2 + $0x150] sm:$0xff] %vm695_vm0, %v13376_v2  ;;  %741 = vst.msk [vmem:[#allocation2 + $0x160] sm:$0xff] %vm695_vm0, %v13376_v2  ;;  %v865_v23 = vld [vmem:[%s16627_s1 + $0xb0] sm:$0xff]  ;;  %v866_v24 = vld [vmem:[%s16627_s1 + $0xb8] sm:$0xff] }
  0x3c   : > { %742 = vst.msk [vmem:[#allocation2 + $0x168] sm:$0xff] %vm695_vm0, %v13376_v2  ;;  %743 = vst.msk [vmem:[#allocation2 + $0x170] sm:$0xff] %vm695_vm0, %v13376_v2  ;;  %v867_v25 = vld [vmem:[%s16627_s1 + $0xc0] sm:$0xff]  ;;  %v868_v26 = vld [vmem:[%s16627_s1 + $0xc8] sm:$0xff] }
  0x3d   : > { %745 = vst.msk [vmem:[#allocation2 + $0x180] sm:$0xff] %vm695_vm0, %v13376_v2  ;;  %746 = vst.msk [vmem:[#allocation2 + $0x188] sm:$0xff] %vm695_vm0, %v13376_v2  ;;  %v869_v27 = vld [vmem:[%s16627_s1 + $0xd0] sm:$0xff]  ;;  %v870_v28 = vld [vmem:[%s16627_s1 + $0xd8] sm:$0xff] }
  0x3e   : > { %747 = vst.msk [vmem:[#allocation2 + $0x190] sm:$0xff] %vm695_vm0, %v13376_v2  ;;  %749 = vst.msk [vmem:[#allocation2 + $0x1a0] sm:$0xff] %vm695_vm0, %v13376_v2  ;;  %v871_v29 = vld [vmem:[%s16627_s1 + $0xe0] sm:$0xff]  ;;  %v872_v30 = vld [vmem:[%s16627_s1 + $0xe8] sm:$0xff] }
  0x3f   : > { %750 = vst.msk [vmem:[#allocation2 + $0x1a8] sm:$0xff] %vm695_vm0, %v13376_v2  ;;  %751 = vst.msk [vmem:[#allocation2 + $0x1b0] sm:$0xff] %vm695_vm0, %v13376_v2  ;;  %v873_v31 = vld [vmem:[%s16627_s1 + $0xf0] sm:$0xff]  ;;  %v874_v32 = vld [vmem:[%s16627_s1 + $0xf8] sm:$0xff] }
  0x40   : > { %753 = vst.msk [vmem:[#allocation2 + $0x1c0] sm:$0xff] %vm695_vm0, %v13376_v2  ;;  %754 = vst.msk [vmem:[#allocation2 + $0x1c8] sm:$0xff] %vm695_vm0, %v13376_v2 }
  0x41   : > { %755 = vst.msk [vmem:[#allocation2 + $0x1d0] sm:$0xff] %vm695_vm0, %v13376_v2  ;;  %757 = vst.msk [vmem:[#allocation2 + $0x1e0] sm:$0xff] %vm695_vm0, %v13376_v2 }
  0x42   : > { %758 = vst.msk [vmem:[#allocation2 + $0x1e8] sm:$0xff] %vm695_vm0, %v13376_v2  ;;  %759 = vst.msk [vmem:[#allocation2 + $0x1f0] sm:$0xff] %vm695_vm0, %v13376_v2 }
  0x43   : > { %761 = vst.msk [vmem:[#allocation2 + $0x200] sm:$0xff] %vm695_vm0, %v13376_v2  ;;  %762 = vst.msk [vmem:[#allocation2 + $0x208] sm:$0xff] %vm695_vm0, %v13376_v2 }
  0x44   : > { %763 = vst.msk [vmem:[#allocation2 + $0x210] sm:$0xff] %vm695_vm0, %v13376_v2  ;;  %765 = vst.msk [vmem:[#allocation2 + $0x220] sm:$0xff] %vm695_vm0, %v13376_v2 }
  0x45   : > { %766 = vst.msk [vmem:[#allocation2 + $0x228] sm:$0xff] %vm695_vm0, %v13376_v2  ;;  %767 = vst.msk [vmem:[#allocation2 + $0x230] sm:$0xff] %vm695_vm0, %v13376_v2 }
  0x46   : > { %907 = vst [vmem:[%s16628_s26] sm:$0x1] %v13376_v2  ;;  %700 = vst.msk [vmem:[#allocation2 + $0x18] sm:$0x1] %vm699_vm1, %v13376_v2 }
  0x47   : > { %704 = vst.msk [vmem:[#allocation2 + $0x38] sm:$0x1] %vm699_vm1, %v13376_v2  ;;  %708 = vst.msk [vmem:[#allocation2 + $0x58] sm:$0x1] %vm699_vm1, %v13376_v2 }
  0x48   : > { %712 = vst.msk [vmem:[#allocation2 + $0x78] sm:$0x1] %vm699_vm1, %v13376_v2  ;;  %716 = vst.msk [vmem:[#allocation2 + $0x98] sm:$0x1] %vm699_vm1, %v13376_v2 }
  0x49   : > { %720 = vst.msk [vmem:[#allocation2 + $0xb8] sm:$0x1] %vm699_vm1, %v13376_v2  ;;  %724 = vst.msk [vmem:[#allocation2 + $0xd8] sm:$0x1] %vm699_vm1, %v13376_v2 }
  0x4a   : > { %728 = vst.msk [vmem:[#allocation2 + $0xf8] sm:$0x1] %vm699_vm1, %v13376_v2  ;;  %732 = vst.msk [vmem:[#allocation2 + $0x118] sm:$0x1] %vm699_vm1, %v13376_v2 }
  0x4b   : > { %736 = vst.msk [vmem:[#allocation2 + $0x138] sm:$0x1] %vm699_vm1, %v13376_v2  ;;  %740 = vst.msk [vmem:[#allocation2 + $0x158] sm:$0x1] %vm699_vm1, %v13376_v2 }
  0x4c   : > { %744 = vst.msk [vmem:[#allocation2 + $0x178] sm:$0x1] %vm699_vm1, %v13376_v2  ;;  %748 = vst.msk [vmem:[#allocation2 + $0x198] sm:$0x1] %vm699_vm1, %v13376_v2 }
  0x4d   : > { %752 = vst.msk [vmem:[#allocation2 + $0x1b8] sm:$0x1] %vm699_vm1, %v13376_v2  ;;  %756 = vst.msk [vmem:[#allocation2 + $0x1d8] sm:$0x1] %vm699_vm1, %v13376_v2 }
  0x4e   : > { %760 = vst.msk [vmem:[#allocation2 + $0x1f8] sm:$0x1] %vm699_vm1, %v13376_v2  ;;  %764 = vst.msk [vmem:[#allocation2 + $0x218] sm:$0x1] %vm699_vm1, %v13376_v2 }
  0x4f   : > { %768 = vst.msk [vmem:[#allocation2 + $0x238] sm:$0x1] %vm699_vm1, %v13376_v2 }
  0x50   : > { %770 = vst.msk [vmem:[#allocation3] sm:$0xff] %vm769_vm2, %v13376_v2  ;;  %771 = vst.msk [vmem:[#allocation3 + $0x8] sm:$0xff] %vm769_vm2, %v13376_v2 }
  0x51   : > { %772 = vst.msk [vmem:[#allocation3 + $0x10] sm:$0xff] %vm769_vm2, %v13376_v2  ;;  %775 = vst.msk [vmem:[#allocation3 + $0x20] sm:$0xff] %vm769_vm2, %v13376_v2 }
  0x52   : > { %776 = vst.msk [vmem:[#allocation3 + $0x28] sm:$0xff] %vm769_vm2, %v13376_v2  ;;  %777 = vst.msk [vmem:[#allocation3 + $0x30] sm:$0xff] %vm769_vm2, %v13376_v2 }
  0x53   : > { %779 = vst.msk [vmem:[#allocation3 + $0x40] sm:$0xff] %vm769_vm2, %v13376_v2  ;;  %780 = vst.msk [vmem:[#allocation3 + $0x48] sm:$0xff] %vm769_vm2, %v13376_v2 }
  0x54   : > { %781 = vst.msk [vmem:[#allocation3 + $0x50] sm:$0xff] %vm769_vm2, %v13376_v2  ;;  %783 = vst.msk [vmem:[#allocation3 + $0x60] sm:$0xff] %vm769_vm2, %v13376_v2 }
  0x55   : > { %784 = vst.msk [vmem:[#allocation3 + $0x68] sm:$0xff] %vm769_vm2, %v13376_v2  ;;  %785 = vst.msk [vmem:[#allocation3 + $0x70] sm:$0xff] %vm769_vm2, %v13376_v2 }
  0x56   : > { %787 = vst.msk [vmem:[#allocation3 + $0x80] sm:$0xff] %vm769_vm2, %v13376_v2  ;;  %788 = vst.msk [vmem:[#allocation3 + $0x88] sm:$0xff] %vm769_vm2, %v13376_v2 }
  0x57   : > { %789 = vst.msk [vmem:[#allocation3 + $0x90] sm:$0xff] %vm769_vm2, %v13376_v2  ;;  %791 = vst.msk [vmem:[#allocation3 + $0xa0] sm:$0xff] %vm769_vm2, %v13376_v2 }
  0x58   : > { %792 = vst.msk [vmem:[#allocation3 + $0xa8] sm:$0xff] %vm769_vm2, %v13376_v2  ;;  %793 = vst.msk [vmem:[#allocation3 + $0xb0] sm:$0xff] %vm769_vm2, %v13376_v2 }
  0x59   : > { %795 = vst.msk [vmem:[#allocation3 + $0xc0] sm:$0xff] %vm769_vm2, %v13376_v2  ;;  %796 = vst.msk [vmem:[#allocation3 + $0xc8] sm:$0xff] %vm769_vm2, %v13376_v2 }
  0x5a   : > { %797 = vst.msk [vmem:[#allocation3 + $0xd0] sm:$0xff] %vm769_vm2, %v13376_v2  ;;  %799 = vst.msk [vmem:[#allocation3 + $0xe0] sm:$0xff] %vm769_vm2, %v13376_v2 }
  0x5b   : > { %800 = vst.msk [vmem:[#allocation3 + $0xe8] sm:$0xff] %vm769_vm2, %v13376_v2  ;;  %801 = vst.msk [vmem:[#allocation3 + $0xf0] sm:$0xff] %vm769_vm2, %v13376_v2 }
  0x5c   : > { %803 = vst.msk [vmem:[#allocation3 + $0x100] sm:$0xff] %vm769_vm2, %v13376_v2  ;;  %804 = vst.msk [vmem:[#allocation3 + $0x108] sm:$0xff] %vm769_vm2, %v13376_v2 }
  0x5d   : > { %805 = vst.msk [vmem:[#allocation3 + $0x110] sm:$0xff] %vm769_vm2, %v13376_v2  ;;  %807 = vst.msk [vmem:[#allocation3 + $0x120] sm:$0xff] %vm769_vm2, %v13376_v2 }
  0x5e   : > { %808 = vst.msk [vmem:[#allocation3 + $0x128] sm:$0xff] %vm769_vm2, %v13376_v2  ;;  %809 = vst.msk [vmem:[#allocation3 + $0x130] sm:$0xff] %vm769_vm2, %v13376_v2 }
  0x5f   : > { %811 = vst.msk [vmem:[#allocation3 + $0x140] sm:$0xff] %vm769_vm2, %v13376_v2  ;;  %812 = vst.msk [vmem:[#allocation3 + $0x148] sm:$0xff] %vm769_vm2, %v13376_v2 }
  0x60   : > { %813 = vst.msk [vmem:[#allocation3 + $0x150] sm:$0xff] %vm769_vm2, %v13376_v2  ;;  %815 = vst.msk [vmem:[#allocation3 + $0x160] sm:$0xff] %vm769_vm2, %v13376_v2 }
  0x61   : > { %816 = vst.msk [vmem:[#allocation3 + $0x168] sm:$0xff] %vm769_vm2, %v13376_v2  ;;  %817 = vst.msk [vmem:[#allocation3 + $0x170] sm:$0xff] %vm769_vm2, %v13376_v2 }
  0x62   : > { %819 = vst.msk [vmem:[#allocation3 + $0x180] sm:$0xff] %vm769_vm2, %v13376_v2  ;;  %820 = vst.msk [vmem:[#allocation3 + $0x188] sm:$0xff] %vm769_vm2, %v13376_v2 }
  0x63   : > { %821 = vst.msk [vmem:[#allocation3 + $0x190] sm:$0xff] %vm769_vm2, %v13376_v2  ;;  %823 = vst.msk [vmem:[#allocation3 + $0x1a0] sm:$0xff] %vm769_vm2, %v13376_v2 }
  0x64   : > { %824 = vst.msk [vmem:[#allocation3 + $0x1a8] sm:$0xff] %vm769_vm2, %v13376_v2  ;;  %825 = vst.msk [vmem:[#allocation3 + $0x1b0] sm:$0xff] %vm769_vm2, %v13376_v2 }
  0x65   : > { %827 = vst.msk [vmem:[#allocation3 + $0x1c0] sm:$0xff] %vm769_vm2, %v13376_v2  ;;  %828 = vst.msk [vmem:[#allocation3 + $0x1c8] sm:$0xff] %vm769_vm2, %v13376_v2 }
  0x66   : > { %829 = vst.msk [vmem:[#allocation3 + $0x1d0] sm:$0xff] %vm769_vm2, %v13376_v2  ;;  %831 = vst.msk [vmem:[#allocation3 + $0x1e0] sm:$0xff] %vm769_vm2, %v13376_v2 }
  0x67   : > { %832 = vst.msk [vmem:[#allocation3 + $0x1e8] sm:$0xff] %vm769_vm2, %v13376_v2  ;;  %833 = vst.msk [vmem:[#allocation3 + $0x1f0] sm:$0xff] %vm769_vm2, %v13376_v2 }
  0x68   : > { %835 = vst.msk [vmem:[#allocation3 + $0x200] sm:$0xff] %vm769_vm2, %v13376_v2  ;;  %836 = vst.msk [vmem:[#allocation3 + $0x208] sm:$0xff] %vm769_vm2, %v13376_v2 }
  0x69   : > { %837 = vst.msk [vmem:[#allocation3 + $0x210] sm:$0xff] %vm769_vm2, %v13376_v2  ;;  %839 = vst.msk [vmem:[#allocation3 + $0x220] sm:$0xff] %vm769_vm2, %v13376_v2 }
  0x6a   : > { %840 = vst.msk [vmem:[#allocation3 + $0x228] sm:$0xff] %vm769_vm2, %v13376_v2  ;;  %841 = vst.msk [vmem:[#allocation3 + $0x230] sm:$0xff] %vm769_vm2, %v13376_v2 }
  0x6b   : > { %875 = vst.msk [vmem:[%s13554_s12] sm:$0xff] %vm695_vm0, %v13563_v0  ;;  %876 = vst.msk [vmem:[%s13554_s12 + $0x8] sm:$0xff] %vm695_vm0, %v13566_v1 }
  0x6c   : > { %774 = vst.msk [vmem:[#allocation3 + $0x18] sm:$0x1] %vm773_vm3, %v13376_v2  ;;  %778 = vst.msk [vmem:[#allocation3 + $0x38] sm:$0x1] %vm773_vm3, %v13376_v2 }
  0x6d   : > { %782 = vst.msk [vmem:[#allocation3 + $0x58] sm:$0x1] %vm773_vm3, %v13376_v2  ;;  %786 = vst.msk [vmem:[#allocation3 + $0x78] sm:$0x1] %vm773_vm3, %v13376_v2 }
  0x6e   : > { %790 = vst.msk [vmem:[#allocation3 + $0x98] sm:$0x1] %vm773_vm3, %v13376_v2  ;;  %794 = vst.msk [vmem:[#allocation3 + $0xb8] sm:$0x1] %vm773_vm3, %v13376_v2 }
  0x6f   : > { %798 = vst.msk [vmem:[#allocation3 + $0xd8] sm:$0x1] %vm773_vm3, %v13376_v2  ;;  %802 = vst.msk [vmem:[#allocation3 + $0xf8] sm:$0x1] %vm773_vm3, %v13376_v2 }
  0x70   : > { %806 = vst.msk [vmem:[#allocation3 + $0x118] sm:$0x1] %vm773_vm3, %v13376_v2  ;;  %810 = vst.msk [vmem:[#allocation3 + $0x138] sm:$0x1] %vm773_vm3, %v13376_v2 }
  0x71   : > { %814 = vst.msk [vmem:[#allocation3 + $0x158] sm:$0x1] %vm773_vm3, %v13376_v2  ;;  %818 = vst.msk [vmem:[#allocation3 + $0x178] sm:$0x1] %vm773_vm3, %v13376_v2 }
  0x72   : > { %822 = vst.msk [vmem:[#allocation3 + $0x198] sm:$0x1] %vm773_vm3, %v13376_v2  ;;  %826 = vst.msk [vmem:[#allocation3 + $0x1b8] sm:$0x1] %vm773_vm3, %v13376_v2 }
  0x73   : > { %830 = vst.msk [vmem:[#allocation3 + $0x1d8] sm:$0x1] %vm773_vm3, %v13376_v2  ;;  %834 = vst.msk [vmem:[#allocation3 + $0x1f8] sm:$0x1] %vm773_vm3, %v13376_v2 }
  0x74   : > { %838 = vst.msk [vmem:[#allocation3 + $0x218] sm:$0x1] %vm773_vm3, %v13376_v2  ;;  %842 = vst.msk [vmem:[#allocation3 + $0x238] sm:$0x1] %vm773_vm3, %v13376_v2 }
  0x75   : > { %877 = vst.msk [vmem:[%s13554_s12 + $0x10] sm:$0xff] %vm695_vm0, %v845_v3  ;;  %878 = vst.msk [vmem:[%s13554_s12 + $0x18] sm:$0xff] %vm695_vm0, %v846_v4 }
  0x76   : > { %879 = vst.msk [vmem:[%s13554_s12 + $0x20] sm:$0xff] %vm695_vm0, %v847_v5  ;;  %880 = vst.msk [vmem:[%s13554_s12 + $0x28] sm:$0xff] %vm695_vm0, %v848_v6 }
  0x77   : > { %881 = vst.msk [vmem:[%s13554_s12 + $0x30] sm:$0xff] %vm695_vm0, %v849_v7  ;;  %882 = vst.msk [vmem:[%s13554_s12 + $0x38] sm:$0xff] %vm695_vm0, %v850_v8 }
  0x78   : > { %883 = vst.msk [vmem:[%s13554_s12 + $0x40] sm:$0xff] %vm695_vm0, %v851_v9  ;;  %884 = vst.msk [vmem:[%s13554_s12 + $0x48] sm:$0xff] %vm695_vm0, %v852_v10 }
  0x79   : > { %885 = vst.msk [vmem:[%s13554_s12 + $0x50] sm:$0xff] %vm695_vm0, %v853_v11  ;;  %886 = vst.msk [vmem:[%s13554_s12 + $0x58] sm:$0xff] %vm695_vm0, %v854_v12 }
  0x7a   : > { %887 = vst.msk [vmem:[%s13554_s12 + $0x60] sm:$0xff] %vm695_vm0, %v855_v13  ;;  %888 = vst.msk [vmem:[%s13554_s12 + $0x68] sm:$0xff] %vm695_vm0, %v856_v14 }
  0x7b   : > { %889 = vst.msk [vmem:[%s13554_s12 + $0x70] sm:$0xff] %vm695_vm0, %v857_v15  ;;  %890 = vst.msk [vmem:[%s13554_s12 + $0x78] sm:$0xff] %vm695_vm0, %v858_v16 }
  0x7c   : > { %891 = vst.msk [vmem:[%s13554_s12 + $0x80] sm:$0xff] %vm695_vm0, %v859_v17  ;;  %892 = vst.msk [vmem:[%s13554_s12 + $0x88] sm:$0xff] %vm695_vm0, %v860_v18 }
  0x7d   : > { %893 = vst.msk [vmem:[%s13554_s12 + $0x90] sm:$0xff] %vm695_vm0, %v861_v19  ;;  %894 = vst.msk [vmem:[%s13554_s12 + $0x98] sm:$0xff] %vm695_vm0, %v862_v20 }
  0x7e   : > { %895 = vst.msk [vmem:[%s13554_s12 + $0xa0] sm:$0xff] %vm695_vm0, %v863_v21  ;;  %896 = vst.msk [vmem:[%s13554_s12 + $0xa8] sm:$0xff] %vm695_vm0, %v864_v22 }
  0x7f   : > { %897 = vst.msk [vmem:[%s13554_s12 + $0xb0] sm:$0xff] %vm695_vm0, %v865_v23  ;;  %898 = vst.msk [vmem:[%s13554_s12 + $0xb8] sm:$0xff] %vm695_vm0, %v866_v24 }
  0x80   : > { %899 = vst.msk [vmem:[%s13554_s12 + $0xc0] sm:$0xff] %vm695_vm0, %v867_v25  ;;  %900 = vst.msk [vmem:[%s13554_s12 + $0xc8] sm:$0xff] %vm695_vm0, %v868_v26 }
  0x81   : > { %901 = vst.msk [vmem:[%s13554_s12 + $0xd0] sm:$0xff] %vm695_vm0, %v869_v27  ;;  %902 = vst.msk [vmem:[%s13554_s12 + $0xd8] sm:$0xff] %vm695_vm0, %v870_v28 }
  0x82   : > { %903 = vst.msk [vmem:[%s13554_s12 + $0xe0] sm:$0xff] %vm695_vm0, %v871_v29  ;;  %904 = vst.msk [vmem:[%s13554_s12 + $0xe8] sm:$0xff] %vm695_vm0, %v872_v30 }
  0x83   : > { %905 = vst.msk [vmem:[%s13554_s12 + $0xf0] sm:$0xff] %vm695_vm0, %v873_v31  ;;  %906 = vst.msk [vmem:[%s13554_s12 + $0xf8] sm:$0xff] %vm695_vm0, %v874_v32 }
  0x84 PF: > { %v940_v33 = vld [vmem:[%s13508_s20] sm:$0xf]  ;;  %vm1045_vm4 = vcmask 1043456   ;;  %vm948_vm5 = vcmask 31744   ;;  %v909_v35 = vld [vmem:[%s13554_s12 + $0x8] sm:$0xff]  ;;  %v910_v36 = vld [vmem:[%s13554_s12 + $0x10] sm:$0xff]  ;;  %s16629_s27 = scalar_lea.vmem %s16433_s2, %s13492_s25  ;;  %s16630_s17 = scalar_lea.vmem %s16435_s4, %s13492_s25 }
  0x85   : > { %v908_v34 = vld [vmem:[%s13554_s12] sm:$0xff]  ;;  %11411 = vmatprep.subr.msk.mxu0 %vm1045_vm4, %v940_v33  ;;  %v911_v37 = vld [vmem:[%s13554_s12 + $0x18] sm:$0xff]  ;;  %v913_v39 = vld [vmem:[%s13554_s12 + $0x28] sm:$0xff]  ;;  %vm4835_vm6 = vcmask 261120   ;;  %s16738_s23 = scalar_lea.vmem %s16438_s7, %s13492_s25  ;;  %s16807_s19 = sld [smem:[#allocation81_spill]]  ;;  %vm8747_vm7 = vcmask 64512  }
  0x86   : > { %11413 = vmatprep.mubr.msk.f32.mxu0 %vm948_vm5, %v908_v34  ;;  %11412 = vmatpush3.msk.msra.mxu0 %vm1045_vm4, %v940_v33  ;;  %v912_v38 = vld [vmem:[%s13554_s12 + $0x20] sm:$0xff]  ;;  %v914_v40 = vld [vmem:[%s13554_s12 + $0x30] sm:$0xff]  ;;  %v915_v41 = vld [vmem:[%s13554_s12 + $0x38] sm:$0xff]  ;;  %s16820_s26 = sld [smem:[#allocation82_spill]]  ;;  %s16854_s0 = scalar_lea.vmem %s16434_s3, %s13492_s25 }
  0x87   : > { %11414 = vmatmul.mubr.msk.f32.vlgmr.msra.gmra.mrb[0].mxu0 %vm948_vm5, %v909_v35  ;;  %v916_v42 = vld [vmem:[%s13554_s12 + $0x40] sm:$0xff]  ;;  %v917_v43 = vld [vmem:[%s13554_s12 + $0x48] sm:$0xff]  ;;  %v918_v44 = vld [vmem:[%s13554_s12 + $0x50] sm:$0xff] }
  0x88   : > { %11416 = vmatprep.mubr.msk.f32.mxu0 %vm948_vm5, %v910_v36  ;;  %v919_v45 = vld [vmem:[%s13554_s12 + $0x58] sm:$0xff]  ;;  %v920_v46 = vld [vmem:[%s13554_s12 + $0x60] sm:$0xff]  ;;  %v921_v47 = vld [vmem:[%s13554_s12 + $0x68] sm:$0xff] }
  0x89   : > { %v922_v48 = vld [vmem:[%s13554_s12 + $0x70] sm:$0xff]  ;;  %v923_v49 = vld [vmem:[%s13554_s12 + $0x78] sm:$0xff]  ;;  %v924_v50 = vld [vmem:[%s13554_s12 + $0x80] sm:$0xff] }
  0x8a   : > { %v925_v51 = vld [vmem:[%s13554_s12 + $0x88] sm:$0xff]  ;;  %v926_v52 = vld [vmem:[%s13554_s12 + $0x90] sm:$0xff]  ;;  %v927_v53 = vld [vmem:[%s13554_s12 + $0x98] sm:$0xff] }
  0x8b   : > { %11417 = vmatmul.mubr.msk.f32.gmra.mrb[2].mxu0 %vm948_vm5, %v911_v37  ;;  %v928_v54 = vld [vmem:[%s13554_s12 + $0xa0] sm:$0xff]  ;;  %v929_v55 = vld [vmem:[%s13554_s12 + $0xa8] sm:$0xff]  ;;  %v930_v56 = vld [vmem:[%s13554_s12 + $0xb0] sm:$0xff] }
  0x8c   : > { %11419 = vmatprep.mubr.msk.f32.mxu0 %vm948_vm5, %v912_v38  ;;  %v931_v57 = vld [vmem:[%s13554_s12 + $0xb8] sm:$0xff]  ;;  %v932_v58 = vld [vmem:[%s13554_s12 + $0xc0] sm:$0xff]  ;;  %v933_v59 = vld [vmem:[%s13554_s12 + $0xc8] sm:$0xff] }
  0x8d   : > { %v934_v60 = vld [vmem:[%s13554_s12 + $0xd0] sm:$0xff]  ;;  %v935_v61 = vld [vmem:[%s13554_s12 + $0xd8] sm:$0xff]  ;;  %v936_v62 = vld [vmem:[%s13554_s12 + $0xe0] sm:$0xff] }
  0x8e   : > { %v937_v63 = vld [vmem:[%s13554_s12 + $0xe8] sm:$0xff]  ;;  %v9925_v0 = vld [vmem:[%s13536_s18 + $0x4] sm:$0xf]  ;;  %v1380_v2 = vld [vmem:[#allocation2 + $0x10] sm:$0xff] }
  0x8f   : > { %11420 = vmatmul.mubr.msk.f32.gmra.mrb[4].mxu0 %vm948_vm5, %v913_v39  ;;  %11461 = vmatprep.subr.msk.mxu1 %vm1045_vm4, %v9925_v0  ;;  %v1379_v1 = vld [vmem:[#allocation2 + $0x8] sm:$0xff]  ;;  %v1378_v3 = vld [vmem:[%s13536_s18] sm:$0xf]  ;;  %v938_v4 = vld [vmem:[%s13554_s12 + $0xf0] sm:$0xff] }
  0x90   : > { %11422 = vmatprep.mubr.msk.f32.mxu0 %vm948_vm5, %v914_v40  ;;  %11462 = vmatpush3.msk.msra.mxu1 %vm1045_vm4, %v9925_v0  ;;  %v939_v5 = vld [vmem:[%s13554_s12 + $0xf8] sm:$0xff]  ;;  %v14030_v6 = vld [vmem:[%s13536_s18 + $0x8] sm:$0xf]  ;;  %v14039_v7 = vld [vmem:[%s16629_s27] ss:$0 sm:$0xff] }
  0x91   : > { %11463 = vmatprep.mubr.msk.f32.mxu1 %vm948_vm5, %v1379_v1  ;;  %11511 = vmatprep.subr.msk.mxu1 %vm1045_vm4, %v1378_v3  ;;  %v14046_v9 = vld [vmem:[%s16630_s17] ss:$0 sm:$0xff] }
  0x92   : > { %11464 = vmatmul.mubr.msk.f32.vlgmr.msra.gmra.mrb[0].mxu1 %vm948_vm5, %v1380_v2 }
  0x93   : > { %11423 = vmatmul.mubr.msk.f32.gmra.mrb[6].mxu0 %vm948_vm5, %v915_v41  ;;  %11512 = vmatpush3.msk.msra.mxu1 %vm1045_vm4, %v1378_v3 }
  0x94   : > { %11425 = vmatprep.mubr.msk.f32.mxu0 %vm948_vm5, %v916_v42  ;;  %11561 = vmatprep.subr.msk.mxu1 %vm1045_vm4, %v14030_v6 }
  0x97   : > { %11426 = vmatmul.mubr.msk.f32.gmra.mrb[8].mxu0 %vm948_vm5, %v917_v43 }
  0x98   : > { %11428 = vmatprep.mubr.msk.f32.mxu0 %vm948_vm5, %v918_v44 }
  0x9b   : > { %11429 = vmatmul.mubr.msk.f32.gmra.mrb[10].mxu0 %vm948_vm5, %v919_v45 }
  0x9c   : > { %11431 = vmatprep.mubr.msk.f32.mxu0 %vm948_vm5, %v920_v46 }
  0x9f   : > { %11432 = vmatmul.mubr.msk.f32.gmra.mrb[12].mxu0 %vm948_vm5, %v921_v47 }
  0xa0   : > { %11434 = vmatprep.mubr.msk.f32.mxu0 %vm948_vm5, %v922_v48 }
  0xa3   : > { %11435 = vmatmul.mubr.msk.f32.gmra.mrb[14].mxu0 %vm948_vm5, %v923_v49 }
  0xa4   : > { %11437 = vmatprep.mubr.msk.f32.mxu0 %vm948_vm5, %v924_v50 }
  0xa7   : > { %11438 = vmatmul.mubr.msk.f32.gmra.mrb[16].mxu0 %vm948_vm5, %v925_v51 }
  0xa8   : > { %11440 = vmatprep.mubr.msk.f32.mxu0 %vm948_vm5, %v926_v52 }
  0xab   : > { %11441 = vmatmul.mubr.msk.f32.gmra.mrb[18].mxu0 %vm948_vm5, %v927_v53 }
  0xac   : > { %11443 = vmatprep.mubr.msk.f32.mxu0 %vm948_vm5, %v928_v54 }
  0xaf   : > { %11444 = vmatmul.mubr.msk.f32.gmra.mrb[20].mxu0 %vm948_vm5, %v929_v55 }
  0xb0   : > { %11446 = vmatprep.mubr.msk.f32.mxu0 %vm948_vm5, %v930_v56 }
  0xb3   : > { %11447 = vmatmul.mubr.msk.f32.gmra.mrb[22].mxu0 %vm948_vm5, %v931_v57 }
  0xb4   : > { %11449 = vmatprep.mubr.msk.f32.mxu0 %vm948_vm5, %v932_v58 }
  0xb7   : > { %11450 = vmatmul.mubr.msk.f32.gmra.mrb[24].mxu0 %vm948_vm5, %v933_v59 }
  0xb8   : > { %11452 = vmatprep.mubr.msk.f32.mxu0 %vm948_vm5, %v934_v60 }
  0xbb   : > { %11453 = vmatmul.mubr.msk.f32.gmra.mrb[26].mxu0 %vm948_vm5, %v935_v61 }
  0xbc   : > { %11455 = vmatprep.mubr.msk.f32.mxu0 %vm948_vm5, %v936_v62 }
  0xbf   : > { %11456 = vmatmul.mubr.msk.f32.gmra.mrb[28].mxu0 %vm948_vm5, %v937_v63 }
  0xc0   : > { %11458 = vmatprep.mubr.msk.f32.mxu0 %vm948_vm5, %v938_v4 }
  0xc3   : > { %11459 = vmatmul.mubr.msk.f32.gmra.mrb[30].mxu0 %vm948_vm5, %v939_v5 }
 0x15a   : > { %v11415_v8 = vpop.f32.mrb[0].mxu0 }
 0x15b   : > { %v14049_v10 = vadd.f32 %v11415_v8, %v14039_v7  ;;  %v1115_v11 = vpop.f32.mrb[1].mxu0 }
 0x15c   : > { %v14052_v12 = vadd.f32 %v14039_v7, %v1115_v11 }
 0x15d   : > { %16631 = vst [vmem:[#allocation12_spill] sm:$0xff] %v14049_v10  ;;  %v1282_v13 = vadd.f32 %v14046_v9, %v14049_v10 }
 0x15e   : > { %16632 = vst [vmem:[#allocation13_spill] sm:$0xff] %v14052_v12  ;;  %v1281_v14 = vadd.f32 %v14046_v9, %v14052_v12  ;;  %v11418_v15 = vpop.f32.mrb[2].mxu0 }
 0x15f   : > { %1315 = vst.msk [vmem:[#allocation2 + $0x30] sm:$0xff] %vm948_vm5, %v1282_v13  ;;  %v14060_v16 = vadd.f32 %v11418_v15, %v14039_v7  ;;  %v1125_v17 = vpop.f32.mrb[3].mxu0 }
 0x160   : > { %1314 = vst.msk [vmem:[#allocation2 + $0x28] sm:$0xff] %vm948_vm5, %v1281_v14  ;;  %v14064_v18 = vadd.f32 %v14039_v7, %v1125_v17 }
 0x161   : > { %16633 = vst [vmem:[#allocation14_spill] sm:$0xff] %v14060_v16  ;;  %v1284_v19 = vadd.f32 %v14046_v9, %v14060_v16 }
 0x162   : > { %16634 = vst [vmem:[#allocation15_spill] sm:$0xff] %v14064_v18  ;;  %v1283_v20 = vadd.f32 %v14046_v9, %v14064_v18  ;;  %v11421_v21 = vpop.f32.mrb[4].mxu0 }
 0x163   : > { %1317 = vst.msk [vmem:[#allocation2 + $0x50] sm:$0xff] %vm948_vm5, %v1284_v19  ;;  %v14072_v22 = vadd.f32 %v11421_v21, %v14039_v7  ;;  %v1135_v23 = vpop.f32.mrb[5].mxu0 }
 0x164   : > { %1316 = vst.msk [vmem:[#allocation2 + $0x48] sm:$0xff] %vm948_vm5, %v1283_v20  ;;  %v14076_v24 = vadd.f32 %v14039_v7, %v1135_v23 }
 0x165   : > { %16635 = vst [vmem:[#allocation16_spill] sm:$0xff] %v14072_v22  ;;  %v1286_v25 = vadd.f32 %v14046_v9, %v14072_v22 }
 0x166   : > { %16636 = vst [vmem:[#allocation17_spill] sm:$0xff] %v14076_v24  ;;  %v1285_v26 = vadd.f32 %v14046_v9, %v14076_v24  ;;  %v11424_v27 = vpop.f32.mrb[6].mxu0  ;;  %v14094_v32 = vld [vmem:[#allocation2 + $0x30] sm:$0xff] }
 0x167   : > { %1319 = vst.msk [vmem:[#allocation2 + $0x70] sm:$0xff] %vm948_vm5, %v1286_v25  ;;  %v14084_v28 = vadd.f32 %v11424_v27, %v14039_v7  ;;  %v1145_v29 = vpop.f32.mrb[7].mxu0  ;;  %v14086_v30 = vld [vmem:[#allocation2 + $0x28] sm:$0xff] }
 0x168   : > { %1318 = vst.msk [vmem:[#allocation2 + $0x68] sm:$0xff] %vm948_vm5, %v1285_v26  ;;  %v14090_v31 = vadd.f32 %v14039_v7, %v1145_v29  ;;  %11466 = vmatprep.mubr.msk.f32.mxu1 %vm948_vm5, %v14086_v30 }
 0x169   : > { %16637 = vst [vmem:[#allocation18_spill] sm:$0xff] %v14084_v28  ;;  %v1288_v33 = vadd.f32 %v14046_v9, %v14084_v28  ;;  %11467 = vmatmul.mubr.msk.f32.gmra.mrb[2].mxu1 %vm948_vm5, %v14094_v32 }
 0x16a   : > { %16638 = vst [vmem:[#allocation19_spill] sm:$0xff] %v14090_v31  ;;  %v1287_v34 = vadd.f32 %v14046_v9, %v14090_v31  ;;  %v11427_v35 = vpop.f32.mrb[8].mxu0  ;;  %v14114_v40 = vld [vmem:[#allocation2 + $0x50] sm:$0xff] }
 0x16b   : > { %1321 = vst.msk [vmem:[#allocation2 + $0x90] sm:$0xff] %vm948_vm5, %v1288_v33  ;;  %v14104_v36 = vadd.f32 %v11427_v35, %v14039_v7  ;;  %v1155_v37 = vpop.f32.mrb[9].mxu0  ;;  %v14106_v38 = vld [vmem:[#allocation2 + $0x48] sm:$0xff] }
 0x16c   : > { %1320 = vst.msk [vmem:[#allocation2 + $0x88] sm:$0xff] %vm948_vm5, %v1287_v34  ;;  %v14110_v39 = vadd.f32 %v14039_v7, %v1155_v37  ;;  %11469 = vmatprep.mubr.msk.f32.mxu1 %vm948_vm5, %v14106_v38 }
 0x16d   : > { %16639 = vst [vmem:[#allocation20_spill] sm:$0xff] %v14104_v36  ;;  %v1290_v41 = vadd.f32 %v14046_v9, %v14104_v36  ;;  %11470 = vmatmul.mubr.msk.f32.gmra.mrb[4].mxu1 %vm948_vm5, %v14114_v40 }
 0x16e   : > { %16640 = vst [vmem:[#allocation21_spill] sm:$0xff] %v14110_v39  ;;  %v1289_v42 = vadd.f32 %v14046_v9, %v14110_v39  ;;  %v11430_v43 = vpop.f32.mrb[10].mxu0  ;;  %v14134_v48 = vld [vmem:[#allocation2 + $0x70] sm:$0xff] }
 0x16f   : > { %1323 = vst.msk [vmem:[#allocation2 + $0xb0] sm:$0xff] %vm948_vm5, %v1290_v41  ;;  %v14124_v44 = vadd.f32 %v11430_v43, %v14039_v7  ;;  %v1165_v45 = vpop.f32.mrb[11].mxu0  ;;  %v14126_v46 = vld [vmem:[#allocation2 + $0x68] sm:$0xff] }
 0x170   : > { %1322 = vst.msk [vmem:[#allocation2 + $0xa8] sm:$0xff] %vm948_vm5, %v1289_v42  ;;  %v14130_v47 = vadd.f32 %v14039_v7, %v1165_v45  ;;  %11472 = vmatprep.mubr.msk.f32.mxu1 %vm948_vm5, %v14126_v46 }
 0x171   : > { %16641 = vst [vmem:[#allocation22_spill] sm:$0xff] %v14124_v44  ;;  %v1292_v49 = vadd.f32 %v14046_v9, %v14124_v44  ;;  %11473 = vmatmul.mubr.msk.f32.gmra.mrb[6].mxu1 %vm948_vm5, %v14134_v48 }
 0x172   : > { %16642 = vst [vmem:[#allocation23_spill] sm:$0xff] %v14130_v47  ;;  %v1291_v50 = vadd.f32 %v14046_v9, %v14130_v47  ;;  %v11433_v51 = vpop.f32.mrb[12].mxu0  ;;  %v14154_v56 = vld [vmem:[#allocation2 + $0x90] sm:$0xff] }
 0x173   : > { %1325 = vst.msk [vmem:[#allocation2 + $0xd0] sm:$0xff] %vm948_vm5, %v1292_v49  ;;  %v14144_v52 = vadd.f32 %v11433_v51, %v14039_v7  ;;  %v1175_v53 = vpop.f32.mrb[13].mxu0  ;;  %v14146_v54 = vld [vmem:[#allocation2 + $0x88] sm:$0xff] }
 0x174   : > { %1324 = vst.msk [vmem:[#allocation2 + $0xc8] sm:$0xff] %vm948_vm5, %v1291_v50  ;;  %v14150_v55 = vadd.f32 %v14039_v7, %v1175_v53  ;;  %11475 = vmatprep.mubr.msk.f32.mxu1 %vm948_vm5, %v14146_v54 }
 0x175   : > { %16643 = vst [vmem:[#allocation24_spill] sm:$0xff] %v14144_v52  ;;  %v1294_v57 = vadd.f32 %v14046_v9, %v14144_v52  ;;  %11476 = vmatmul.mubr.msk.f32.gmra.mrb[8].mxu1 %vm948_vm5, %v14154_v56 }
 0x176   : > { %16644 = vst [vmem:[#allocation25_spill] sm:$0xff] %v14150_v55  ;;  %v1293_v58 = vadd.f32 %v14046_v9, %v14150_v55  ;;  %v11436_v59 = vpop.f32.mrb[14].mxu0  ;;  %v14174_v0 = vld [vmem:[#allocation2 + $0xb0] sm:$0xff] }
 0x177   : > { %1327 = vst.msk [vmem:[#allocation2 + $0xf0] sm:$0xff] %vm948_vm5, %v1294_v57  ;;  %v14164_v60 = vadd.f32 %v11436_v59, %v14039_v7  ;;  %v1185_v61 = vpop.f32.mrb[15].mxu0  ;;  %v14166_v62 = vld [vmem:[#allocation2 + $0xa8] sm:$0xff] }
 0x178   : > { %1326 = vst.msk [vmem:[#allocation2 + $0xe8] sm:$0xff] %vm948_vm5, %v1293_v58  ;;  %v14170_v63 = vadd.f32 %v14039_v7, %v1185_v61  ;;  %11478 = vmatprep.mubr.msk.f32.mxu1 %vm948_vm5, %v14166_v62 }
 0x179   : > { %16645 = vst [vmem:[#allocation26_spill] sm:$0xff] %v14164_v60  ;;  %v1296_v1 = vadd.f32 %v14046_v9, %v14164_v60  ;;  %11479 = vmatmul.mubr.msk.f32.gmra.mrb[10].mxu1 %vm948_vm5, %v14174_v0 }
 0x17a   : > { %16646 = vst [vmem:[#allocation27_spill] sm:$0xff] %v14170_v63  ;;  %v1295_v2 = vadd.f32 %v14046_v9, %v14170_v63  ;;  %v11439_v3 = vpop.f32.mrb[16].mxu0  ;;  %v14194_v13 = vld [vmem:[#allocation2 + $0xd0] sm:$0xff] }
 0x17b   : > { %1329 = vst.msk [vmem:[#allocation2 + $0x110] sm:$0xff] %vm948_vm5, %v1296_v1  ;;  %v14184_v4 = vadd.f32 %v11439_v3, %v14039_v7  ;;  %v1195_v5 = vpop.f32.mrb[17].mxu0  ;;  %v14186_v8 = vld [vmem:[#allocation2 + $0xc8] sm:$0xff] }
 0x17c   : > { %1328 = vst.msk [vmem:[#allocation2 + $0x108] sm:$0xff] %vm948_vm5, %v1295_v2  ;;  %v14190_v11 = vadd.f32 %v14039_v7, %v1195_v5  ;;  %11481 = vmatprep.mubr.msk.f32.mxu1 %vm948_vm5, %v14186_v8 }
 0x17d   : > { %16647 = vst [vmem:[#allocation28_spill] sm:$0xff] %v14184_v4  ;;  %v1298_v14 = vadd.f32 %v14046_v9, %v14184_v4  ;;  %11482 = vmatmul.mubr.msk.f32.gmra.mrb[12].mxu1 %vm948_vm5, %v14194_v13 }
 0x17e   : > { %16648 = vst [vmem:[#allocation29_spill] sm:$0xff] %v14190_v11  ;;  %v1297_v15 = vadd.f32 %v14046_v9, %v14190_v11  ;;  %v11442_v17 = vpop.f32.mrb[18].mxu0  ;;  %v14214_v25 = vld [vmem:[#allocation2 + $0xf0] sm:$0xff] }
 0x17f   : > { %1331 = vst.msk [vmem:[#allocation2 + $0x130] sm:$0xff] %vm948_vm5, %v1298_v14  ;;  %v14204_v19 = vadd.f32 %v11442_v17, %v14039_v7  ;;  %v1205_v20 = vpop.f32.mrb[19].mxu0  ;;  %v14206_v21 = vld [vmem:[#allocation2 + $0xe8] sm:$0xff] }
 0x180   : > { %1330 = vst.msk [vmem:[#allocation2 + $0x128] sm:$0xff] %vm948_vm5, %v1297_v15  ;;  %v14210_v23 = vadd.f32 %v14039_v7, %v1205_v20  ;;  %11484 = vmatprep.mubr.msk.f32.mxu1 %vm948_vm5, %v14206_v21  ;;  %v14409_v11 = vld [vmem:[#allocation2 + $0xef] sm:$0xff] }
 0x181   : > { %16649 = vst [vmem:[#allocation30_spill] sm:$0xff] %v14204_v19  ;;  %v1300_v26 = vadd.f32 %v14046_v9, %v14204_v19  ;;  %11485 = vmatmul.mubr.msk.f32.gmra.mrb[14].mxu1 %vm948_vm5, %v14214_v25  ;;  %v14405_v19 = vld [vmem:[#allocation2 + $0xe7] sm:$0xff] }
 0x182   : > { %16650 = vst [vmem:[#allocation31_spill] sm:$0xff] %v14210_v23  ;;  %v1299_v27 = vadd.f32 %v14046_v9, %v14210_v23  ;;  %v11445_v29 = vpop.f32.mrb[20].mxu0  ;;  %v14234_v41 = vld [vmem:[#allocation2 + $0x110] sm:$0xff] }
 0x183   : > { %1333 = vst.msk [vmem:[#allocation2 + $0x150] sm:$0xff] %vm948_vm5, %v1300_v26  ;;  %v14224_v33 = vadd.f32 %v11445_v29, %v14039_v7  ;;  %v1215_v34 = vpop.f32.mrb[21].mxu0  ;;  %v14226_v35 = vld [vmem:[#allocation2 + $0x108] sm:$0xff] }
 0x184   : > { %1332 = vst.msk [vmem:[#allocation2 + $0x148] sm:$0xff] %vm948_vm5, %v1299_v27  ;;  %v14230_v37 = vadd.f32 %v14039_v7, %v1215_v34  ;;  %11487 = vmatprep.mubr.msk.f32.mxu1 %vm948_vm5, %v14226_v35  ;;  %v14401_v23 = vld [vmem:[#allocation2 + $0xcf] sm:$0xff]  ;;  %v14413_v4 = vld [vmem:[#allocation2 + $0x107] sm:$0xff] }
 0x185   : > { %16651 = vst [vmem:[#allocation32_spill] sm:$0xff] %v14224_v33  ;;  %v1302_v42 = vadd.f32 %v14046_v9, %v14224_v33  ;;  %11488 = vmatmul.mubr.msk.f32.gmra.mrb[16].mxu1 %vm948_vm5, %v14234_v41  ;;  %v14397_v33 = vld [vmem:[#allocation2 + $0xc7] sm:$0xff]  ;;  %v14417_v63 = vld [vmem:[#allocation2 + $0x10f] sm:$0xff] }
 0x186   : > { %16652 = vst [vmem:[#allocation33_spill] sm:$0xff] %v14230_v37  ;;  %v1301_v43 = vadd.f32 %v14046_v9, %v14230_v37  ;;  %v11448_v45 = vpop.f32.mrb[22].mxu0  ;;  %v14254_v57 = vld [vmem:[#allocation2 + $0x130] sm:$0xff] }
 0x187   : > { %1335 = vst.msk [vmem:[#allocation2 + $0x170] sm:$0xff] %vm948_vm5, %v1302_v42  ;;  %v14244_v49 = vadd.f32 %v11448_v45, %v14039_v7  ;;  %v1225_v50 = vpop.f32.mrb[23].mxu0  ;;  %v14246_v51 = vld [vmem:[#allocation2 + $0x128] sm:$0xff] }
 0x188   : > { %1334 = vst.msk [vmem:[#allocation2 + $0x168] sm:$0xff] %vm948_vm5, %v1301_v43  ;;  %v14250_v53 = vadd.f32 %v14039_v7, %v1225_v50  ;;  %11490 = vmatprep.mubr.msk.f32.mxu1 %vm948_vm5, %v14246_v51  ;;  %v14393_v37 = vld [vmem:[#allocation2 + $0xaf] sm:$0xff]  ;;  %v14421_v60 = vld [vmem:[#allocation2 + $0x127] sm:$0xff] }
 0x189   : > { %16653 = vst [vmem:[#allocation34_spill] sm:$0xff] %v14244_v49  ;;  %v1304_v58 = vadd.f32 %v14046_v9, %v14244_v49  ;;  %11491 = vmatmul.mubr.msk.f32.gmra.mrb[18].mxu1 %vm948_vm5, %v14254_v57  ;;  %v14389_v49 = vld [vmem:[#allocation2 + $0xa7] sm:$0xff]  ;;  %v14425_v55 = vld [vmem:[#allocation2 + $0x12f] sm:$0xff] }
 0x18a   : > { %16654 = vst [vmem:[#allocation35_spill] sm:$0xff] %v14250_v53  ;;  %v1303_v59 = vadd.f32 %v14046_v9, %v14250_v53  ;;  %v11451_v61 = vpop.f32.mrb[24].mxu0  ;;  %v14274_v14 = vld [vmem:[#allocation2 + $0x150] sm:$0xff] }
 0x18b   : > { %1337 = vst.msk [vmem:[#allocation2 + $0x190] sm:$0xff] %vm948_vm5, %v1304_v58  ;;  %v14264_v1 = vadd.f32 %v11451_v61, %v14039_v7  ;;  %v1235_v2 = vpop.f32.mrb[25].mxu0  ;;  %v14266_v3 = vld [vmem:[#allocation2 + $0x148] sm:$0xff] }
 0x18c   : > { %1336 = vst.msk [vmem:[#allocation2 + $0x188] sm:$0xff] %vm948_vm5, %v1303_v59  ;;  %v14270_v5 = vadd.f32 %v14039_v7, %v1235_v2  ;;  %11493 = vmatprep.mubr.msk.f32.mxu1 %vm948_vm5, %v14266_v3  ;;  %v14385_v53 = vld [vmem:[#allocation2 + $0x8f] sm:$0xff]  ;;  %v14429_v52 = vld [vmem:[#allocation2 + $0x147] sm:$0xff] }
 0x18d   : > { %16655 = vst [vmem:[#allocation36_spill] sm:$0xff] %v14264_v1  ;;  %v1306_v15 = vadd.f32 %v14046_v9, %v14264_v1  ;;  %11494 = vmatmul.mubr.msk.f32.gmra.mrb[20].mxu1 %vm948_vm5, %v14274_v14  ;;  %v14381_v1 = vld [vmem:[#allocation2 + $0x87] sm:$0xff]  ;;  %v14433_v47 = vld [vmem:[#allocation2 + $0x14f] sm:$0xff] }
 0x18e   : > { %16656 = vst [vmem:[#allocation37_spill] sm:$0xff] %v14270_v5  ;;  %v1305_v17 = vadd.f32 %v14046_v9, %v14270_v5  ;;  %v11454_v20 = vpop.f32.mrb[26].mxu0  ;;  %v14294_v42 = vld [vmem:[#allocation2 + $0x170] sm:$0xff] }
 0x18f   : > { %1339 = vst.msk [vmem:[#allocation2 + $0x1b0] sm:$0xff] %vm948_vm5, %v1306_v15  ;;  %v14284_v26 = vadd.f32 %v11454_v20, %v14039_v7  ;;  %v1245_v27 = vpop.f32.mrb[27].mxu0  ;;  %v14286_v29 = vld [vmem:[#allocation2 + $0x168] sm:$0xff] }
 0x190   : > { %1338 = vst.msk [vmem:[#allocation2 + $0x1a8] sm:$0xff] %vm948_vm5, %v1305_v17  ;;  %v14290_v34 = vadd.f32 %v14039_v7, %v1245_v27  ;;  %11496 = vmatprep.mubr.msk.f32.mxu1 %vm948_vm5, %v14286_v29  ;;  %v14377_v5 = vld [vmem:[#allocation2 + $0x6f] sm:$0xff]  ;;  %v14437_v44 = vld [vmem:[#allocation2 + $0x167] sm:$0xff] }
 0x191   : > { %16657 = vst [vmem:[#allocation38_spill] sm:$0xff] %v14284_v26  ;;  %v1308_v43 = vadd.f32 %v14046_v9, %v14284_v26  ;;  %11497 = vmatmul.mubr.msk.f32.gmra.mrb[22].mxu1 %vm948_vm5, %v14294_v42  ;;  %v14361_v26 = vld [vmem:[#allocation2 + $0x2f] sm:$0xff] }
 0x192   : > { %16658 = vst [vmem:[#allocation39_spill] sm:$0xff] %v14290_v34  ;;  %v1307_v45 = vadd.f32 %v14046_v9, %v14290_v34  ;;  %v11457_v50 = vpop.f32.mrb[28].mxu0  ;;  %v14314_v15 = vld [vmem:[#allocation2 + $0x190] sm:$0xff]  ;;  %v14353_v34 = vld [vmem:[#allocation2 + $0x27] sm:$0xff] }
 0x193   : > { %1341 = vst.msk [vmem:[#allocation2 + $0x1d0] sm:$0xff] %vm948_vm5, %v1308_v43  ;;  %v14304_v58 = vadd.f32 %v11457_v50, %v14039_v7  ;;  %v1255_v59 = vpop.f32.mrb[29].mxu0  ;;  %v14306_v61 = vld [vmem:[#allocation2 + $0x188] sm:$0xff] }
 0x194   : > { %1340 = vst.msk [vmem:[#allocation2 + $0x1c8] sm:$0xff] %vm948_vm5, %v1307_v45  ;;  %v14310_v2 = vadd.f32 %v14039_v7, %v1255_v59  ;;  %11499 = vmatprep.mubr.msk.f32.mxu1 %vm948_vm5, %v14306_v61  ;;  %v14441_v39 = vld [vmem:[#allocation2 + $0x16f] sm:$0xff]  ;;  %v14445_v36 = vld [vmem:[#allocation2 + $0x187] sm:$0xff] }
 0x195   : > { %16659 = vst [vmem:[#allocation40_spill] sm:$0xff] %v14304_v58  ;;  %v1310_v17 = vadd.f32 %v14046_v9, %v14304_v58  ;;  %11500 = vmatmul.mubr.msk.f32.gmra.mrb[24].mxu1 %vm948_vm5, %v14314_v15  ;;  %v14350_v58 = vld [vmem:[%s13536_s18 + $0xc] sm:$0xf] }
 0x196   : > { %16660 = vst [vmem:[#allocation41_spill] sm:$0xff] %v14310_v2  ;;  %v1309_v20 = vadd.f32 %v14046_v9, %v14310_v2  ;;  %v14328_v43 = vld [vmem:[#allocation2 + $0x1b0] sm:$0xff]  ;;  %v11460_v31 = vpop.f32.mrb[30].mxu0 }
 0x197   : > { %1343 = vst.msk [vmem:[#allocation2 + $0x1f0] sm:$0xff] %vm948_vm5, %v1310_v17  ;;  %v14323_v27 = vld [vmem:[#allocation2 + $0x1a8] sm:$0xff]  ;;  %v14450_v28 = vadd.f32 %v11460_v31, %v14039_v7  ;;  %v1265_v24 = vpop.f32.mrb[31].mxu0 }
 0x198   : > { %1342 = vst.msk [vmem:[#allocation2 + $0x1e8] sm:$0xff] %vm948_vm5, %v1309_v20  ;;  %11502 = vmatprep.mubr.msk.f32.mxu1 %vm948_vm5, %v14323_v27  ;;  %v1346_v17 = vld [vmem:[#allocation2 + $0x7] sm:$0xff]  ;;  %v1347_v2 = vld [vmem:[#allocation2 + $0xf] sm:$0xff]  ;;  %v14453_v22 = vadd.f32 %v14039_v7, %v1265_v24 }
 0x199   : > { %11503 = vmatmul.mubr.msk.f32.gmra.mrb[26].mxu1 %vm948_vm5, %v14328_v43  ;;  %16663 = vst [vmem:[#allocation44_spill] sm:$0xff] %v14450_v28  ;;  %v14455_v18 = vld [vmem:[#allocation2 + $0x18f] sm:$0xff]  ;;  %v1312_v16 = vadd.f32 %v14046_v9, %v14450_v28  ;;  %v14461_v12 = vld [vmem:[#allocation2 + $0x1a7] sm:$0xff] }
 0x19a   : > { %v14336_v50 = vld [vmem:[#allocation2 + $0x1d0] sm:$0xff]  ;;  %16664 = vst [vmem:[#allocation45_spill] sm:$0xff] %v14453_v22  ;;  %v1311_v10 = vadd.f32 %v14046_v9, %v14453_v22 }
 0x19b   : > { %v14332_v45 = vld [vmem:[#allocation2 + $0x1c8] sm:$0xff]  ;;  %1345 = vst.msk [vmem:[#allocation2 + $0x210] sm:$0xff] %vm948_vm5, %v1312_v16  ;;  %v2062_v22 = vld [vmem:[#allocation2 + $0x11] sm:$0xff] }
 0x19c   : > { %11505 = vmatprep.mubr.msk.f32.mxu1 %vm948_vm5, %v14332_v45  ;;  %1344 = vst.msk [vmem:[#allocation2 + $0x208] sm:$0xff] %vm948_vm5, %v1311_v10  ;;  %v14469_v7 = vld [vmem:[#allocation2 + $0x1af] sm:$0xff]  ;;  %v14473_v24 = vld [vmem:[#allocation2 + $0x1c7] sm:$0xff] }
 0x19d   : > { %11506 = vmatmul.mubr.msk.f32.gmra.mrb[28].mxu1 %vm948_vm5, %v14336_v50  ;;  %v14477_v31 = vld [vmem:[#allocation2 + $0x1cf] sm:$0xff] }
 0x19e   : > { %v14344_v20 = vld [vmem:[#allocation2 + $0x1f0] sm:$0xff] }
 0x19f   : > { %v14340_v59 = vld [vmem:[#allocation2 + $0x1e8] sm:$0xff]  ;;  %16662 = vst [vmem:[#allocation43_spill] sm:$0xff] %v14344_v20  ;;  %v14491_v28 = vld [vmem:[%s13536_s18 + $0x10] sm:$0xf] }
 0x1a0   : > { %16661 = vst [vmem:[#allocation42_spill] sm:$0xff] %v14340_v59  ;;  %11508 = vmatprep.mubr.msk.f32.mxu1 %vm948_vm5, %v14340_v59  ;;  %v14481_v9 = vld [vmem:[#allocation2 + $0x1e7] sm:$0xff]  ;;  %v14485_v16 = vld [vmem:[#allocation2 + $0x1ef] sm:$0xff] }
 0x1a1   : > { %11509 = vmatmul.mubr.msk.f32.gmra.mrb[30].mxu1 %vm948_vm5, %v14344_v20  ;;  %v2061_v10 = vld [vmem:[#allocation2 + $0x9] sm:$0xff]  ;;  %v14502_v59 = vld [vmem:[#allocation2 + $0x31] sm:$0xff] }
 0x1a2   : > { %11513 = vmatprep.mubr.msk.f32.mxu1 %vm948_vm5, %v1346_v17  ;;  %v14365_v17 = vld [vmem:[#allocation2 + $0x47] sm:$0xff]  ;;  %16666 = vst [vmem:[#allocation47_spill] sm:$0xff] %v14502_v59 }
 0x1a3   : > { %v14494_v20 = vld [vmem:[#allocation2 + $0x29] sm:$0xff] }
 0x1a4   : > { %16665 = vst [vmem:[#allocation46_spill] sm:$0xff] %v14494_v20 }
 0x1a5   : > { %11514 = vmatmul.mubr.msk.f32.vlgmr.msra.gmra.mrb[0].mxu1 %vm948_vm5, %v1347_v2  ;;  %v14369_v2 = vld [vmem:[#allocation2 + $0x4f] sm:$0xff] }
 0x1a6   : > { %11562 = vmatpush3.msk.msra.mxu1 %vm1045_vm4, %v14030_v6  ;;  %11516 = vmatprep.mubr.msk.f32.mxu1 %vm948_vm5, %v14353_v34  ;;  %v14373_v6 = vld [vmem:[#allocation2 + $0x67] sm:$0xff] }
 0x1a7   : > { %11611 = vmatprep.subr.msk.mxu1 %vm1045_vm4, %v14350_v58 }
 0x1a9   : > { %11517 = vmatmul.mubr.msk.f32.gmra.mrb[2].mxu1 %vm948_vm5, %v14361_v26 }
 0x1aa   : > { %11519 = vmatprep.mubr.msk.f32.mxu1 %vm948_vm5, %v14365_v17 }
 0x1ad   : > { %11520 = vmatmul.mubr.msk.f32.gmra.mrb[4].mxu1 %vm948_vm5, %v14369_v2 }
 0x1ae   : > { %11522 = vmatprep.mubr.msk.f32.mxu1 %vm948_vm5, %v14373_v6 }
 0x1b1   : > { %11523 = vmatmul.mubr.msk.f32.gmra.mrb[6].mxu1 %vm948_vm5, %v14377_v5 }
 0x1b2   : > { %11525 = vmatprep.mubr.msk.f32.mxu1 %vm948_vm5, %v14381_v1 }
 0x1b5   : > { %11526 = vmatmul.mubr.msk.f32.gmra.mrb[8].mxu1 %vm948_vm5, %v14385_v53 }
 0x1b6   : > { %11528 = vmatprep.mubr.msk.f32.mxu1 %vm948_vm5, %v14389_v49 }
 0x1b9   : > { %11529 = vmatmul.mubr.msk.f32.gmra.mrb[10].mxu1 %vm948_vm5, %v14393_v37 }
 0x1ba   : > { %11531 = vmatprep.mubr.msk.f32.mxu1 %vm948_vm5, %v14397_v33 }
 0x1bd   : > { %11532 = vmatmul.mubr.msk.f32.gmra.mrb[12].mxu1 %vm948_vm5, %v14401_v23 }
 0x1be   : > { %11534 = vmatprep.mubr.msk.f32.mxu1 %vm948_vm5, %v14405_v19 }
 0x1c1   : > { %11535 = vmatmul.mubr.msk.f32.gmra.mrb[14].mxu1 %vm948_vm5, %v14409_v11 }
 0x1c2   : > { %11537 = vmatprep.mubr.msk.f32.mxu1 %vm948_vm5, %v14413_v4 }
 0x1c5   : > { %11538 = vmatmul.mubr.msk.f32.gmra.mrb[16].mxu1 %vm948_vm5, %v14417_v63 }
 0x1c6   : > { %11540 = vmatprep.mubr.msk.f32.mxu1 %vm948_vm5, %v14421_v60 }
 0x1c9   : > { %11541 = vmatmul.mubr.msk.f32.gmra.mrb[18].mxu1 %vm948_vm5, %v14425_v55 }
 0x1ca   : > { %11543 = vmatprep.mubr.msk.f32.mxu1 %vm948_vm5, %v14429_v52 }
 0x1cd   : > { %11544 = vmatmul.mubr.msk.f32.gmra.mrb[20].mxu1 %vm948_vm5, %v14433_v47 }
 0x1ce   : > { %11546 = vmatprep.mubr.msk.f32.mxu1 %vm948_vm5, %v14437_v44 }
 0x1d1   : > { %11547 = vmatmul.mubr.msk.f32.gmra.mrb[22].mxu1 %vm948_vm5, %v14441_v39 }
 0x1d2   : > { %11549 = vmatprep.mubr.msk.f32.mxu1 %vm948_vm5, %v14445_v36 }
 0x1d5   : > { %11550 = vmatmul.mubr.msk.f32.gmra.mrb[24].mxu1 %vm948_vm5, %v14455_v18 }
 0x1d6   : > { %11552 = vmatprep.mubr.msk.f32.mxu1 %vm948_vm5, %v14461_v12 }
 0x1d9   : > { %11553 = vmatmul.mubr.msk.f32.gmra.mrb[26].mxu1 %vm948_vm5, %v14469_v7 }
 0x1da   : > { %11555 = vmatprep.mubr.msk.f32.mxu1 %vm948_vm5, %v14473_v24 }
 0x1dd   : > { %11556 = vmatmul.mubr.msk.f32.gmra.mrb[28].mxu1 %vm948_vm5, %v14477_v31 }
 0x1de   : > { %11558 = vmatprep.mubr.msk.f32.mxu1 %vm948_vm5, %v14481_v9 }
 0x1e1   : > { %11559 = vmatmul.mubr.msk.f32.gmra.mrb[30].mxu1 %vm948_vm5, %v14485_v16 }
 0x1e2   : > { %11563 = vmatprep.mubr.msk.f32.mxu1 %vm948_vm5, %v2061_v10  ;;  %v14506_v10 = vld [vmem:[#allocation2 + $0x49] sm:$0xff] }
 0x1e3   : > { %16667 = vst [vmem:[#allocation48_spill] sm:$0xff] %v14506_v10 }
 0x1e5   : > { %11564 = vmatmul.mubr.msk.f32.vlgmr.msra.gmra.mrb[0].mxu1 %vm948_vm5, %v2062_v22  ;;  %v14510_v22 = vld [vmem:[#allocation2 + $0x51] sm:$0xff] }
 0x1e6   : > { %11612 = vmatpush3.msk.msra.mxu1 %vm1045_vm4, %v14350_v58  ;;  %11566 = vmatprep.mubr.msk.f32.mxu1 %vm948_vm5, %v14494_v20  ;;  %16668 = vst [vmem:[#allocation49_spill] sm:$0xff] %v14510_v22  ;;  %v14514_v58 = vld [vmem:[#allocation2 + $0x69] sm:$0xff]  ;;  %v14518_v20 = vld [vmem:[#allocation2 + $0x71] sm:$0xff] }
 0x1e7   : > { %11661 = vmatprep.subr.msk.mxu1 %vm1045_vm4, %v14491_v28  ;;  %16669 = vst [vmem:[#allocation50_spill] sm:$0xff] %v14514_v58  ;;  %16670 = vst [vmem:[#allocation51_spill] sm:$0xff] %v14518_v20 }
 0x1e9   : > { %11567 = vmatmul.mubr.msk.f32.gmra.mrb[2].mxu1 %vm948_vm5, %v14502_v59  ;;  %v14522_v59 = vld [vmem:[#allocation2 + $0x89] sm:$0xff] }
 0x1ea   : > { %11569 = vmatprep.mubr.msk.f32.mxu1 %vm948_vm5, %v14506_v10  ;;  %16671 = vst [vmem:[#allocation52_spill] sm:$0xff] %v14522_v59  ;;  %v14526_v10 = vld [vmem:[#allocation2 + $0x91] sm:$0xff] }
 0x1eb   : > { %16672 = vst [vmem:[#allocation53_spill] sm:$0xff] %v14526_v10 }
 0x1ed   : > { %11570 = vmatmul.mubr.msk.f32.gmra.mrb[4].mxu1 %vm948_vm5, %v14510_v22  ;;  %v14530_v22 = vld [vmem:[#allocation2 + $0xa9] sm:$0xff] }
 0x1ee   : > { %11572 = vmatprep.mubr.msk.f32.mxu1 %vm948_vm5, %v14514_v58  ;;  %16673 = vst [vmem:[#allocation54_spill] sm:$0xff] %v14530_v22  ;;  %v14534_v58 = vld [vmem:[#allocation2 + $0xb1] sm:$0xff] }
 0x1ef   : > { %16674 = vst [vmem:[#allocation55_spill] sm:$0xff] %v14534_v58 }
 0x1f1   : > { %11573 = vmatmul.mubr.msk.f32.gmra.mrb[6].mxu1 %vm948_vm5, %v14518_v20  ;;  %v14538_v20 = vld [vmem:[#allocation2 + $0xc9] sm:$0xff] }
 0x1f2   : > { %11575 = vmatprep.mubr.msk.f32.mxu1 %vm948_vm5, %v14522_v59  ;;  %16675 = vst [vmem:[#allocation56_spill] sm:$0xff] %v14538_v20  ;;  %v14542_v59 = vld [vmem:[#allocation2 + $0xd1] sm:$0xff] }
 0x1f3   : > { %16676 = vst [vmem:[#allocation57_spill] sm:$0xff] %v14542_v59 }
 0x1f5   : > { %11576 = vmatmul.mubr.msk.f32.gmra.mrb[8].mxu1 %vm948_vm5, %v14526_v10  ;;  %v14546_v10 = vld [vmem:[#allocation2 + $0xe9] sm:$0xff] }
 0x1f6   : > { %11578 = vmatprep.mubr.msk.f32.mxu1 %vm948_vm5, %v14530_v22  ;;  %16677 = vst [vmem:[#allocation58_spill] sm:$0xff] %v14546_v10  ;;  %v14550_v22 = vld [vmem:[#allocation2 + $0xf1] sm:$0xff] }
 0x1f7   : > { %16678 = vst [vmem:[#allocation59_spill] sm:$0xff] %v14550_v22 }
 0x1f9   : > { %11579 = vmatmul.mubr.msk.f32.gmra.mrb[10].mxu1 %vm948_vm5, %v14534_v58  ;;  %v14554_v58 = vld [vmem:[#allocation2 + $0x109] sm:$0xff] }
 0x1fa   : > { %11581 = vmatprep.mubr.msk.f32.mxu1 %vm948_vm5, %v14538_v20  ;;  %16679 = vst [vmem:[#allocation60_spill] sm:$0xff] %v14554_v58  ;;  %v14558_v20 = vld [vmem:[#allocation2 + $0x111] sm:$0xff] }
 0x1fb   : > { %16680 = vst [vmem:[#allocation61_spill] sm:$0xff] %v14558_v20 }
 0x1fd   : > { %11582 = vmatmul.mubr.msk.f32.gmra.mrb[12].mxu1 %vm948_vm5, %v14542_v59  ;;  %v14562_v59 = vld [vmem:[#allocation2 + $0x129] sm:$0xff] }
 0x1fe   : > { %11584 = vmatprep.mubr.msk.f32.mxu1 %vm948_vm5, %v14546_v10  ;;  %16681 = vst [vmem:[#allocation62_spill] sm:$0xff] %v14562_v59  ;;  %v14566_v10 = vld [vmem:[#allocation2 + $0x131] sm:$0xff] }
 0x1ff   : > { %16682 = vst [vmem:[#allocation63_spill] sm:$0xff] %v14566_v10 }
 0x201   : > { %11585 = vmatmul.mubr.msk.f32.gmra.mrb[14].mxu1 %vm948_vm5, %v14550_v22  ;;  %v14570_v22 = vld [vmem:[#allocation2 + $0x149] sm:$0xff] }
 0x202   : > { %11587 = vmatprep.mubr.msk.f32.mxu1 %vm948_vm5, %v14554_v58  ;;  %16683 = vst [vmem:[#allocation64_spill] sm:$0xff] %v14570_v22  ;;  %v14574_v58 = vld [vmem:[#allocation2 + $0x151] sm:$0xff] }
 0x203   : > { %16684 = vst [vmem:[#allocation65_spill] sm:$0xff] %v14574_v58 }
 0x205   : > { %11588 = vmatmul.mubr.msk.f32.gmra.mrb[16].mxu1 %vm948_vm5, %v14558_v20  ;;  %v14578_v20 = vld [vmem:[#allocation2 + $0x169] sm:$0xff] }
 0x206   : > { %11590 = vmatprep.mubr.msk.f32.mxu1 %vm948_vm5, %v14562_v59  ;;  %16685 = vst [vmem:[#allocation66_spill] sm:$0xff] %v14578_v20  ;;  %v14582_v59 = vld [vmem:[#allocation2 + $0x171] sm:$0xff] }
 0x207   : > { %16686 = vst [vmem:[#allocation67_spill] sm:$0xff] %v14582_v59 }
 0x209   : > { %11591 = vmatmul.mubr.msk.f32.gmra.mrb[18].mxu1 %vm948_vm5, %v14566_v10  ;;  %v14586_v10 = vld [vmem:[#allocation2 + $0x189] sm:$0xff] }
 0x20a   : > { %11593 = vmatprep.mubr.msk.f32.mxu1 %vm948_vm5, %v14570_v22  ;;  %16687 = vst [vmem:[#allocation68_spill] sm:$0xff] %v14586_v10  ;;  %v14590_v22 = vld [vmem:[#allocation2 + $0x191] sm:$0xff] }
 0x20b   : > { %16688 = vst [vmem:[#allocation69_spill] sm:$0xff] %v14590_v22 }
 0x20d   : > { %11594 = vmatmul.mubr.msk.f32.gmra.mrb[20].mxu1 %vm948_vm5, %v14574_v58  ;;  %v14594_v58 = vld [vmem:[#allocation2 + $0x1a9] sm:$0xff] }
 0x20e   : > { %11596 = vmatprep.mubr.msk.f32.mxu1 %vm948_vm5, %v14578_v20  ;;  %16689 = vst [vmem:[#allocation70_spill] sm:$0xff] %v14594_v58  ;;  %v14598_v20 = vld [vmem:[#allocation2 + $0x1b1] sm:$0xff] }
 0x20f   : > { %16690 = vst [vmem:[#allocation71_spill] sm:$0xff] %v14598_v20 }
 0x211   : > { %11597 = vmatmul.mubr.msk.f32.gmra.mrb[22].mxu1 %vm948_vm5, %v14582_v59  ;;  %v14602_v59 = vld [vmem:[#allocation2 + $0x1c9] sm:$0xff] }
 0x212   : > { %11599 = vmatprep.mubr.msk.f32.mxu1 %vm948_vm5, %v14586_v10  ;;  %v14606_v10 = vld [vmem:[#allocation2 + $0x1d1] sm:$0xff] }
 0x213   : > { %16691 = vst [vmem:[#allocation72_spill] sm:$0xff] %v14606_v10 }
 0x215   : > { %11600 = vmatmul.mubr.msk.f32.gmra.mrb[24].mxu1 %vm948_vm5, %v14590_v22  ;;  %v14610_v22 = vld [vmem:[#allocation2 + $0x1e9] sm:$0xff] }
 0x216   : > { %11602 = vmatprep.mubr.msk.f32.mxu1 %vm948_vm5, %v14594_v58  ;;  %v14614_v58 = vld [vmem:[#allocation2 + $0x1f1] sm:$0xff] }
 0x219   : > { %11603 = vmatmul.mubr.msk.f32.gmra.mrb[26].mxu1 %vm948_vm5, %v14598_v20  ;;  %v10094_v20 = vld [vmem:[%s13536_s18 + $0x14] sm:$0xf] }
 0x21a   : > { %11605 = vmatprep.mubr.msk.f32.mxu1 %vm948_vm5, %v14602_v59 }
 0x21d   : > { %11606 = vmatmul.mubr.msk.f32.gmra.mrb[28].mxu1 %vm948_vm5, %v14606_v10 }
 0x21e   : > { %11608 = vmatprep.mubr.msk.f32.mxu1 %vm948_vm5, %v14610_v22 }
 0x221   : > { %11609 = vmatmul.mubr.msk.f32.gmra.mrb[30].mxu1 %vm948_vm5, %v14614_v58 }
 0x222   : > { %11613 = vmatprep.mubr.msk.f32.mxu1 %vm948_vm5, %v14353_v34  ;;  %v10128_v34 = vld [vmem:[%s13536_s18 + $0x18] sm:$0xf] }
 0x225   : > { %11614 = vmatmul.mubr.msk.f32.vlgmr.msra.gmra.mrb[0].mxu1 %vm948_vm5, %v14361_v26  ;;  %v14686_v26 = vld [vmem:[#allocation2 + $0x20f] sm:$0xff] }
 0x226   : > { %11662 = vmatpush3.msk.msra.mxu1 %vm1045_vm4, %v14491_v28  ;;  %11616 = vmatprep.mubr.msk.f32.mxu1 %vm948_vm5, %v14365_v17  ;;  %v14680_v28 = vld [vmem:[#allocation2 + $0x207] sm:$0xff] }
 0x227   : > { %11711 = vmatprep.subr.msk.mxu1 %vm1045_vm4, %v10094_v20 }
 0x229   : > { %11617 = vmatmul.mubr.msk.f32.gmra.mrb[2].mxu1 %vm948_vm5, %v14369_v2 }
 0x22a   : > { %11619 = vmatprep.mubr.msk.f32.mxu1 %vm948_vm5, %v14373_v6 }
 0x22d   : > { %11620 = vmatmul.mubr.msk.f32.gmra.mrb[4].mxu1 %vm948_vm5, %v14377_v5 }
 0x22e   : > { %11622 = vmatprep.mubr.msk.f32.mxu1 %vm948_vm5, %v14381_v1 }
 0x231   : > { %11623 = vmatmul.mubr.msk.f32.gmra.mrb[6].mxu1 %vm948_vm5, %v14385_v53 }
 0x232   : > { %11625 = vmatprep.mubr.msk.f32.mxu1 %vm948_vm5, %v14389_v49 }
 0x235   : > { %11626 = vmatmul.mubr.msk.f32.gmra.mrb[8].mxu1 %vm948_vm5, %v14393_v37 }
 0x236   : > { %11628 = vmatprep.mubr.msk.f32.mxu1 %vm948_vm5, %v14397_v33 }
 0x239   : > { %11629 = vmatmul.mubr.msk.f32.gmra.mrb[10].mxu1 %vm948_vm5, %v14401_v23 }
 0x23a   : > { %11631 = vmatprep.mubr.msk.f32.mxu1 %vm948_vm5, %v14405_v19 }
 0x23d   : > { %11632 = vmatmul.mubr.msk.f32.gmra.mrb[12].mxu1 %vm948_vm5, %v14409_v11 }
 0x23e   : > { %11634 = vmatprep.mubr.msk.f32.mxu1 %vm948_vm5, %v14413_v4 }
 0x241   : > { %11635 = vmatmul.mubr.msk.f32.gmra.mrb[14].mxu1 %vm948_vm5, %v14417_v63 }
 0x242   : > { %11637 = vmatprep.mubr.msk.f32.mxu1 %vm948_vm5, %v14421_v60 }
 0x245   : > { %11638 = vmatmul.mubr.msk.f32.gmra.mrb[16].mxu1 %vm948_vm5, %v14425_v55 }
 0x246   : > { %11640 = vmatprep.mubr.msk.f32.mxu1 %vm948_vm5, %v14429_v52 }
 0x249   : > { %11641 = vmatmul.mubr.msk.f32.gmra.mrb[18].mxu1 %vm948_vm5, %v14433_v47 }
 0x24a   : > { %11643 = vmatprep.mubr.msk.f32.mxu1 %vm948_vm5, %v14437_v44 }
 0x24d   : > { %11644 = vmatmul.mubr.msk.f32.gmra.mrb[20].mxu1 %vm948_vm5, %v14441_v39 }
 0x24e   : > { %11646 = vmatprep.mubr.msk.f32.mxu1 %vm948_vm5, %v14445_v36 }
 0x251   : > { %11647 = vmatmul.mubr.msk.f32.gmra.mrb[22].mxu1 %vm948_vm5, %v14455_v18 }
 0x252   : > { %11649 = vmatprep.mubr.msk.f32.mxu1 %vm948_vm5, %v14461_v12 }
 0x255   : > { %11650 = vmatmul.mubr.msk.f32.gmra.mrb[24].mxu1 %vm948_vm5, %v14469_v7 }
 0x256   : > { %11652 = vmatprep.mubr.msk.f32.mxu1 %vm948_vm5, %v14473_v24 }
 0x259   : > { %11653 = vmatmul.mubr.msk.f32.gmra.mrb[26].mxu1 %vm948_vm5, %v14477_v31 }
 0x25a   : > { %11655 = vmatprep.mubr.msk.f32.mxu1 %vm948_vm5, %v14481_v9 }
 0x25d   : > { %11656 = vmatmul.mubr.msk.f32.gmra.mrb[28].mxu1 %vm948_vm5, %v14485_v16 }
 0x25e   : > { %11658 = vmatprep.mubr.msk.f32.mxu1 %vm948_vm5, %v14680_v28 }
 0x261   : > { %11659 = vmatmul.mubr.msk.f32.gmra.mrb[30].mxu1 %vm948_vm5, %v14686_v26 }
 0x262   : > { %11663 = vmatprep.mubr.msk.f32.mxu1 %vm948_vm5, %v14086_v30  ;;  %v16692_v30 = vld [vmem:[#allocation42_spill] sm:$0xff] }
 0x265   : > { %11664 = vmatmul.mubr.msk.f32.vlgmr.msra.gmra.mrb[0].mxu1 %vm948_vm5, %v14094_v32  ;;  %v16693_v32 = vld [vmem:[#allocation43_spill] sm:$0xff] }
 0x266   : > { %11712 = vmatpush3.msk.msra.mxu1 %vm1045_vm4, %v10094_v20  ;;  %11666 = vmatprep.mubr.msk.f32.mxu1 %vm948_vm5, %v14106_v38  ;;  %v14753_v38 = vld [vmem:[#allocation2 + $0x208] sm:$0xff] }
 0x267   : > { %11761 = vmatprep.subr.msk.mxu1 %vm1045_vm4, %v10128_v34  ;;  %v16701_v20 = vld [vmem:[#allocation53_spill] sm:$0xff] }
 0x269   : > { %11667 = vmatmul.mubr.msk.f32.gmra.mrb[2].mxu1 %vm948_vm5, %v14114_v40  ;;  %v14757_v40 = vld [vmem:[#allocation2 + $0x210] sm:$0xff] }
 0x26a   : > { %11669 = vmatprep.mubr.msk.f32.mxu1 %vm948_vm5, %v14126_v46  ;;  %v16694_v46 = vld [vmem:[#allocation46_spill] sm:$0xff] }
 0x26d   : > { %11670 = vmatmul.mubr.msk.f32.gmra.mrb[4].mxu1 %vm948_vm5, %v14134_v48  ;;  %v10162_v48 = vld [vmem:[%s13536_s18 + $0x1c] sm:$0xf] }
 0x26e   : > { %11672 = vmatprep.mubr.msk.f32.mxu1 %vm948_vm5, %v14146_v54  ;;  %v16695_v54 = vld [vmem:[#allocation47_spill] sm:$0xff] }
 0x271   : > { %11673 = vmatmul.mubr.msk.f32.gmra.mrb[6].mxu1 %vm948_vm5, %v14154_v56  ;;  %v16696_v56 = vld [vmem:[#allocation48_spill] sm:$0xff] }
 0x272   : > { %11675 = vmatprep.mubr.msk.f32.mxu1 %vm948_vm5, %v14166_v62  ;;  %v16697_v62 = vld [vmem:[#allocation49_spill] sm:$0xff] }
 0x275   : > { %11676 = vmatmul.mubr.msk.f32.gmra.mrb[8].mxu1 %vm948_vm5, %v14174_v0  ;;  %v16698_v0 = vld [vmem:[#allocation50_spill] sm:$0xff] }
 0x276   : > { %11678 = vmatprep.mubr.msk.f32.mxu1 %vm948_vm5, %v14186_v8  ;;  %v16699_v8 = vld [vmem:[#allocation51_spill] sm:$0xff] }
 0x279   : > { %11679 = vmatmul.mubr.msk.f32.gmra.mrb[10].mxu1 %vm948_vm5, %v14194_v13  ;;  %v16700_v13 = vld [vmem:[#allocation52_spill] sm:$0xff] }
 0x27a   : > { %11681 = vmatprep.mubr.msk.f32.mxu1 %vm948_vm5, %v14206_v21 }
 0x27d   : > { %11682 = vmatmul.mubr.msk.f32.gmra.mrb[12].mxu1 %vm948_vm5, %v14214_v25 }
 0x27e   : > { %11684 = vmatprep.mubr.msk.f32.mxu1 %vm948_vm5, %v14226_v35 }
 0x281   : > { %11685 = vmatmul.mubr.msk.f32.gmra.mrb[14].mxu1 %vm948_vm5, %v14234_v41 }
 0x282   : > { %11687 = vmatprep.mubr.msk.f32.mxu1 %vm948_vm5, %v14246_v51 }
 0x285   : > { %11688 = vmatmul.mubr.msk.f32.gmra.mrb[16].mxu1 %vm948_vm5, %v14254_v57 }
 0x286   : > { %11690 = vmatprep.mubr.msk.f32.mxu1 %vm948_vm5, %v14266_v3 }
 0x289   : > { %11691 = vmatmul.mubr.msk.f32.gmra.mrb[18].mxu1 %vm948_vm5, %v14274_v14 }
 0x28a   : > { %11693 = vmatprep.mubr.msk.f32.mxu1 %vm948_vm5, %v14286_v29 }
 0x28d   : > { %11694 = vmatmul.mubr.msk.f32.gmra.mrb[20].mxu1 %vm948_vm5, %v14294_v42 }
 0x28e   : > { %11696 = vmatprep.mubr.msk.f32.mxu1 %vm948_vm5, %v14306_v61 }
 0x291   : > { %11697 = vmatmul.mubr.msk.f32.gmra.mrb[22].mxu1 %vm948_vm5, %v14314_v15 }
 0x292   : > { %11699 = vmatprep.mubr.msk.f32.mxu1 %vm948_vm5, %v14323_v27 }
 0x295   : > { %11700 = vmatmul.mubr.msk.f32.gmra.mrb[24].mxu1 %vm948_vm5, %v14328_v43 }
 0x296   : > { %11702 = vmatprep.mubr.msk.f32.mxu1 %vm948_vm5, %v14332_v45 }
 0x299   : > { %11703 = vmatmul.mubr.msk.f32.gmra.mrb[26].mxu1 %vm948_vm5, %v14336_v50 }
 0x29a   : > { %11705 = vmatprep.mubr.msk.f32.mxu1 %vm948_vm5, %v16692_v30 }
 0x29d   : > { %11706 = vmatmul.mubr.msk.f32.gmra.mrb[28].mxu1 %vm948_vm5, %v16693_v32 }
 0x29e   : > { %11708 = vmatprep.mubr.msk.f32.mxu1 %vm948_vm5, %v14753_v38 }
 0x2a1   : > { %11709 = vmatmul.mubr.msk.f32.gmra.mrb[30].mxu1 %vm948_vm5, %v14757_v40 }
 0x2a2   : > { %11713 = vmatprep.mubr.msk.f32.mxu1 %vm948_vm5, %v16694_v46  ;;  %v16703_v46 = vld [vmem:[#allocation55_spill] sm:$0xff] }
 0x2a5   : > { %11714 = vmatmul.mubr.msk.f32.vlgmr.msra.gmra.mrb[0].mxu1 %vm948_vm5, %v16695_v54  ;;  %v16704_v54 = vld [vmem:[#allocation56_spill] sm:$0xff] }
 0x2a6   : > { %11762 = vmatpush3.msk.msra.mxu1 %vm1045_vm4, %v10128_v34  ;;  %11716 = vmatprep.mubr.msk.f32.mxu1 %vm948_vm5, %v16696_v56  ;;  %v16702_v34 = vld [vmem:[#allocation54_spill] sm:$0xff] }
 0x2a7   : > { %11811 = vmatprep.subr.msk.mxu1 %vm1045_vm4, %v10162_v48 }
 0x2a9   : > { %11717 = vmatmul.mubr.msk.f32.gmra.mrb[2].mxu1 %vm948_vm5, %v16697_v62  ;;  %v16705_v62 = vld [vmem:[#allocation57_spill] sm:$0xff] }
 0x2aa   : > { %11719 = vmatprep.mubr.msk.f32.mxu1 %vm948_vm5, %v16698_v0  ;;  %v16706_v0 = vld [vmem:[#allocation58_spill] sm:$0xff] }
 0x2ad   : > { %11720 = vmatmul.mubr.msk.f32.gmra.mrb[4].mxu1 %vm948_vm5, %v16699_v8  ;;  %v16707_v8 = vld [vmem:[#allocation59_spill] sm:$0xff] }
 0x2ae   : > { %11722 = vmatprep.mubr.msk.f32.mxu1 %vm948_vm5, %v16700_v13  ;;  %v16708_v13 = vld [vmem:[#allocation60_spill] sm:$0xff] }
 0x2b1   : > { %11723 = vmatmul.mubr.msk.f32.gmra.mrb[6].mxu1 %vm948_vm5, %v16701_v20  ;;  %v16709_v20 = vld [vmem:[#allocation61_spill] sm:$0xff] }
 0x2b2   : > { %11725 = vmatprep.mubr.msk.f32.mxu1 %vm948_vm5, %v16702_v34  ;;  %v16710_v34 = vld [vmem:[#allocation62_spill] sm:$0xff] }
 0x2b5   : > { %11726 = vmatmul.mubr.msk.f32.gmra.mrb[8].mxu1 %vm948_vm5, %v16703_v46  ;;  %v16711_v46 = vld [vmem:[#allocation63_spill] sm:$0xff] }
 0x2b6   : > { %11728 = vmatprep.mubr.msk.f32.mxu1 %vm948_vm5, %v16704_v54  ;;  %v16712_v54 = vld [vmem:[#allocation64_spill] sm:$0xff] }
 0x2b9   : > { %11729 = vmatmul.mubr.msk.f32.gmra.mrb[10].mxu1 %vm948_vm5, %v16705_v62  ;;  %v16713_v62 = vld [vmem:[#allocation65_spill] sm:$0xff] }
 0x2ba   : > { %11731 = vmatprep.mubr.msk.f32.mxu1 %vm948_vm5, %v16706_v0  ;;  %v16714_v0 = vld [vmem:[#allocation66_spill] sm:$0xff] }
 0x2bd   : > { %11732 = vmatmul.mubr.msk.f32.gmra.mrb[12].mxu1 %vm948_vm5, %v16707_v8 }
 0x2be   : > { %11734 = vmatprep.mubr.msk.f32.mxu1 %vm948_vm5, %v16708_v13  ;;  %v16715_v13 = vld [vmem:[#allocation67_spill] sm:$0xff] }
 0x2c1   : > { %11735 = vmatmul.mubr.msk.f32.gmra.mrb[14].mxu1 %vm948_vm5, %v16709_v20  ;;  %v16716_v20 = vld [vmem:[#allocation68_spill] sm:$0xff] }
 0x2c2   : > { %11737 = vmatprep.mubr.msk.f32.mxu1 %vm948_vm5, %v16710_v34  ;;  %v16717_v34 = vld [vmem:[#allocation69_spill] sm:$0xff] }
 0x2c5   : > { %11738 = vmatmul.mubr.msk.f32.gmra.mrb[16].mxu1 %vm948_vm5, %v16711_v46  ;;  %v16718_v46 = vld [vmem:[#allocation70_spill] sm:$0xff] }
 0x2c6   : > { %11740 = vmatprep.mubr.msk.f32.mxu1 %vm948_vm5, %v16712_v54  ;;  %v16719_v54 = vld [vmem:[#allocation71_spill] sm:$0xff] }
 0x2c9   : > { %11741 = vmatmul.mubr.msk.f32.gmra.mrb[18].mxu1 %vm948_vm5, %v16713_v62 }
 0x2ca   : > { %11743 = vmatprep.mubr.msk.f32.mxu1 %vm948_vm5, %v16714_v0 }
 0x2cd   : > { %11744 = vmatmul.mubr.msk.f32.gmra.mrb[20].mxu1 %vm948_vm5, %v16715_v13 }
 0x2ce   : > { %11746 = vmatprep.mubr.msk.f32.mxu1 %vm948_vm5, %v16716_v20  ;;  %v14824_v20 = vld [vmem:[#allocation2 + $0x209] sm:$0xff] }
 0x2d1   : > { %11747 = vmatmul.mubr.msk.f32.gmra.mrb[22].mxu1 %vm948_vm5, %v16717_v34 }
 0x2d2   : > { %11749 = vmatprep.mubr.msk.f32.mxu1 %vm948_vm5, %v16718_v46  ;;  %v14828_v46 = vld [vmem:[#allocation2 + $0x211] sm:$0xff] }
 0x2d5   : > { %11750 = vmatmul.mubr.msk.f32.gmra.mrb[24].mxu1 %vm948_vm5, %v16719_v54 }
 0x2d6   : > { %11752 = vmatprep.mubr.msk.f32.mxu1 %vm948_vm5, %v14602_v59 }
 0x2d9   : > { %11753 = vmatmul.mubr.msk.f32.gmra.mrb[26].mxu1 %vm948_vm5, %v14606_v10  ;;  %v10196_v10 = vld [vmem:[%s13536_s18 + $0x20] sm:$0xf] }
 0x2da   : > { %11755 = vmatprep.mubr.msk.f32.mxu1 %vm948_vm5, %v14610_v22 }
 0x2dd   : > { %11756 = vmatmul.mubr.msk.f32.gmra.mrb[28].mxu1 %vm948_vm5, %v14614_v58 }
 0x2de   : > { %11758 = vmatprep.mubr.msk.f32.mxu1 %vm948_vm5, %v14824_v20 }
 0x2e1   : > { %11759 = vmatmul.mubr.msk.f32.gmra.mrb[30].mxu1 %vm948_vm5, %v14828_v46 }
 0x2e2   : > { %11763 = vmatprep.mubr.msk.f32.mxu1 %vm948_vm5, %v14365_v17  ;;  %v16736_v17 = vld [vmem:[#allocation70_spill] sm:$0xff] }
 0x2e5   : > { %11764 = vmatmul.mubr.msk.f32.vlgmr.msra.gmra.mrb[0].mxu1 %vm948_vm5, %v14369_v2  ;;  %v16737_v2 = vld [vmem:[#allocation72_spill] sm:$0xff] }
 0x2e6   : > { %11812 = vmatpush3.msk.msra.mxu1 %vm1045_vm4, %v10162_v48  ;;  %11766 = vmatprep.mubr.msk.f32.mxu1 %vm948_vm5, %v14373_v6  ;;  %v4432_v6 = vld [vmem:[#allocation2 + $0x229] sm:$0xff] }
 0x2e7   : > { %11861 = vmatprep.subr.msk.mxu1 %vm1045_vm4, %v10196_v10 }
 0x2e9   : > { %11767 = vmatmul.mubr.msk.f32.gmra.mrb[2].mxu1 %vm948_vm5, %v14377_v5  ;;  %v16726_v5 = vld [vmem:[#allocation55_spill] sm:$0xff] }
 0x2ea   : > { %11769 = vmatprep.mubr.msk.f32.mxu1 %vm948_vm5, %v14381_v1  ;;  %v16724_v1 = vld [vmem:[#allocation53_spill] sm:$0xff] }
 0x2ed   : > { %11770 = vmatmul.mubr.msk.f32.gmra.mrb[4].mxu1 %vm948_vm5, %v14385_v53  ;;  %v4021_v53 = vld [vmem:[#allocation2 + $0xd0] sm:$0xff] }
 0x2ee   : > { %11772 = vmatprep.mubr.msk.f32.mxu1 %vm948_vm5, %v14389_v49  ;;  %v4020_v49 = vld [vmem:[#allocation2 + $0xc8] sm:$0xff] }
 0x2f1   : > { %11773 = vmatmul.mubr.msk.f32.gmra.mrb[6].mxu1 %vm948_vm5, %v14393_v37  ;;  %v4019_v37 = vld [vmem:[#allocation2 + $0xb0] sm:$0xff] }
 0x2f2   : > { %11775 = vmatprep.mubr.msk.f32.mxu1 %vm948_vm5, %v14397_v33  ;;  %v4018_v33 = vld [vmem:[#allocation2 + $0xa8] sm:$0xff] }
 0x2f5   : > { %11776 = vmatmul.mubr.msk.f32.gmra.mrb[8].mxu1 %vm948_vm5, %v14401_v23  ;;  %v4017_v23 = vld [vmem:[#allocation2 + $0x90] sm:$0xff] }
 0x2f6   : > { %11778 = vmatprep.mubr.msk.f32.mxu1 %vm948_vm5, %v14405_v19  ;;  %v4016_v19 = vld [vmem:[#allocation2 + $0x88] sm:$0xff] }
 0x2f9   : > { %11779 = vmatmul.mubr.msk.f32.gmra.mrb[10].mxu1 %vm948_vm5, %v14409_v11  ;;  %v4015_v11 = vld [vmem:[#allocation2 + $0x70] sm:$0xff] }
 0x2fa   : > { %11781 = vmatprep.mubr.msk.f32.mxu1 %vm948_vm5, %v14413_v4  ;;  %v4014_v4 = vld [vmem:[#allocation2 + $0x68] sm:$0xff] }
 0x2fd   : > { %11782 = vmatmul.mubr.msk.f32.gmra.mrb[12].mxu1 %vm948_vm5, %v14417_v63  ;;  %v4013_v63 = vld [vmem:[#allocation2 + $0x50] sm:$0xff] }
 0x2fe   : > { %11784 = vmatprep.mubr.msk.f32.mxu1 %vm948_vm5, %v14421_v60 }
 0x301   : > { %11785 = vmatmul.mubr.msk.f32.gmra.mrb[14].mxu1 %vm948_vm5, %v14425_v55  ;;  %v4827_v55 = vld [vmem:[%s13527_s21 + $0x18] sm:$0xff] }
 0x302   : > { %11787 = vmatprep.mubr.msk.f32.mxu1 %vm948_vm5, %v14429_v52 }
 0x305   : > { %11788 = vmatmul.mubr.msk.f32.gmra.mrb[16].mxu1 %vm948_vm5, %v14433_v47  ;;  %v4826_v47 = vld [vmem:[%s13527_s21 + $0x10] sm:$0xff] }
 0x306   : > { %11790 = vmatprep.mubr.msk.f32.mxu1 %vm948_vm5, %v14437_v44  ;;  %v4825_v44 = vld [vmem:[%s13527_s21 + $0x8] sm:$0xff]  ;;  %v12575_v60 = vpack.c.bf16 %v4827_v55, %v4826_v47 }
 0x309   : > { %11791 = vmatmul.mubr.msk.f32.gmra.mrb[18].mxu1 %vm948_vm5, %v14441_v39  ;;  %v4824_v39 = vld [vmem:[%s13527_s21] sm:$0xff] }
 0x30a   : > { %11793 = vmatprep.mubr.msk.f32.mxu1 %vm948_vm5, %v14445_v36  ;;  %v4012_v36 = vld [vmem:[#allocation2 + $0x48] sm:$0xff]  ;;  %v12571_v52 = vpack.c.bf16 %v4825_v44, %v4824_v39 }
 0x30c   : > { %12572 = vmatprep.subr.bf16.mxu0 %v12571_v52 }
 0x30d   : > { %11794 = vmatmul.mubr.msk.f32.gmra.mrb[20].mxu1 %vm948_vm5, %v14455_v18  ;;  %v3653_v18 = vld [vmem:[#allocation2 + $0x22f] sm:$0xff]  ;;  %12574 = vmatpush3.bf16.msra.mxu0 %v12571_v52 }
 0x30e   : > { %11796 = vmatprep.mubr.msk.f32.mxu1 %vm948_vm5, %v14461_v12  ;;  %v3652_v12 = vld [vmem:[#allocation2 + $0x227] sm:$0xff]  ;;  %12576 = vmatprep.subr.bf16.mxu0 %v12575_v60 }
 0x311   : > { %11797 = vmatmul.mubr.msk.f32.gmra.mrb[22].mxu1 %vm948_vm5, %v14469_v7  ;;  %12578 = vmatpush3.bf16.msra.mxu0 %v12575_v60  ;;  %v10264_v7 = vld [vmem:[%s13559_s22 + $0x20] sm:$0xff] }
 0x312   : > { %11799 = vmatprep.mubr.msk.f32.mxu1 %vm948_vm5, %v14473_v24  ;;  %v10265_v24 = vld [vmem:[%s13559_s22 + $0x28] sm:$0xff] }
 0x315   : > { %11800 = vmatmul.mubr.msk.f32.gmra.mrb[24].mxu1 %vm948_vm5, %v14477_v31  ;;  %v12579_v31 = vpack.c.bf16 %v10265_v24, %v10264_v7 }
 0x316   : > { %11802 = vmatprep.mubr.msk.f32.mxu1 %vm948_vm5, %v14481_v9 }
 0x317   : > { %12580 = vmatprep.subr.bf16.mxu0 %v12579_v31 }
 0x319   : > { %11803 = vmatmul.mubr.msk.f32.gmra.mrb[26].mxu1 %vm948_vm5, %v14485_v16  ;;  %v10266_v16 = vld [vmem:[%s13559_s22 + $0x30] sm:$0xff] }
 0x31a   : > { %11805 = vmatprep.mubr.msk.f32.mxu1 %vm948_vm5, %v14680_v28 }
 0x31d   : > { %11806 = vmatmul.mubr.msk.f32.gmra.mrb[28].mxu1 %vm948_vm5, %v14686_v26 }
 0x31e   : > { %11808 = vmatprep.mubr.msk.f32.mxu1 %vm948_vm5, %v3652_v12 }
 0x321   : > { %11809 = vmatmul.mubr.msk.f32.gmra.mrb[30].mxu1 %vm948_vm5, %v3653_v18 }
 0x322   : > { %11813 = vmatprep.mubr.msk.f32.mxu1 %vm948_vm5, %v4012_v36 }
 0x325   : > { %11814 = vmatmul.mubr.msk.f32.vlgmr.msra.gmra.mrb[0].mxu1 %vm948_vm5, %v4013_v63 }
 0x326   : > { %11862 = vmatpush3.msk.msra.mxu1 %vm1045_vm4, %v10196_v10  ;;  %11816 = vmatprep.mubr.msk.f32.mxu1 %vm948_vm5, %v4014_v4  ;;  %v10267_v10 = vld [vmem:[%s13559_s22 + $0x38] sm:$0xff] }
 0x327   : > { %v12583_v26 = vpack.c.bf16 %v10267_v10, %v10266_v16 }
 0x329   : > { %11817 = vmatmul.mubr.msk.f32.gmra.mrb[2].mxu1 %vm948_vm5, %v4015_v11 }
 0x32a   : > { %11819 = vmatprep.mubr.msk.f32.mxu1 %vm948_vm5, %v4016_v19 }
 0x32d   : > { %11820 = vmatmul.mubr.msk.f32.gmra.mrb[4].mxu1 %vm948_vm5, %v4017_v23 }
 0x32e   : > { %11822 = vmatprep.mubr.msk.f32.mxu1 %vm948_vm5, %v4018_v33 }
 0x331   : > { %11823 = vmatmul.mubr.msk.f32.gmra.mrb[6].mxu1 %vm948_vm5, %v4019_v37 }
 0x332   : > { %11825 = vmatprep.mubr.msk.f32.mxu1 %vm948_vm5, %v4020_v49 }
 0x335   : > { %11826 = vmatmul.mubr.msk.f32.gmra.mrb[8].mxu1 %vm948_vm5, %v4021_v53 }
 0x336   : > { %11828 = vmatprep.mubr.msk.f32.mxu1 %vm948_vm5, %v14206_v21  ;;  %v4042_v21 = vld [vmem:[#allocation2 + $0x228] sm:$0xff] }
 0x339   : > { %11829 = vmatmul.mubr.msk.f32.gmra.mrb[10].mxu1 %vm948_vm5, %v14214_v25  ;;  %v4043_v25 = vld [vmem:[#allocation2 + $0x230] sm:$0xff] }
 0x33a   : > { %11831 = vmatprep.mubr.msk.f32.mxu1 %vm948_vm5, %v14226_v35  ;;  %v16720_v35 = vld [vmem:[#allocation49_spill] sm:$0xff] }
 0x33d   : > { %11832 = vmatmul.mubr.msk.f32.gmra.mrb[12].mxu1 %vm948_vm5, %v14234_v41  ;;  %v16721_v41 = vld [vmem:[#allocation50_spill] sm:$0xff] }
 0x33e   : > { %11834 = vmatprep.mubr.msk.f32.mxu1 %vm948_vm5, %v14246_v51  ;;  %v16722_v51 = vld [vmem:[#allocation51_spill] sm:$0xff] }
 0x341   : > { %11835 = vmatmul.mubr.msk.f32.gmra.mrb[14].mxu1 %vm948_vm5, %v14254_v57  ;;  %v16723_v57 = vld [vmem:[#allocation52_spill] sm:$0xff] }
 0x342   : > { %11837 = vmatprep.mubr.msk.f32.mxu1 %vm948_vm5, %v14266_v3  ;;  %v16725_v3 = vld [vmem:[#allocation54_spill] sm:$0xff] }
 0x345   : > { %11838 = vmatmul.mubr.msk.f32.gmra.mrb[16].mxu1 %vm948_vm5, %v14274_v14  ;;  %v16727_v14 = vld [vmem:[#allocation56_spill] sm:$0xff] }
 0x346   : > { %11840 = vmatprep.mubr.msk.f32.mxu1 %vm948_vm5, %v14286_v29  ;;  %v16728_v29 = vld [vmem:[#allocation57_spill] sm:$0xff] }
 0x349   : > { %11841 = vmatmul.mubr.msk.f32.gmra.mrb[18].mxu1 %vm948_vm5, %v14294_v42  ;;  %v16729_v42 = vld [vmem:[#allocation58_spill] sm:$0xff] }
 0x34a   : > { %11843 = vmatprep.mubr.msk.f32.mxu1 %vm948_vm5, %v14306_v61  ;;  %v16730_v61 = vld [vmem:[#allocation60_spill] sm:$0xff] }
 0x34d   : > { %11844 = vmatmul.mubr.msk.f32.gmra.mrb[20].mxu1 %vm948_vm5, %v14314_v15  ;;  %v16731_v15 = vld [vmem:[#allocation61_spill] sm:$0xff] }
 0x34e   : > { %11846 = vmatprep.mubr.msk.f32.mxu1 %vm948_vm5, %v14323_v27  ;;  %v16732_v27 = vld [vmem:[#allocation62_spill] sm:$0xff] }
 0x351   : > { %11847 = vmatmul.mubr.msk.f32.gmra.mrb[22].mxu1 %vm948_vm5, %v14328_v43  ;;  %v16733_v43 = vld [vmem:[#allocation63_spill] sm:$0xff] }
 0x352   : > { %11849 = vmatprep.mubr.msk.f32.mxu1 %vm948_vm5, %v14332_v45  ;;  %v16734_v45 = vld [vmem:[#allocation64_spill] sm:$0xff] }
 0x355   : > { %11850 = vmatmul.mubr.msk.f32.gmra.mrb[24].mxu1 %vm948_vm5, %v14336_v50  ;;  %v16735_v50 = vld [vmem:[#allocation68_spill] sm:$0xff] }
 0x356   : > { %11852 = vmatprep.mubr.msk.f32.mxu1 %vm948_vm5, %v16692_v30 }
 0x359   : > { %11853 = vmatmul.mubr.msk.f32.gmra.mrb[26].mxu1 %vm948_vm5, %v16693_v32 }
 0x35a   : > { %11855 = vmatprep.mubr.msk.f32.mxu1 %vm948_vm5, %v14753_v38 }
 0x35d   : > { %11856 = vmatmul.mubr.msk.f32.gmra.mrb[28].mxu1 %vm948_vm5, %v14757_v40 }
 0x35e   : > { %11858 = vmatprep.mubr.msk.f32.mxu1 %vm948_vm5, %v4042_v21 }
 0x361   : > { %11859 = vmatmul.mubr.msk.f32.gmra.mrb[30].mxu1 %vm948_vm5, %v4043_v25 }
 0x362   : > { %11863 = vmatprep.mubr.msk.f32.mxu1 %vm948_vm5, %v16696_v56 }
 0x365   : > { %11864 = vmatmul.mubr.msk.f32.vlgmr.msra.gmra.mrb[0].mxu1 %vm948_vm5, %v16720_v35 }
 0x366   : > { %11866 = vmatprep.mubr.msk.f32.mxu1 %vm948_vm5, %v16721_v41 }
 0x369   : > { %11867 = vmatmul.mubr.msk.f32.gmra.mrb[2].mxu1 %vm948_vm5, %v16722_v51 }
 0x36a   : > { %11869 = vmatprep.mubr.msk.f32.mxu1 %vm948_vm5, %v16723_v57 }
 0x36d   : > { %11870 = vmatmul.mubr.msk.f32.gmra.mrb[4].mxu1 %vm948_vm5, %v16724_v1 }
 0x36e   : > { %11872 = vmatprep.mubr.msk.f32.mxu1 %vm948_vm5, %v16725_v3 }
 0x371   : > { %11873 = vmatmul.mubr.msk.f32.gmra.mrb[6].mxu1 %vm948_vm5, %v16726_v5 }
 0x372   : > { %11875 = vmatprep.mubr.msk.f32.mxu1 %vm948_vm5, %v16727_v14 }
 0x375   : > { %11876 = vmatmul.mubr.msk.f32.gmra.mrb[8].mxu1 %vm948_vm5, %v16728_v29 }
 0x376   : > { %11878 = vmatprep.mubr.msk.f32.mxu1 %vm948_vm5, %v16729_v42 }
 0x379   : > { %11879 = vmatmul.mubr.msk.f32.gmra.mrb[10].mxu1 %vm948_vm5, %v16707_v8 }
 0x37a   : > { %11881 = vmatprep.mubr.msk.f32.mxu1 %vm948_vm5, %v16730_v61 }
 0x37d   : > { %11882 = vmatmul.mubr.msk.f32.gmra.mrb[12].mxu1 %vm948_vm5, %v16731_v15 }
 0x37e   : > { %11884 = vmatprep.mubr.msk.f32.mxu1 %vm948_vm5, %v16732_v27 }
 0x381   : > { %11885 = vmatmul.mubr.msk.f32.gmra.mrb[14].mxu1 %vm948_vm5, %v16733_v43 }
 0x382   : > { %11887 = vmatprep.mubr.msk.f32.mxu1 %vm948_vm5, %v16734_v45 }
 0x385   : > { %11888 = vmatmul.mubr.msk.f32.gmra.mrb[16].mxu1 %vm948_vm5, %v16713_v62 }
 0x386   : > { %11890 = vmatprep.mubr.msk.f32.mxu1 %vm948_vm5, %v16714_v0 }
 0x389   : > { %11891 = vmatmul.mubr.msk.f32.gmra.mrb[18].mxu1 %vm948_vm5, %v16715_v13 }
 0x38a   : > { %11893 = vmatprep.mubr.msk.f32.mxu1 %vm948_vm5, %v16735_v50 }
 0x38d   : > { %11894 = vmatmul.mubr.msk.f32.gmra.mrb[20].mxu1 %vm948_vm5, %v16717_v34 }
 0x38e   : > { %11896 = vmatprep.mubr.msk.f32.mxu1 %vm948_vm5, %v16736_v17 }
 0x391   : > { %11897 = vmatmul.mubr.msk.f32.gmra.mrb[22].mxu1 %vm948_vm5, %v16719_v54 }
 0x392   : > { %11899 = vmatprep.mubr.msk.f32.mxu1 %vm948_vm5, %v14602_v59  ;;  %v4433_v59 = vld [vmem:[#allocation2 + $0x231] sm:$0xff] }
 0x395   : > { %11900 = vmatmul.mubr.msk.f32.gmra.mrb[24].mxu1 %vm948_vm5, %v16737_v2 }
 0x396   : > { %11902 = vmatprep.mubr.msk.f32.mxu1 %vm948_vm5, %v14610_v22 }
 0x399   : > { %11903 = vmatmul.mubr.msk.f32.gmra.mrb[26].mxu1 %vm948_vm5, %v14614_v58 }
 0x39a   : > { %11905 = vmatprep.mubr.msk.f32.mxu1 %vm948_vm5, %v14824_v20 }
 0x39d   : > { %11906 = vmatmul.mubr.msk.f32.gmra.mrb[28].mxu1 %vm948_vm5, %v14828_v46 }
 0x39e   : > { %11908 = vmatprep.mubr.msk.f32.mxu1 %vm948_vm5, %v4432_v6 }
 0x3a1   : > { %11909 = vmatmul.mubr.msk.f32.gmra.mrb[30].mxu1 %vm948_vm5, %v4433_v59 }
 0x438   : > { %v11865_v9 = vpop.f32.mrb[0].mxu1 }
 0x439   : > { %v4601_v22 = vpop.f32.mrb[1].mxu1  ;;  %v4793_v28 = vmax.f32 %v11865_v9, 0.0 }
 0x43a   : > { %v4792_v58 = vmax.f32 %v4601_v22, 0.0  ;;  %v5297_v22 = vld [vmem:[#allocation3 + $0x8] sm:$0xff] }
 0x43c   : > { %v11868_v30 = vpop.f32.mrb[2].mxu1  ;;  %11919 = vmatprep.mubr.msk.f32.mxu0 %vm4835_vm6, %v4792_v58  ;;  %v5298_v58 = vld [vmem:[#allocation3 + $0x10] sm:$0xff] }
 0x43d   : > { %v4611_v32 = vpop.f32.mrb[3].mxu1  ;;  %11920 = vmatmul.mubr.msk.f32.vlgmr.msra.gmra.mrb[32].mxu0 %vm4835_vm6, %v4793_v28  ;;  %v4795_v40 = vmax.f32 %v11868_v30, 0.0  ;;  %v5293_v28 = vld [vmem:[%s13559_s22] sm:$0xff] }
 0x43e   : > { %v4794_v38 = vmax.f32 %v4611_v32, 0.0  ;;  %12582 = vmatpush3.bf16.msra.mxu0 %v12579_v31  ;;  %v5295_v32 = vld [vmem:[%s13559_s22 + $0x10] sm:$0xff] }
 0x43f   : > { %12584 = vmatprep.subr.bf16.mxu0 %v12583_v26 }
 0x440   : > { %v11871_v48 = vpop.f32.mrb[4].mxu1  ;;  %11922 = vmatprep.mubr.msk.f32.mxu0 %vm4835_vm6, %v4794_v38  ;;  %v5296_v38 = vld [vmem:[%s13559_s22 + $0x18] sm:$0xff] }
 0x441   : > { %v4621_v56 = vpop.f32.mrb[5].mxu1  ;;  %11923 = vmatmul.mubr.msk.f32.gmra.mrb[34].mxu0 %vm4835_vm6, %v4795_v40  ;;  %v4797_v0 = vmax.f32 %v11871_v48, 0.0  ;;  %v12591_v40 = vpack.c.bf16 %v5296_v38, %v5295_v32  ;;  %v10332_v48 = vld [vmem:[%s13559_s22 + $0x40] sm:$0xff] }
 0x442   : > { %v4796_v62 = vmax.f32 %v4621_v56, 0.0  ;;  %12586 = vmatpush3.bf16.msra.mxu0 %v12583_v26  ;;  %v5294_v26 = vld [vmem:[%s13559_s22 + $0x8] sm:$0xff] }
 0x443   : > { %v12587_v30 = vpack.c.bf16 %v5294_v26, %v5293_v28  ;;  %v10333_v56 = vld [vmem:[%s13559_s22 + $0x48] sm:$0xff] }
 0x444   : > { %v11874_v8 = vpop.f32.mrb[6].mxu1  ;;  %11925 = vmatprep.mubr.msk.f32.mxu0 %vm4835_vm6, %v4796_v62  ;;  %v15060_v62 = vpack.c.bf16 %v10333_v56, %v10332_v48 }
 0x445   : > { %v4631_v13 = vpop.f32.mrb[7].mxu1  ;;  %11926 = vmatmul.mubr.msk.f32.gmra.mrb[36].mxu0 %vm4835_vm6, %v4797_v0  ;;  %v4799_v34 = vmax.f32 %v11874_v8, 0.0  ;;  %12588 = vmatprep.subr.bf16.mxu0 %v12587_v30  ;;  %v15068_v0 = vld [vmem:[%s16738_s23] ss:$0 sm:$0xff] }
 0x446   : > { %v4798_v20 = vmax.f32 %v4631_v13, 0.0 }
 0x448   : > { %v11877_v46 = vpop.f32.mrb[8].mxu1  ;;  %11928 = vmatprep.mubr.msk.f32.mxu0 %vm4835_vm6, %v4798_v20 }
 0x449   : > { %v4641_v54 = vpop.f32.mrb[9].mxu1  ;;  %11929 = vmatmul.mubr.msk.f32.gmra.mrb[38].mxu0 %vm4835_vm6, %v4799_v34  ;;  %v4801_v18 = vmax.f32 %v11877_v46, 0.0  ;;  %v15076_v34 = vld [vmem:[%s671_s15] ss:$0 sm:$0xff] }
 0x44a   : > { %v4800_v12 = vmax.f32 %v4641_v54, 0.0 }
 0x44c   : > { %v11880_v36 = vpop.f32.mrb[10].mxu1  ;;  %11931 = vmatprep.mubr.msk.f32.mxu0 %vm4835_vm6, %v4800_v12 }
 0x44d   : > { %v4651_v39 = vpop.f32.mrb[11].mxu1  ;;  %11932 = vmatmul.mubr.msk.f32.gmra.mrb[40].mxu0 %vm4835_vm6, %v4801_v18  ;;  %v4803_v47 = vmax.f32 %v11880_v36, 0.0 }
 0x44e   : > { %v4802_v44 = vmax.f32 %v4651_v39, 0.0 }
 0x450   : > { %v11883_v52 = vpop.f32.mrb[12].mxu1  ;;  %11934 = vmatprep.mubr.msk.f32.mxu0 %vm4835_vm6, %v4802_v44 }
 0x451   : > { %v4661_v55 = vpop.f32.mrb[13].mxu1  ;;  %11935 = vmatmul.mubr.msk.f32.gmra.mrb[42].mxu0 %vm4835_vm6, %v4803_v47  ;;  %v4805_v63 = vmax.f32 %v11883_v52, 0.0 }
 0x452   : > { %v4804_v60 = vmax.f32 %v4661_v55, 0.0 }
 0x454   : > { %v11886_v4 = vpop.f32.mrb[14].mxu1  ;;  %11937 = vmatprep.mubr.msk.f32.mxu0 %vm4835_vm6, %v4804_v60 }
 0x455   : > { %v4671_v11 = vpop.f32.mrb[15].mxu1  ;;  %11938 = vmatmul.mubr.msk.f32.gmra.mrb[44].mxu0 %vm4835_vm6, %v4805_v63  ;;  %v4807_v23 = vmax.f32 %v11886_v4, 0.0 }
 0x456   : > { %v4806_v19 = vmax.f32 %v4671_v11, 0.0 }
 0x458   : > { %v11889_v33 = vpop.f32.mrb[16].mxu1  ;;  %11940 = vmatprep.mubr.msk.f32.mxu0 %vm4835_vm6, %v4806_v19 }
 0x459   : > { %v4681_v37 = vpop.f32.mrb[17].mxu1  ;;  %11941 = vmatmul.mubr.msk.f32.gmra.mrb[46].mxu0 %vm4835_vm6, %v4807_v23  ;;  %v4809_v53 = vmax.f32 %v11889_v33, 0.0 }
 0x45a   : > { %v4808_v49 = vmax.f32 %v4681_v37, 0.0 }
 0x45c   : > { %v11892_v21 = vpop.f32.mrb[18].mxu1  ;;  %11943 = vmatprep.mubr.msk.f32.mxu0 %vm4835_vm6, %v4808_v49 }
 0x45d   : > { %v4691_v25 = vpop.f32.mrb[19].mxu1  ;;  %11944 = vmatmul.mubr.msk.f32.gmra.mrb[48].mxu0 %vm4835_vm6, %v4809_v53  ;;  %v4811_v41 = vmax.f32 %v11892_v21, 0.0 }
 0x45e   : > { %v4810_v35 = vmax.f32 %v4691_v25, 0.0 }
 0x460   : > { %v11895_v51 = vpop.f32.mrb[20].mxu1  ;;  %11946 = vmatprep.mubr.msk.f32.mxu0 %vm4835_vm6, %v4810_v35 }
 0x461   : > { %v4701_v57 = vpop.f32.mrb[21].mxu1  ;;  %11947 = vmatmul.mubr.msk.f32.gmra.mrb[50].mxu0 %vm4835_vm6, %v4811_v41  ;;  %v4813_v3 = vmax.f32 %v11895_v51, 0.0 }
 0x462   : > { %v4812_v1 = vmax.f32 %v4701_v57, 0.0 }
 0x464   : > { %v11898_v5 = vpop.f32.mrb[22].mxu1  ;;  %11949 = vmatprep.mubr.msk.f32.mxu0 %vm4835_vm6, %v4812_v1 }
 0x465   : > { %v4711_v14 = vpop.f32.mrb[23].mxu1  ;;  %11950 = vmatmul.mubr.msk.f32.gmra.mrb[52].mxu0 %vm4835_vm6, %v4813_v3  ;;  %v4815_v42 = vmax.f32 %v11898_v5, 0.0 }
 0x466   : > { %v4814_v29 = vmax.f32 %v4711_v14, 0.0 }
 0x468   : > { %v11901_v61 = vpop.f32.mrb[24].mxu1  ;;  %11952 = vmatprep.mubr.msk.f32.mxu0 %vm4835_vm6, %v4814_v29 }
 0x469   : > { %v4721_v15 = vpop.f32.mrb[25].mxu1  ;;  %11953 = vmatmul.mubr.msk.f32.gmra.mrb[54].mxu0 %vm4835_vm6, %v4815_v42  ;;  %v4817_v43 = vmax.f32 %v11901_v61, 0.0 }
 0x46a   : > { %v4816_v27 = vmax.f32 %v4721_v15, 0.0 }
 0x46c   : > { %v11904_v45 = vpop.f32.mrb[26].mxu1  ;;  %11955 = vmatprep.mubr.msk.f32.mxu0 %vm4835_vm6, %v4816_v27 }
 0x46d   : > { %v4731_v50 = vpop.f32.mrb[27].mxu1  ;;  %11956 = vmatmul.mubr.msk.f32.gmra.mrb[56].mxu0 %vm4835_vm6, %v4817_v43  ;;  %v4819_v2 = vmax.f32 %v11904_v45, 0.0 }
 0x46e   : > { %v4818_v17 = vmax.f32 %v4731_v50, 0.0 }
 0x470   : > { %v11907_v6 = vpop.f32.mrb[28].mxu1  ;;  %11958 = vmatprep.mubr.msk.f32.mxu0 %vm4835_vm6, %v4818_v17 }
 0x471   : > { %v4741_v59 = vpop.f32.mrb[29].mxu1  ;;  %11959 = vmatmul.mubr.msk.f32.gmra.mrb[58].mxu0 %vm4835_vm6, %v4819_v2  ;;  %v4821_v24 = vmax.f32 %v11907_v6, 0.0 }
 0x472   : > { %v4820_v7 = vmax.f32 %v4741_v59, 0.0 }
 0x474   : > { %v11910_v31 = vpop.f32.mrb[30].mxu1  ;;  %11961 = vmatprep.mubr.msk.f32.mxu0 %vm4835_vm6, %v4820_v7 }
 0x475   : > { %v4751_v9 = vpop.f32.mrb[31].mxu1  ;;  %11962 = vmatmul.mubr.msk.f32.gmra.mrb[60].mxu0 %vm4835_vm6, %v4821_v24  ;;  %v4823_v10 = vmax.f32 %v11910_v31, 0.0 }
 0x476   : > { %v4822_v16 = vmax.f32 %v4751_v9, 0.0 }
 0x478   : > { %11964 = vmatprep.mubr.msk.f32.mxu0 %vm4835_vm6, %v4822_v16 }
 0x479   : > { %11965 = vmatmul.mubr.msk.f32.gmra.mrb[62].mxu0 %vm4835_vm6, %v4823_v10 }
 0x47a   : > { %11975 = vmatprep.mubr.msk.f32.mxu0 %vm4835_vm6, %v5297_v22 }
 0x47d   : > { %11976 = vmatmul.mubr.msk.f32.vlgmr.msra.gmra.mrb[64].mxu0 %vm4835_vm6, %v5298_v58 }
 0x47e   : > { %12590 = vmatpush3.bf16.msra.mxu0 %v12587_v30 }
 0x47f   : > { %12592 = vmatprep.subr.bf16.mxu0 %v12591_v40 }
 0x482   : > { %12594 = vmatpush3.bf16.msra.mxu0 %v12591_v40 }
 0x483   : > { %12596 = vmatprep.subr.bf16.mxu0 %v15060_v62 }
 0x510   : > { %v11921_v8 = vpop.f32.mrb[32].mxu0 }
 0x511   : > { %v5004_v13 = vadd.f32 %v11921_v8, %v15068_v0  ;;  %v4998_v20 = vpop.f32.mrb[33].mxu0 }
 0x512   : > { %v4999_v46 = vadd.f32 %v15068_v0, %v4998_v20 }
 0x513   : > { %v5158_v54 = vmax.f32 %v5004_v13, 0.0 }
 0x514   : > { %v5157_v12 = vmax.f32 %v4999_v46, 0.0  ;;  %v11924_v18 = vpop.f32.mrb[34].mxu0 }
 0x515   : > { %v5197_v36 = vadd.f32 %v15076_v34, %v5158_v54  ;;  %v5014_v39 = vadd.f32 %v11924_v18, %v15068_v0  ;;  %v5008_v44 = vpop.f32.mrb[35].mxu0 }
 0x516   : > { %v5196_v47 = vadd.f32 %v15076_v34, %v5157_v12  ;;  %v5009_v52 = vadd.f32 %v15068_v0, %v5008_v44 }
 0x517   : > { %5230 = vst.msk [vmem:[#allocation3 + $0x30] sm:$0xff] %vm4835_vm6, %v5197_v36  ;;  %v5160_v55 = vmax.f32 %v5014_v39, 0.0 }
 0x518   : > { %5229 = vst.msk [vmem:[#allocation3 + $0x28] sm:$0xff] %vm4835_vm6, %v5196_v47  ;;  %v5159_v60 = vmax.f32 %v5009_v52, 0.0  ;;  %v11927_v63 = vpop.f32.mrb[36].mxu0 }
 0x519   : > { %v5199_v4 = vadd.f32 %v15076_v34, %v5160_v55  ;;  %v5024_v11 = vadd.f32 %v11927_v63, %v15068_v0  ;;  %v5018_v19 = vpop.f32.mrb[37].mxu0 }
 0x51a   : > { %v5198_v23 = vadd.f32 %v15076_v34, %v5159_v60  ;;  %v5019_v33 = vadd.f32 %v15068_v0, %v5018_v19 }
 0x51b   : > { %5232 = vst.msk [vmem:[#allocation3 + $0x50] sm:$0xff] %vm4835_vm6, %v5199_v4  ;;  %v5162_v37 = vmax.f32 %v5024_v11, 0.0 }
 0x51c   : > { %5231 = vst.msk [vmem:[#allocation3 + $0x48] sm:$0xff] %vm4835_vm6, %v5198_v23  ;;  %v5161_v49 = vmax.f32 %v5019_v33, 0.0  ;;  %v11930_v53 = vpop.f32.mrb[38].mxu0 }
 0x51d   : > { %v5201_v21 = vadd.f32 %v15076_v34, %v5162_v37  ;;  %v5034_v25 = vadd.f32 %v11930_v53, %v15068_v0  ;;  %v5028_v35 = vpop.f32.mrb[39].mxu0 }
 0x51e   : > { %v5200_v41 = vadd.f32 %v15076_v34, %v5161_v49  ;;  %v5029_v51 = vadd.f32 %v15068_v0, %v5028_v35  ;;  %v15101_v14 = vld [vmem:[#allocation3 + $0x30] sm:$0xff] }
 0x51f   : > { %5234 = vst.msk [vmem:[#allocation3 + $0x70] sm:$0xff] %vm4835_vm6, %v5201_v21  ;;  %v5164_v57 = vmax.f32 %v5034_v25, 0.0  ;;  %v15096_v1 = vld [vmem:[#allocation3 + $0x28] sm:$0xff] }
 0x520   : > { %5233 = vst.msk [vmem:[#allocation3 + $0x68] sm:$0xff] %vm4835_vm6, %v5200_v41  ;;  %v5163_v3 = vmax.f32 %v5029_v51, 0.0  ;;  %v11933_v5 = vpop.f32.mrb[40].mxu0  ;;  %11978 = vmatprep.mubr.msk.f32.mxu0 %vm4835_vm6, %v15096_v1 }
 0x521   : > { %v5203_v29 = vadd.f32 %v15076_v34, %v5164_v57  ;;  %v5044_v42 = vadd.f32 %v11933_v5, %v15068_v0  ;;  %v5038_v61 = vpop.f32.mrb[41].mxu0  ;;  %11979 = vmatmul.mubr.msk.f32.gmra.mrb[66].mxu0 %vm4835_vm6, %v15101_v14 }
 0x522   : > { %v5202_v15 = vadd.f32 %v15076_v34, %v5163_v3  ;;  %v5039_v27 = vadd.f32 %v15068_v0, %v5038_v61  ;;  %v15115_v2 = vld [vmem:[#allocation3 + $0x50] sm:$0xff] }
 0x523   : > { %5236 = vst.msk [vmem:[#allocation3 + $0x90] sm:$0xff] %vm4835_vm6, %v5203_v29  ;;  %v5166_v43 = vmax.f32 %v5044_v42, 0.0  ;;  %v15110_v45 = vld [vmem:[#allocation3 + $0x48] sm:$0xff] }
 0x524   : > { %5235 = vst.msk [vmem:[#allocation3 + $0x88] sm:$0xff] %vm4835_vm6, %v5202_v15  ;;  %v5165_v50 = vmax.f32 %v5039_v27, 0.0  ;;  %v11936_v17 = vpop.f32.mrb[42].mxu0  ;;  %11981 = vmatprep.mubr.msk.f32.mxu0 %vm4835_vm6, %v15110_v45 }
 0x525   : > { %v5205_v6 = vadd.f32 %v15076_v34, %v5166_v43  ;;  %v5054_v59 = vadd.f32 %v11936_v17, %v15068_v0  ;;  %v5048_v7 = vpop.f32.mrb[43].mxu0  ;;  %11982 = vmatmul.mubr.msk.f32.gmra.mrb[68].mxu0 %vm4835_vm6, %v15115_v2 }
 0x526   : > { %v5204_v24 = vadd.f32 %v15076_v34, %v5165_v50  ;;  %v5049_v31 = vadd.f32 %v15068_v0, %v5048_v7  ;;  %v15129_v58 = vld [vmem:[#allocation3 + $0x70] sm:$0xff] }
 0x527   : > { %5238 = vst.msk [vmem:[#allocation3 + $0xb0] sm:$0xff] %vm4835_vm6, %v5205_v6  ;;  %v5168_v9 = vmax.f32 %v5054_v59, 0.0  ;;  %v15124_v16 = vld [vmem:[#allocation3 + $0x68] sm:$0xff] }
 0x528   : > { %5237 = vst.msk [vmem:[#allocation3 + $0xa8] sm:$0xff] %vm4835_vm6, %v5204_v24  ;;  %v5167_v10 = vmax.f32 %v5049_v31, 0.0  ;;  %v11939_v22 = vpop.f32.mrb[44].mxu0  ;;  %11984 = vmatprep.mubr.msk.f32.mxu0 %vm4835_vm6, %v15124_v16 }
 0x529   : > { %v5207_v28 = vadd.f32 %v15076_v34, %v5168_v9  ;;  %v5064_v26 = vadd.f32 %v11939_v22, %v15068_v0  ;;  %v5058_v30 = vpop.f32.mrb[45].mxu0  ;;  %11985 = vmatmul.mubr.msk.f32.gmra.mrb[70].mxu0 %vm4835_vm6, %v15129_v58 }
 0x52a   : > { %v5206_v32 = vadd.f32 %v15076_v34, %v5167_v10  ;;  %v5059_v38 = vadd.f32 %v15068_v0, %v5058_v30  ;;  %v15143_v13 = vld [vmem:[#allocation3 + $0x90] sm:$0xff] }
 0x52b   : > { %5240 = vst.msk [vmem:[#allocation3 + $0xd0] sm:$0xff] %vm4835_vm6, %v5207_v28  ;;  %v5170_v40 = vmax.f32 %v5064_v26, 0.0  ;;  %v15138_v48 = vld [vmem:[#allocation3 + $0x88] sm:$0xff] }
 0x52c   : > { %5239 = vst.msk [vmem:[#allocation3 + $0xc8] sm:$0xff] %vm4835_vm6, %v5206_v32  ;;  %v5169_v56 = vmax.f32 %v5059_v38, 0.0  ;;  %v11942_v8 = vpop.f32.mrb[46].mxu0  ;;  %11987 = vmatprep.mubr.msk.f32.mxu0 %vm4835_vm6, %v15138_v48 }
 0x52d   : > { %v5209_v20 = vadd.f32 %v15076_v34, %v5170_v40  ;;  %v5074_v46 = vadd.f32 %v11942_v8, %v15068_v0  ;;  %v5068_v54 = vpop.f32.mrb[47].mxu0  ;;  %11988 = vmatmul.mubr.msk.f32.gmra.mrb[72].mxu0 %vm4835_vm6, %v15143_v13 }
 0x52e   : > { %v5208_v12 = vadd.f32 %v15076_v34, %v5169_v56  ;;  %v5069_v18 = vadd.f32 %v15068_v0, %v5068_v54  ;;  %v15157_v52 = vld [vmem:[#allocation3 + $0xb0] sm:$0xff] }
 0x52f   : > { %5242 = vst.msk [vmem:[#allocation3 + $0xf0] sm:$0xff] %vm4835_vm6, %v5209_v20  ;;  %v5172_v36 = vmax.f32 %v5074_v46, 0.0  ;;  %v15152_v39 = vld [vmem:[#allocation3 + $0xa8] sm:$0xff] }
 0x530   : > { %5241 = vst.msk [vmem:[#allocation3 + $0xe8] sm:$0xff] %vm4835_vm6, %v5208_v12  ;;  %v5171_v44 = vmax.f32 %v5069_v18, 0.0  ;;  %v11945_v47 = vpop.f32.mrb[48].mxu0  ;;  %11990 = vmatprep.mubr.msk.f32.mxu0 %vm4835_vm6, %v15152_v39 }
 0x531   : > { %v5211_v55 = vadd.f32 %v15076_v34, %v5172_v36  ;;  %v5084_v60 = vadd.f32 %v11945_v47, %v15068_v0  ;;  %v5078_v63 = vpop.f32.mrb[49].mxu0  ;;  %11991 = vmatmul.mubr.msk.f32.gmra.mrb[74].mxu0 %vm4835_vm6, %v15157_v52 }
 0x532   : > { %v5210_v4 = vadd.f32 %v15076_v34, %v5171_v44  ;;  %v5079_v11 = vadd.f32 %v15068_v0, %v5078_v63  ;;  %v15171_v49 = vld [vmem:[#allocation3 + $0xd0] sm:$0xff] }
 0x533   : > { %5244 = vst.msk [vmem:[#allocation3 + $0x110] sm:$0xff] %vm4835_vm6, %v5211_v55  ;;  %v5174_v19 = vmax.f32 %v5084_v60, 0.0  ;;  %v15166_v23 = vld [vmem:[#allocation3 + $0xc8] sm:$0xff] }
 0x534   : > { %5243 = vst.msk [vmem:[#allocation3 + $0x108] sm:$0xff] %vm4835_vm6, %v5210_v4  ;;  %v5173_v33 = vmax.f32 %v5079_v11, 0.0  ;;  %v11948_v37 = vpop.f32.mrb[50].mxu0  ;;  %11993 = vmatprep.mubr.msk.f32.mxu0 %vm4835_vm6, %v15166_v23 }
 0x535   : > { %v5213_v53 = vadd.f32 %v15076_v34, %v5174_v19  ;;  %v5094_v21 = vadd.f32 %v11948_v37, %v15068_v0  ;;  %v5088_v25 = vpop.f32.mrb[51].mxu0  ;;  %11994 = vmatmul.mubr.msk.f32.gmra.mrb[76].mxu0 %vm4835_vm6, %v15171_v49 }
 0x536   : > { %v5212_v35 = vadd.f32 %v15076_v34, %v5173_v33  ;;  %v5089_v41 = vadd.f32 %v15068_v0, %v5088_v25  ;;  %v15185_v29 = vld [vmem:[#allocation3 + $0xf0] sm:$0xff] }
 0x537   : > { %5246 = vst.msk [vmem:[#allocation3 + $0x130] sm:$0xff] %vm4835_vm6, %v5213_v53  ;;  %v5176_v51 = vmax.f32 %v5094_v21, 0.0  ;;  %v15180_v57 = vld [vmem:[#allocation3 + $0xe8] sm:$0xff] }
 0x538   : > { %5245 = vst.msk [vmem:[#allocation3 + $0x128] sm:$0xff] %vm4835_vm6, %v5212_v35  ;;  %v5175_v3 = vmax.f32 %v5089_v41, 0.0  ;;  %v11951_v5 = vpop.f32.mrb[52].mxu0  ;;  %11996 = vmatprep.mubr.msk.f32.mxu0 %vm4835_vm6, %v15180_v57 }
 0x539   : > { %v5215_v42 = vadd.f32 %v15076_v34, %v5176_v51  ;;  %v5104_v61 = vadd.f32 %v11951_v5, %v15068_v0  ;;  %v5098_v15 = vpop.f32.mrb[53].mxu0  ;;  %11997 = vmatmul.mubr.msk.f32.gmra.mrb[78].mxu0 %vm4835_vm6, %v15185_v29 }
 0x53a   : > { %v5214_v27 = vadd.f32 %v15076_v34, %v5175_v3  ;;  %v5099_v43 = vadd.f32 %v15068_v0, %v5098_v15  ;;  %v15199_v7 = vld [vmem:[#allocation3 + $0x110] sm:$0xff] }
 0x53b   : > { %5248 = vst.msk [vmem:[#allocation3 + $0x150] sm:$0xff] %vm4835_vm6, %v5215_v42  ;;  %v5178_v50 = vmax.f32 %v5104_v61, 0.0  ;;  %v15194_v17 = vld [vmem:[#allocation3 + $0x108] sm:$0xff] }
 0x53c   : > { %5247 = vst.msk [vmem:[#allocation3 + $0x148] sm:$0xff] %vm4835_vm6, %v5214_v27  ;;  %v5177_v6 = vmax.f32 %v5099_v43, 0.0  ;;  %v11954_v59 = vpop.f32.mrb[54].mxu0  ;;  %11999 = vmatprep.mubr.msk.f32.mxu0 %vm4835_vm6, %v15194_v17 }
 0x53d   : > { %v5217_v24 = vadd.f32 %v15076_v34, %v5178_v50  ;;  %v5114_v31 = vadd.f32 %v11954_v59, %v15068_v0  ;;  %v5108_v9 = vpop.f32.mrb[55].mxu0  ;;  %12000 = vmatmul.mubr.msk.f32.gmra.mrb[80].mxu0 %vm4835_vm6, %v15199_v7 }
 0x53e   : > { %v5216_v10 = vadd.f32 %v15076_v34, %v5177_v6  ;;  %v5109_v22 = vadd.f32 %v15068_v0, %v5108_v9  ;;  %v15213_v38 = vld [vmem:[#allocation3 + $0x130] sm:$0xff] }
 0x53f   : > { %5250 = vst.msk [vmem:[#allocation3 + $0x170] sm:$0xff] %vm4835_vm6, %v5217_v24  ;;  %v5180_v28 = vmax.f32 %v5114_v31, 0.0  ;;  %v15208_v26 = vld [vmem:[#allocation3 + $0x128] sm:$0xff] }
 0x540   : > { %5249 = vst.msk [vmem:[#allocation3 + $0x168] sm:$0xff] %vm4835_vm6, %v5216_v10  ;;  %v5179_v30 = vmax.f32 %v5109_v22, 0.0  ;;  %v11957_v32 = vpop.f32.mrb[56].mxu0  ;;  %12002 = vmatprep.mubr.msk.f32.mxu0 %vm4835_vm6, %v15208_v26 }
 0x541   : > { %v5219_v40 = vadd.f32 %v15076_v34, %v5180_v28  ;;  %v5124_v56 = vadd.f32 %v11957_v32, %v15068_v0  ;;  %v5118_v8 = vpop.f32.mrb[57].mxu0  ;;  %12003 = vmatmul.mubr.msk.f32.gmra.mrb[82].mxu0 %vm4835_vm6, %v15213_v38 }
 0x542   : > { %v5218_v20 = vadd.f32 %v15076_v34, %v5179_v30  ;;  %v5119_v46 = vadd.f32 %v15068_v0, %v5118_v8  ;;  %v15227_v44 = vld [vmem:[#allocation3 + $0x150] sm:$0xff]  ;;  %v10335_v8 = vld [vmem:[%s13559_s22 + $0x58] sm:$0xff] }
 0x543   : > { %5252 = vst.msk [vmem:[#allocation3 + $0x190] sm:$0xff] %vm4835_vm6, %v5219_v40  ;;  %v5182_v54 = vmax.f32 %v5124_v56, 0.0  ;;  %v15222_v12 = vld [vmem:[#allocation3 + $0x148] sm:$0xff]  ;;  %v10334_v56 = vld [vmem:[%s13559_s22 + $0x50] sm:$0xff] }
 0x544   : > { %5251 = vst.msk [vmem:[#allocation3 + $0x188] sm:$0xff] %vm4835_vm6, %v5218_v20  ;;  %v5181_v18 = vmax.f32 %v5119_v46, 0.0  ;;  %v11960_v36 = vpop.f32.mrb[58].mxu0  ;;  %12005 = vmatprep.mubr.msk.f32.mxu0 %vm4835_vm6, %v15222_v12  ;;  %v5261_v40 = vld [vmem:[#allocation3 + $0x7] sm:$0xff]  ;;  %v5262_v20 = vld [vmem:[#allocation3 + $0xf] sm:$0xff]  ;;  %v12599_v46 = vpack.c.bf16 %v10335_v8, %v10334_v56 }
 0x545   : > { %v5221_v47 = vadd.f32 %v15076_v34, %v5182_v54  ;;  %v5134_v55 = vadd.f32 %v11960_v36, %v15068_v0  ;;  %v5128_v60 = vpop.f32.mrb[59].mxu0  ;;  %12006 = vmatmul.mubr.msk.f32.gmra.mrb[84].mxu0 %vm4835_vm6, %v15227_v44  ;;  %v10368_v54 = vld [vmem:[%s13559_s22 + $0x60] sm:$0xff] }
 0x546   : > { %v5220_v63 = vadd.f32 %v15076_v34, %v5181_v18  ;;  %v5129_v4 = vadd.f32 %v15068_v0, %v5128_v60  ;;  %v15241_v53 = vld [vmem:[#allocation3 + $0x170] sm:$0xff]  ;;  %v10369_v18 = vld [vmem:[%s13559_s22 + $0x68] sm:$0xff] }
 0x547   : > { %5254 = vst.msk [vmem:[#allocation3 + $0x1b0] sm:$0xff] %vm4835_vm6, %v5221_v47  ;;  %v5184_v11 = vmax.f32 %v5134_v55, 0.0  ;;  %v15236_v19 = vld [vmem:[#allocation3 + $0x168] sm:$0xff]  ;;  %v15304_v47 = vpack.c.bf16 %v10369_v18, %v10368_v54  ;;  %v10370_v54 = vld [vmem:[%s13559_s22 + $0x70] sm:$0xff]  ;;  %v10371_v18 = vld [vmem:[%s13559_s22 + $0x78] sm:$0xff] }
 0x548   : > { %5253 = vst.msk [vmem:[#allocation3 + $0x1a8] sm:$0xff] %vm4835_vm6, %v5220_v63  ;;  %v5183_v33 = vmax.f32 %v5129_v4, 0.0  ;;  %v11963_v37 = vpop.f32.mrb[60].mxu0  ;;  %12008 = vmatprep.mubr.msk.f32.mxu0 %vm4835_vm6, %v15236_v19  ;;  %v15299_v36 = vld [vmem:[#allocation3 + $0x27] sm:$0xff]  ;;  %v15306_v55 = vld [vmem:[#allocation3 + $0x2f] sm:$0xff] }
 0x549   : > { %v5223_v21 = vadd.f32 %v15076_v34, %v5184_v11  ;;  %v5144_v25 = vadd.f32 %v11963_v37, %v15068_v0  ;;  %v5138_v35 = vpop.f32.mrb[61].mxu0  ;;  %12009 = vmatmul.mubr.msk.f32.gmra.mrb[86].mxu0 %vm4835_vm6, %v15241_v53  ;;  %v15310_v60 = vld [vmem:[#allocation3 + $0x47] sm:$0xff]  ;;  %v15323_v4 = vld [vmem:[#allocation3 + $0x6f] sm:$0xff] }
 0x54a   : > { %v5222_v41 = vadd.f32 %v15076_v34, %v5183_v33  ;;  %v5139_v51 = vadd.f32 %v15068_v0, %v5138_v35  ;;  %v15255_v15 = vld [vmem:[#allocation3 + $0x190] sm:$0xff]  ;;  %v15319_v63 = vld [vmem:[#allocation3 + $0x67] sm:$0xff] }
 0x54b   : > { %5256 = vst.msk [vmem:[#allocation3 + $0x1d0] sm:$0xff] %vm4835_vm6, %v5223_v21  ;;  %v5186_v3 = vmax.f32 %v5144_v25, 0.0  ;;  %v15250_v5 = vld [vmem:[#allocation3 + $0x188] sm:$0xff]  ;;  %16739 = vst [vmem:[#allocation42_spill] sm:$0xff] %v15255_v15 }
 0x54c   : > { %5255 = vst.msk [vmem:[#allocation3 + $0x1c8] sm:$0xff] %vm4835_vm6, %v5222_v41  ;;  %v5185_v42 = vmax.f32 %v5139_v51, 0.0  ;;  %v11966_v61 = vpop.f32.mrb[62].mxu0  ;;  %12011 = vmatprep.mubr.msk.f32.mxu0 %vm4835_vm6, %v15250_v5  ;;  %v15327_v11 = vld [vmem:[#allocation3 + $0x87] sm:$0xff]  ;;  %v15331_v33 = vld [vmem:[#allocation3 + $0x8f] sm:$0xff] }
 0x54d   : > { %v5225_v27 = vadd.f32 %v15076_v34, %v5186_v3  ;;  %v5154_v43 = vadd.f32 %v11966_v61, %v15068_v0  ;;  %v5148_v50 = vpop.f32.mrb[63].mxu0  ;;  %12012 = vmatmul.mubr.msk.f32.gmra.mrb[88].mxu0 %vm4835_vm6, %v15255_v15  ;;  %v15335_v37 = vld [vmem:[#allocation3 + $0xa7] sm:$0xff]  ;;  %v15339_v21 = vld [vmem:[#allocation3 + $0xaf] sm:$0xff] }
 0x54e   : > { %v5224_v6 = vadd.f32 %v15076_v34, %v5185_v42  ;;  %v5149_v59 = vadd.f32 %v15068_v0, %v5148_v50  ;;  %v15269_v10 = vld [vmem:[#allocation3 + $0x1b0] sm:$0xff]  ;;  %v15343_v25 = vld [vmem:[#allocation3 + $0xc7] sm:$0xff] }
 0x54f   : > { %5258 = vst.msk [vmem:[#allocation3 + $0x1f0] sm:$0xff] %vm4835_vm6, %v5225_v27  ;;  %v5188_v24 = vmax.f32 %v5154_v43, 0.0  ;;  %v15264_v31 = vld [vmem:[#allocation3 + $0x1a8] sm:$0xff]  ;;  %16741 = vst [vmem:[#allocation46_spill] sm:$0xff] %v15269_v10  ;;  %v15436_v15 = vld [vmem:[#allocation3 + $0x31] sm:$0xff] }
 0x550   : > { %16740 = vst [vmem:[#allocation43_spill] sm:$0xff] %v15264_v31  ;;  %5257 = vst.msk [vmem:[#allocation3 + $0x1e8] sm:$0xff] %vm4835_vm6, %v5224_v6  ;;  %v5187_v9 = vmax.f32 %v5149_v59, 0.0  ;;  %12014 = vmatprep.mubr.msk.f32.mxu0 %vm4835_vm6, %v15264_v31  ;;  %v15347_v35 = vld [vmem:[#allocation3 + $0xcf] sm:$0xff]  ;;  %v15351_v41 = vld [vmem:[#allocation3 + $0xe7] sm:$0xff] }
 0x551   : > { %v5227_v22 = vadd.f32 %v15076_v34, %v5188_v24  ;;  %12015 = vmatmul.mubr.msk.f32.gmra.mrb[90].mxu0 %vm4835_vm6, %v15269_v10  ;;  %v15355_v51 = vld [vmem:[#allocation3 + $0xef] sm:$0xff]  ;;  %v15359_v3 = vld [vmem:[#allocation3 + $0x107] sm:$0xff] }
 0x552   : > { %v5226_v0 = vadd.f32 %v15076_v34, %v5187_v9  ;;  %v15281_v30 = vld [vmem:[#allocation3 + $0x1d0] sm:$0xff]  ;;  %v15367_v61 = vld [vmem:[#allocation3 + $0x127] sm:$0xff] }
 0x553   : > { %5260 = vst.msk [vmem:[#allocation3 + $0x210] sm:$0xff] %vm4835_vm6, %v5227_v22  ;;  %v15276_v28 = vld [vmem:[#allocation3 + $0x1c8] sm:$0xff]  ;;  %16743 = vst [vmem:[#allocation48_spill] sm:$0xff] %v15281_v30 }
 0x554   : > { %16742 = vst [vmem:[#allocation47_spill] sm:$0xff] %v15276_v28  ;;  %5259 = vst.msk [vmem:[#allocation3 + $0x208] sm:$0xff] %vm4835_vm6, %v5226_v0  ;;  %12017 = vmatprep.mubr.msk.f32.mxu0 %vm4835_vm6, %v15276_v28  ;;  %v15363_v42 = vld [vmem:[#allocation3 + $0x10f] sm:$0xff]  ;;  %v15375_v43 = vld [vmem:[#allocation3 + $0x147] sm:$0xff] }
 0x555   : > { %12018 = vmatmul.mubr.msk.f32.gmra.mrb[92].mxu0 %vm4835_vm6, %v15281_v30  ;;  %v15371_v27 = vld [vmem:[#allocation3 + $0x12f] sm:$0xff]  ;;  %v15383_v6 = vld [vmem:[#allocation3 + $0x167] sm:$0xff] }
 0x556   : > { %v15289_v34 = vld [vmem:[#allocation3 + $0x1f0] sm:$0xff]  ;;  %v15391_v24 = vld [vmem:[#allocation3 + $0x187] sm:$0xff] }
 0x557   : > { %v15285_v32 = vld [vmem:[#allocation3 + $0x1e8] sm:$0xff]  ;;  %16745 = vst [vmem:[#allocation65_spill] sm:$0xff] %v15289_v34  ;;  %v10404_v30 = vld [vmem:[%s13559_s22 + $0x80] sm:$0xff] }
 0x558   : > { %16744 = vst [vmem:[#allocation59_spill] sm:$0xff] %v15285_v32  ;;  %12020 = vmatprep.mubr.msk.f32.mxu0 %vm4835_vm6, %v15285_v32  ;;  %v15379_v50 = vld [vmem:[#allocation3 + $0x14f] sm:$0xff]  ;;  %v15399_v22 = vld [vmem:[#allocation3 + $0x1a7] sm:$0xff]  ;;  %v12607_v32 = vpack.c.bf16 %v10371_v18, %v10370_v54 }
 0x559   : > { %12021 = vmatmul.mubr.msk.f32.gmra.mrb[94].mxu0 %vm4835_vm6, %v15289_v34  ;;  %v15387_v59 = vld [vmem:[#allocation3 + $0x16f] sm:$0xff]  ;;  %v15415_v8 = vld [vmem:[#allocation3 + $0x1e7] sm:$0xff] }
 0x55a   : > { %12031 = vmatprep.mubr.msk.f32.mxu0 %vm4835_vm6, %v5261_v40  ;;  %v15395_v9 = vld [vmem:[#allocation3 + $0x18f] sm:$0xff]  ;;  %v15407_v40 = vld [vmem:[#allocation3 + $0x1c7] sm:$0xff] }
 0x55b   : > { %v15403_v0 = vld [vmem:[#allocation3 + $0x1af] sm:$0xff] }
 0x55c   : > { %v15411_v56 = vld [vmem:[#allocation3 + $0x1cf] sm:$0xff] }
 0x55d   : > { %12032 = vmatmul.mubr.msk.f32.vlgmr.msra.gmra.mrb[64].mxu0 %vm4835_vm6, %v5262_v20  ;;  %v5976_v20 = vld [vmem:[#allocation3 + $0x9] sm:$0xff]  ;;  %v5977_v34 = vld [vmem:[#allocation3 + $0x11] sm:$0xff] }
 0x55e   : > { %12598 = vmatpush3.bf16.msra.mxu0 %v15060_v62  ;;  %12034 = vmatprep.mubr.msk.f32.mxu0 %vm4835_vm6, %v15299_v36  ;;  %v15315_v62 = vld [vmem:[#allocation3 + $0x4f] sm:$0xff] }
 0x55f   : > { %12600 = vmatprep.subr.bf16.mxu0 %v12599_v46  ;;  %v10405_v28 = vld [vmem:[%s13559_s22 + $0x88] sm:$0xff]  ;;  %v15469_v18 = vld [vmem:[#allocation3 + $0xb1] sm:$0xff] }
 0x560   : > { %v15429_v10 = vld [vmem:[#allocation3 + $0x29] sm:$0xff]  ;;  %v15434_v31 = vpack.c.bf16 %v10405_v28, %v10404_v30  ;;  %v15453_v30 = vld [vmem:[#allocation3 + $0x71] sm:$0xff]  ;;  %16753 = vst [vmem:[#allocation52_spill] sm:$0xff] %v15469_v18 }
 0x561   : > { %12035 = vmatmul.mubr.msk.f32.gmra.mrb[66].mxu0 %vm4835_vm6, %v15306_v55  ;;  %v15449_v28 = vld [vmem:[#allocation3 + $0x69] sm:$0xff]  ;;  %16749 = vst [vmem:[#allocation71_spill] sm:$0xff] %v15453_v30 }
 0x562   : > { %12037 = vmatprep.mubr.msk.f32.mxu0 %vm4835_vm6, %v15310_v60  ;;  %12602 = vmatpush3.bf16.msra.mxu0 %v12599_v46  ;;  %v15419_v46 = vld [vmem:[#allocation3 + $0x1ef] sm:$0xff]  ;;  %16748 = vst [vmem:[#allocation69_spill] sm:$0xff] %v15449_v28 }
 0x563   : > { %12604 = vmatprep.subr.bf16.mxu0 %v15304_v47  ;;  %v15465_v54 = vld [vmem:[#allocation3 + $0xa9] sm:$0xff] }
 0x564   : > { %16752 = vst [vmem:[#allocation51_spill] sm:$0xff] %v15465_v54 }
 0x565   : > { %12038 = vmatmul.mubr.msk.f32.gmra.mrb[68].mxu0 %vm4835_vm6, %v15315_v62 }
 0x566   : > { %12040 = vmatprep.mubr.msk.f32.mxu0 %vm4835_vm6, %v15319_v63 }
 0x569   : > { %12041 = vmatmul.mubr.msk.f32.gmra.mrb[70].mxu0 %vm4835_vm6, %v15323_v4 }
 0x56a   : > { %12043 = vmatprep.mubr.msk.f32.mxu0 %vm4835_vm6, %v15327_v11 }
 0x56d   : > { %12044 = vmatmul.mubr.msk.f32.gmra.mrb[72].mxu0 %vm4835_vm6, %v15331_v33 }
 0x56e   : > { %12046 = vmatprep.mubr.msk.f32.mxu0 %vm4835_vm6, %v15335_v37 }
 0x571   : > { %12047 = vmatmul.mubr.msk.f32.gmra.mrb[74].mxu0 %vm4835_vm6, %v15339_v21 }
 0x572   : > { %12049 = vmatprep.mubr.msk.f32.mxu0 %vm4835_vm6, %v15343_v25 }
 0x575   : > { %12050 = vmatmul.mubr.msk.f32.gmra.mrb[76].mxu0 %vm4835_vm6, %v15347_v35 }
 0x576   : > { %12052 = vmatprep.mubr.msk.f32.mxu0 %vm4835_vm6, %v15351_v41 }
 0x579   : > { %12053 = vmatmul.mubr.msk.f32.gmra.mrb[78].mxu0 %vm4835_vm6, %v15355_v51 }
 0x57a   : > { %12055 = vmatprep.mubr.msk.f32.mxu0 %vm4835_vm6, %v15359_v3 }
 0x57d   : > { %12056 = vmatmul.mubr.msk.f32.gmra.mrb[80].mxu0 %vm4835_vm6, %v15363_v42 }
 0x57e   : > { %12058 = vmatprep.mubr.msk.f32.mxu0 %vm4835_vm6, %v15367_v61 }
 0x581   : > { %12059 = vmatmul.mubr.msk.f32.gmra.mrb[82].mxu0 %vm4835_vm6, %v15371_v27 }
 0x582   : > { %12061 = vmatprep.mubr.msk.f32.mxu0 %vm4835_vm6, %v15375_v43 }
 0x585   : > { %12062 = vmatmul.mubr.msk.f32.gmra.mrb[84].mxu0 %vm4835_vm6, %v15379_v50 }
 0x586   : > { %12064 = vmatprep.mubr.msk.f32.mxu0 %vm4835_vm6, %v15383_v6 }
 0x589   : > { %12065 = vmatmul.mubr.msk.f32.gmra.mrb[86].mxu0 %vm4835_vm6, %v15387_v59 }
 0x58a   : > { %12067 = vmatprep.mubr.msk.f32.mxu0 %vm4835_vm6, %v15391_v24 }
 0x58d   : > { %12068 = vmatmul.mubr.msk.f32.gmra.mrb[88].mxu0 %vm4835_vm6, %v15395_v9 }
 0x58e   : > { %12070 = vmatprep.mubr.msk.f32.mxu0 %vm4835_vm6, %v15399_v22 }
 0x591   : > { %12071 = vmatmul.mubr.msk.f32.gmra.mrb[90].mxu0 %vm4835_vm6, %v15403_v0 }
 0x592   : > { %12073 = vmatprep.mubr.msk.f32.mxu0 %vm4835_vm6, %v15407_v40 }
 0x595   : > { %12074 = vmatmul.mubr.msk.f32.gmra.mrb[92].mxu0 %vm4835_vm6, %v15411_v56 }
 0x596   : > { %12076 = vmatprep.mubr.msk.f32.mxu0 %vm4835_vm6, %v15415_v8 }
 0x599   : > { %12077 = vmatmul.mubr.msk.f32.gmra.mrb[94].mxu0 %vm4835_vm6, %v15419_v46 }
 0x59a   : > { %12087 = vmatprep.mubr.msk.f32.mxu0 %vm4835_vm6, %v5976_v20  ;;  %v15440_v20 = vld [vmem:[#allocation3 + $0x49] sm:$0xff] }
 0x59b   : > { %16746 = vst [vmem:[#allocation66_spill] sm:$0xff] %v15440_v20 }
 0x59d   : > { %12088 = vmatmul.mubr.msk.f32.vlgmr.msra.gmra.mrb[64].mxu0 %vm4835_vm6, %v5977_v34  ;;  %v15445_v34 = vld [vmem:[#allocation3 + $0x51] sm:$0xff] }
 0x59e   : > { %12606 = vmatpush3.bf16.msra.mxu0 %v15304_v47  ;;  %12090 = vmatprep.mubr.msk.f32.mxu0 %vm4835_vm6, %v15429_v10  ;;  %16747 = vst [vmem:[#allocation67_spill] sm:$0xff] %v15445_v34  ;;  %v15457_v47 = vld [vmem:[#allocation3 + $0x89] sm:$0xff] }
 0x59f   : > { %12608 = vmatprep.subr.bf16.mxu0 %v12607_v32  ;;  %16750 = vst [vmem:[#allocation49_spill] sm:$0xff] %v15457_v47 }
 0x5a1   : > { %12091 = vmatmul.mubr.msk.f32.gmra.mrb[66].mxu0 %vm4835_vm6, %v15436_v15 }
 0x5a2   : > { %12093 = vmatprep.mubr.msk.f32.mxu0 %vm4835_vm6, %v15440_v20  ;;  %12610 = vmatpush3.bf16.msra.mxu0 %v12607_v32  ;;  %v15461_v32 = vld [vmem:[#allocation3 + $0x91] sm:$0xff]  ;;  %v10441_v20 = vld [vmem:[%s13559_s22 + $0xa8] sm:$0xff] }
 0x5a3   : > { %12612 = vmatprep.subr.bf16.mxu0 %v15434_v31  ;;  %16751 = vst [vmem:[#allocation50_spill] sm:$0xff] %v15461_v32 }
 0x5a5   : > { %12094 = vmatmul.mubr.msk.f32.gmra.mrb[68].mxu0 %vm4835_vm6, %v15445_v34  ;;  %v10407_v34 = vld [vmem:[%s13559_s22 + $0x98] sm:$0xff] }
 0x5a6   : > { %12096 = vmatprep.mubr.msk.f32.mxu0 %vm4835_vm6, %v15449_v28  ;;  %v10406_v28 = vld [vmem:[%s13559_s22 + $0x90] sm:$0xff] }
 0x5a9   : > { %12097 = vmatmul.mubr.msk.f32.gmra.mrb[70].mxu0 %vm4835_vm6, %v15453_v30  ;;  %v15473_v30 = vld [vmem:[#allocation3 + $0xc9] sm:$0xff] }
 0x5aa   : > { %12099 = vmatprep.mubr.msk.f32.mxu0 %vm4835_vm6, %v15457_v47  ;;  %16754 = vst [vmem:[#allocation53_spill] sm:$0xff] %v15473_v30  ;;  %v15477_v47 = vld [vmem:[#allocation3 + $0xd1] sm:$0xff] }
 0x5ab   : > { %16755 = vst [vmem:[#allocation54_spill] sm:$0xff] %v15477_v47 }
 0x5ad   : > { %12100 = vmatmul.mubr.msk.f32.gmra.mrb[72].mxu0 %vm4835_vm6, %v15461_v32  ;;  %v15481_v32 = vld [vmem:[#allocation3 + $0xe9] sm:$0xff] }
 0x5ae   : > { %12102 = vmatprep.mubr.msk.f32.mxu0 %vm4835_vm6, %v15465_v54  ;;  %16756 = vst [vmem:[#allocation55_spill] sm:$0xff] %v15481_v32  ;;  %v15485_v54 = vld [vmem:[#allocation3 + $0xf1] sm:$0xff] }
 0x5af   : > { %16757 = vst [vmem:[#allocation56_spill] sm:$0xff] %v15485_v54 }
 0x5b1   : > { %12103 = vmatmul.mubr.msk.f32.gmra.mrb[74].mxu0 %vm4835_vm6, %v15469_v18  ;;  %v15489_v18 = vld [vmem:[#allocation3 + $0x109] sm:$0xff] }
 0x5b2   : > { %12105 = vmatprep.mubr.msk.f32.mxu0 %vm4835_vm6, %v15473_v30  ;;  %16758 = vst [vmem:[#allocation57_spill] sm:$0xff] %v15489_v18  ;;  %v15493_v30 = vld [vmem:[#allocation3 + $0x111] sm:$0xff] }
 0x5b3   : > { %16759 = vst [vmem:[#allocation58_spill] sm:$0xff] %v15493_v30 }
 0x5b5   : > { %12106 = vmatmul.mubr.msk.f32.gmra.mrb[76].mxu0 %vm4835_vm6, %v15477_v47  ;;  %v15497_v47 = vld [vmem:[#allocation3 + $0x129] sm:$0xff] }
 0x5b6   : > { %12108 = vmatprep.mubr.msk.f32.mxu0 %vm4835_vm6, %v15481_v32  ;;  %16760 = vst [vmem:[#allocation60_spill] sm:$0xff] %v15497_v47  ;;  %v15501_v32 = vld [vmem:[#allocation3 + $0x131] sm:$0xff] }
 0x5b7   : > { %16761 = vst [vmem:[#allocation61_spill] sm:$0xff] %v15501_v32 }
 0x5b9   : > { %12109 = vmatmul.mubr.msk.f32.gmra.mrb[78].mxu0 %vm4835_vm6, %v15485_v54  ;;  %v15505_v54 = vld [vmem:[#allocation3 + $0x149] sm:$0xff] }
 0x5ba   : > { %12111 = vmatprep.mubr.msk.f32.mxu0 %vm4835_vm6, %v15489_v18  ;;  %16762 = vst [vmem:[#allocation62_spill] sm:$0xff] %v15505_v54  ;;  %v15509_v18 = vld [vmem:[#allocation3 + $0x151] sm:$0xff] }
 0x5bb   : > { %16763 = vst [vmem:[#allocation63_spill] sm:$0xff] %v15509_v18 }
 0x5bd   : > { %12112 = vmatmul.mubr.msk.f32.gmra.mrb[80].mxu0 %vm4835_vm6, %v15493_v30  ;;  %v15513_v30 = vld [vmem:[#allocation3 + $0x169] sm:$0xff] }
 0x5be   : > { %12114 = vmatprep.mubr.msk.f32.mxu0 %vm4835_vm6, %v15497_v47  ;;  %16764 = vst [vmem:[#allocation64_spill] sm:$0xff] %v15513_v30  ;;  %v15517_v47 = vld [vmem:[#allocation3 + $0x171] sm:$0xff] }
 0x5bf   : > { %16765 = vst [vmem:[#allocation68_spill] sm:$0xff] %v15517_v47 }
 0x5c1   : > { %12115 = vmatmul.mubr.msk.f32.gmra.mrb[82].mxu0 %vm4835_vm6, %v15501_v32  ;;  %v15521_v32 = vld [vmem:[#allocation3 + $0x189] sm:$0xff] }
 0x5c2   : > { %12117 = vmatprep.mubr.msk.f32.mxu0 %vm4835_vm6, %v15505_v54  ;;  %16766 = vst [vmem:[#allocation70_spill] sm:$0xff] %v15521_v32  ;;  %v15525_v54 = vld [vmem:[#allocation3 + $0x191] sm:$0xff] }
 0x5c3   : > { %16767 = vst [vmem:[#allocation72_spill] sm:$0xff] %v15525_v54 }
 0x5c5   : > { %12118 = vmatmul.mubr.msk.f32.gmra.mrb[84].mxu0 %vm4835_vm6, %v15509_v18  ;;  %v15529_v18 = vld [vmem:[#allocation3 + $0x1a9] sm:$0xff] }
 0x5c6   : > { %12120 = vmatprep.mubr.msk.f32.mxu0 %vm4835_vm6, %v15513_v30  ;;  %16768 = vst [vmem:[#allocation73_spill] sm:$0xff] %v15529_v18  ;;  %v15537_v30 = vld [vmem:[#allocation3 + $0x1c9] sm:$0xff] }
 0x5c7   : > { %16770 = vst [vmem:[#allocation75_spill] sm:$0xff] %v15537_v30 }
 0x5c9   : > { %12121 = vmatmul.mubr.msk.f32.gmra.mrb[86].mxu0 %vm4835_vm6, %v15517_v47  ;;  %v15533_v47 = vld [vmem:[#allocation3 + $0x1b1] sm:$0xff] }
 0x5ca   : > { %12123 = vmatprep.mubr.msk.f32.mxu0 %vm4835_vm6, %v15521_v32  ;;  %16769 = vst [vmem:[#allocation74_spill] sm:$0xff] %v15533_v47  ;;  %v15541_v32 = vld [vmem:[#allocation3 + $0x1d1] sm:$0xff] }
 0x5cb   : > { %16771 = vst [vmem:[#allocation76_spill] sm:$0xff] %v15541_v32 }
 0x5cd   : > { %12124 = vmatmul.mubr.msk.f32.gmra.mrb[88].mxu0 %vm4835_vm6, %v15525_v54  ;;  %v15545_v54 = vld [vmem:[#allocation3 + $0x1e9] sm:$0xff] }
 0x5ce   : > { %12126 = vmatprep.mubr.msk.f32.mxu0 %vm4835_vm6, %v15529_v18  ;;  %16772 = vst [vmem:[#allocation77_spill] sm:$0xff] %v15545_v54  ;;  %v15549_v18 = vld [vmem:[#allocation3 + $0x1f1] sm:$0xff] }
 0x5d1   : > { %12127 = vmatmul.mubr.msk.f32.gmra.mrb[90].mxu0 %vm4835_vm6, %v15533_v47  ;;  %v10440_v47 = vld [vmem:[%s13559_s22 + $0xa0] sm:$0xff] }
 0x5d2   : > { %12129 = vmatprep.mubr.msk.f32.mxu0 %vm4835_vm6, %v15537_v30  ;;  %v12615_v30 = vpack.c.bf16 %v10407_v34, %v10406_v28  ;;  %v10476_v28 = vld [vmem:[%s13559_s22 + $0xc0] sm:$0xff] }
 0x5d5   : > { %12130 = vmatmul.mubr.msk.f32.gmra.mrb[92].mxu0 %vm4835_vm6, %v15541_v32 }
 0x5d6   : > { %12132 = vmatprep.mubr.msk.f32.mxu0 %vm4835_vm6, %v15545_v54  ;;  %v12619_v54 = vpack.c.bf16 %v10441_v20, %v10440_v47  ;;  %v10443_v20 = vld [vmem:[%s13559_s22 + $0xb8] sm:$0xff] }
 0x5d9   : > { %12133 = vmatmul.mubr.msk.f32.gmra.mrb[94].mxu0 %vm4835_vm6, %v15549_v18 }
 0x5da   : > { %12143 = vmatprep.mubr.msk.f32.mxu0 %vm4835_vm6, %v15299_v36  ;;  %v15622_v36 = vld [vmem:[#allocation3 + $0x20f] sm:$0xff] }
 0x5dd   : > { %12144 = vmatmul.mubr.msk.f32.vlgmr.msra.gmra.mrb[64].mxu0 %vm4835_vm6, %v15306_v55  ;;  %v10442_v55 = vld [vmem:[%s13559_s22 + $0xb0] sm:$0xff] }
 0x5de   : > { %12614 = vmatpush3.bf16.msra.mxu0 %v15434_v31  ;;  %12146 = vmatprep.mubr.msk.f32.mxu0 %vm4835_vm6, %v15310_v60  ;;  %v15618_v31 = vld [vmem:[#allocation3 + $0x207] sm:$0xff]  ;;  %v12623_v34 = vpack.c.bf16 %v10443_v20, %v10442_v55 }
 0x5df   : > { %12616 = vmatprep.subr.bf16.mxu0 %v12615_v30  ;;  %v16791_v55 = vld [vmem:[#allocation56_spill] sm:$0xff]  ;;  %v16792_v20 = vld [vmem:[#allocation57_spill] sm:$0xff] }
 0x5e1   : > { %12147 = vmatmul.mubr.msk.f32.gmra.mrb[66].mxu0 %vm4835_vm6, %v15315_v62 }
 0x5e2   : > { %12149 = vmatprep.mubr.msk.f32.mxu0 %vm4835_vm6, %v15319_v63  ;;  %12618 = vmatpush3.bf16.msra.mxu0 %v12615_v30  ;;  %v10477_v30 = vld [vmem:[%s13559_s22 + $0xc8] sm:$0xff] }
 0x5e3   : > { %12620 = vmatprep.subr.bf16.mxu0 %v12619_v54  ;;  %v12627_v47 = vpack.c.bf16 %v10477_v30, %v10476_v28  ;;  %v16794_v28 = vld [vmem:[#allocation60_spill] sm:$0xff]  ;;  %v16795_v30 = vld [vmem:[#allocation61_spill] sm:$0xff] }
 0x5e5   : > { %12150 = vmatmul.mubr.msk.f32.gmra.mrb[68].mxu0 %vm4835_vm6, %v15323_v4 }
 0x5e6   : > { %12152 = vmatprep.mubr.msk.f32.mxu0 %vm4835_vm6, %v15327_v11 }
 0x5e9   : > { %12153 = vmatmul.mubr.msk.f32.gmra.mrb[70].mxu0 %vm4835_vm6, %v15331_v33 }
 0x5ea   : > { %12155 = vmatprep.mubr.msk.f32.mxu0 %vm4835_vm6, %v15335_v37 }
 0x5ed   : > { %12156 = vmatmul.mubr.msk.f32.gmra.mrb[72].mxu0 %vm4835_vm6, %v15339_v21 }
 0x5ee   : > { %12158 = vmatprep.mubr.msk.f32.mxu0 %vm4835_vm6, %v15343_v25 }
 0x5f1   : > { %12159 = vmatmul.mubr.msk.f32.gmra.mrb[74].mxu0 %vm4835_vm6, %v15347_v35 }
 0x5f2   : > { %12161 = vmatprep.mubr.msk.f32.mxu0 %vm4835_vm6, %v15351_v41 }
 0x5f5   : > { %12162 = vmatmul.mubr.msk.f32.gmra.mrb[76].mxu0 %vm4835_vm6, %v15355_v51 }
 0x5f6   : > { %12164 = vmatprep.mubr.msk.f32.mxu0 %vm4835_vm6, %v15359_v3 }
 0x5f9   : > { %12165 = vmatmul.mubr.msk.f32.gmra.mrb[78].mxu0 %vm4835_vm6, %v15363_v42 }
 0x5fa   : > { %12167 = vmatprep.mubr.msk.f32.mxu0 %vm4835_vm6, %v15367_v61 }
 0x5fd   : > { %12168 = vmatmul.mubr.msk.f32.gmra.mrb[80].mxu0 %vm4835_vm6, %v15371_v27 }
 0x5fe   : > { %12170 = vmatprep.mubr.msk.f32.mxu0 %vm4835_vm6, %v15375_v43 }
 0x601   : > { %12171 = vmatmul.mubr.msk.f32.gmra.mrb[82].mxu0 %vm4835_vm6, %v15379_v50 }
 0x602   : > { %12173 = vmatprep.mubr.msk.f32.mxu0 %vm4835_vm6, %v15383_v6 }
 0x605   : > { %12174 = vmatmul.mubr.msk.f32.gmra.mrb[84].mxu0 %vm4835_vm6, %v15387_v59 }
 0x606   : > { %12176 = vmatprep.mubr.msk.f32.mxu0 %vm4835_vm6, %v15391_v24 }
 0x609   : > { %12177 = vmatmul.mubr.msk.f32.gmra.mrb[86].mxu0 %vm4835_vm6, %v15395_v9 }
 0x60a   : > { %12179 = vmatprep.mubr.msk.f32.mxu0 %vm4835_vm6, %v15399_v22 }
 0x60d   : > { %12180 = vmatmul.mubr.msk.f32.gmra.mrb[88].mxu0 %vm4835_vm6, %v15403_v0 }
 0x60e   : > { %12182 = vmatprep.mubr.msk.f32.mxu0 %vm4835_vm6, %v15407_v40 }
 0x611   : > { %12183 = vmatmul.mubr.msk.f32.gmra.mrb[90].mxu0 %vm4835_vm6, %v15411_v56 }
 0x612   : > { %12185 = vmatprep.mubr.msk.f32.mxu0 %vm4835_vm6, %v15415_v8 }
 0x615   : > { %12186 = vmatmul.mubr.msk.f32.gmra.mrb[92].mxu0 %vm4835_vm6, %v15419_v46 }
 0x616   : > { %12188 = vmatprep.mubr.msk.f32.mxu0 %vm4835_vm6, %v15618_v31 }
 0x619   : > { %12189 = vmatmul.mubr.msk.f32.gmra.mrb[94].mxu0 %vm4835_vm6, %v15622_v36 }
 0x61a   : > { %12199 = vmatprep.mubr.msk.f32.mxu0 %vm4835_vm6, %v15096_v1  ;;  %v16773_v1 = vld [vmem:[#allocation42_spill] sm:$0xff] }
 0x61d   : > { %12200 = vmatmul.mubr.msk.f32.vlgmr.msra.gmra.mrb[64].mxu0 %vm4835_vm6, %v15101_v14  ;;  %v16774_v14 = vld [vmem:[#allocation43_spill] sm:$0xff] }
 0x61e   : > { %12622 = vmatpush3.bf16.msra.mxu0 %v12619_v54  ;;  %12202 = vmatprep.mubr.msk.f32.mxu0 %vm4835_vm6, %v15110_v45  ;;  %v16775_v45 = vld [vmem:[#allocation46_spill] sm:$0xff]  ;;  %v16790_v54 = vld [vmem:[#allocation55_spill] sm:$0xff] }
 0x61f   : > { %12624 = vmatprep.subr.bf16.mxu0 %v12623_v34 }
 0x621   : > { %12203 = vmatmul.mubr.msk.f32.gmra.mrb[66].mxu0 %vm4835_vm6, %v15115_v2  ;;  %v16776_v2 = vld [vmem:[#allocation47_spill] sm:$0xff] }
 0x622   : > { %12205 = vmatprep.mubr.msk.f32.mxu0 %vm4835_vm6, %v15124_v16  ;;  %12626 = vmatpush3.bf16.msra.mxu0 %v12623_v34  ;;  %v16777_v16 = vld [vmem:[#allocation48_spill] sm:$0xff]  ;;  %v16793_v34 = vld [vmem:[#allocation58_spill] sm:$0xff] }
 0x623   : > { %12628 = vmatprep.subr.bf16.mxu0 %v12627_v47 }
 0x625   : > { %12206 = vmatmul.mubr.msk.f32.gmra.mrb[68].mxu0 %vm4835_vm6, %v15129_v58  ;;  %v16778_v58 = vld [vmem:[#allocation59_spill] sm:$0xff] }
 0x626   : > { %12208 = vmatprep.mubr.msk.f32.mxu0 %vm4835_vm6, %v15138_v48  ;;  %v16779_v48 = vld [vmem:[#allocation65_spill] sm:$0xff] }
 0x629   : > { %12209 = vmatmul.mubr.msk.f32.gmra.mrb[70].mxu0 %vm4835_vm6, %v15143_v13  ;;  %v15690_v13 = vld [vmem:[#allocation3 + $0x208] sm:$0xff] }
 0x62a   : > { %12211 = vmatprep.mubr.msk.f32.mxu0 %vm4835_vm6, %v15152_v39  ;;  %v15694_v39 = vld [vmem:[#allocation3 + $0x210] sm:$0xff] }
 0x62d   : > { %12212 = vmatmul.mubr.msk.f32.gmra.mrb[72].mxu0 %vm4835_vm6, %v15157_v52  ;;  %v10478_v52 = vld [vmem:[%s13559_s22 + $0xd0] sm:$0xff] }
 0x62e   : > { %12214 = vmatprep.mubr.msk.f32.mxu0 %vm4835_vm6, %v15166_v23  ;;  %v10479_v23 = vld [vmem:[%s13559_s22 + $0xd8] sm:$0xff] }
 0x631   : > { %12215 = vmatmul.mubr.msk.f32.gmra.mrb[74].mxu0 %vm4835_vm6, %v15171_v49  ;;  %v12631_v49 = vpack.c.bf16 %v10479_v23, %v10478_v52  ;;  %v16797_v52 = vld [vmem:[#allocation63_spill] sm:$0xff]  ;;  %v16798_v23 = vld [vmem:[#allocation64_spill] sm:$0xff] }
 0x632   : > { %12217 = vmatprep.mubr.msk.f32.mxu0 %vm4835_vm6, %v15180_v57  ;;  %v10512_v57 = vld [vmem:[%s13559_s22 + $0xe0] sm:$0xff] }
 0x635   : > { %12218 = vmatmul.mubr.msk.f32.gmra.mrb[76].mxu0 %vm4835_vm6, %v15185_v29  ;;  %v10513_v29 = vld [vmem:[%s13559_s22 + $0xe8] sm:$0xff] }
 0x636   : > { %12220 = vmatprep.mubr.msk.f32.mxu0 %vm4835_vm6, %v15194_v17  ;;  %v16780_v17 = vld [vmem:[#allocation66_spill] sm:$0xff] }
 0x639   : > { %12221 = vmatmul.mubr.msk.f32.gmra.mrb[78].mxu0 %vm4835_vm6, %v15199_v7  ;;  %v12635_v7 = vpack.c.bf16 %v10513_v29, %v10512_v57  ;;  %v16800_v57 = vld [vmem:[#allocation70_spill] sm:$0xff]  ;;  %v16801_v29 = vld [vmem:[#allocation72_spill] sm:$0xff] }
 0x63a   : > { %12223 = vmatprep.mubr.msk.f32.mxu0 %vm4835_vm6, %v15208_v26  ;;  %v16781_v26 = vld [vmem:[#allocation67_spill] sm:$0xff] }
 0x63d   : > { %12224 = vmatmul.mubr.msk.f32.gmra.mrb[80].mxu0 %vm4835_vm6, %v15213_v38  ;;  %v16782_v38 = vld [vmem:[#allocation69_spill] sm:$0xff] }
 0x63e   : > { %12226 = vmatprep.mubr.msk.f32.mxu0 %vm4835_vm6, %v15222_v12  ;;  %v16783_v12 = vld [vmem:[#allocation71_spill] sm:$0xff] }
 0x641   : > { %12227 = vmatmul.mubr.msk.f32.gmra.mrb[82].mxu0 %vm4835_vm6, %v15227_v44  ;;  %v16784_v44 = vld [vmem:[#allocation49_spill] sm:$0xff] }
 0x642   : > { %12229 = vmatprep.mubr.msk.f32.mxu0 %vm4835_vm6, %v15236_v19  ;;  %v16785_v19 = vld [vmem:[#allocation50_spill] sm:$0xff] }
 0x645   : > { %12230 = vmatmul.mubr.msk.f32.gmra.mrb[84].mxu0 %vm4835_vm6, %v15241_v53  ;;  %v16786_v53 = vld [vmem:[#allocation51_spill] sm:$0xff] }
 0x646   : > { %12232 = vmatprep.mubr.msk.f32.mxu0 %vm4835_vm6, %v15250_v5  ;;  %v16787_v5 = vld [vmem:[#allocation52_spill] sm:$0xff] }
 0x649   : > { %12233 = vmatmul.mubr.msk.f32.gmra.mrb[86].mxu0 %vm4835_vm6, %v16773_v1 }
 0x64a   : > { %12235 = vmatprep.mubr.msk.f32.mxu0 %vm4835_vm6, %v16774_v14 }
 0x64d   : > { %12236 = vmatmul.mubr.msk.f32.gmra.mrb[88].mxu0 %vm4835_vm6, %v16775_v45 }
 0x64e   : > { %12238 = vmatprep.mubr.msk.f32.mxu0 %vm4835_vm6, %v16776_v2 }
 0x651   : > { %12239 = vmatmul.mubr.msk.f32.gmra.mrb[90].mxu0 %vm4835_vm6, %v16777_v16 }
 0x652   : > { %12241 = vmatprep.mubr.msk.f32.mxu0 %vm4835_vm6, %v16778_v58 }
 0x655   : > { %12242 = vmatmul.mubr.msk.f32.gmra.mrb[92].mxu0 %vm4835_vm6, %v16779_v48 }
 0x656   : > { %12244 = vmatprep.mubr.msk.f32.mxu0 %vm4835_vm6, %v15690_v13 }
 0x659   : > { %12245 = vmatmul.mubr.msk.f32.gmra.mrb[94].mxu0 %vm4835_vm6, %v15694_v39 }
 0x65a   : > { %12255 = vmatprep.mubr.msk.f32.mxu0 %vm4835_vm6, %v15429_v10  ;;  %v16789_v10 = vld [vmem:[#allocation54_spill] sm:$0xff] }
 0x65d   : > { %12256 = vmatmul.mubr.msk.f32.vlgmr.msra.gmra.mrb[64].mxu0 %vm4835_vm6, %v15436_v15  ;;  %v16788_v15 = vld [vmem:[#allocation53_spill] sm:$0xff] }
 0x65e   : > { %12630 = vmatpush3.bf16.msra.mxu0 %v12627_v47  ;;  %12258 = vmatprep.mubr.msk.f32.mxu0 %vm4835_vm6, %v16780_v17  ;;  %v16796_v47 = vld [vmem:[#allocation62_spill] sm:$0xff] }
 0x65f   : > { %12632 = vmatprep.subr.bf16.mxu0 %v12631_v49 }
 0x661   : > { %12259 = vmatmul.mubr.msk.f32.gmra.mrb[66].mxu0 %vm4835_vm6, %v16781_v26 }
 0x662   : > { %12261 = vmatprep.mubr.msk.f32.mxu0 %vm4835_vm6, %v16782_v38  ;;  %12634 = vmatpush3.bf16.msra.mxu0 %v12631_v49  ;;  %v16799_v49 = vld [vmem:[#allocation68_spill] sm:$0xff] }
 0x663   : > { %12636 = vmatprep.subr.bf16.mxu0 %v12635_v7 }
 0x665   : > { %12262 = vmatmul.mubr.msk.f32.gmra.mrb[68].mxu0 %vm4835_vm6, %v16783_v12 }
 0x666   : > { %12264 = vmatprep.mubr.msk.f32.mxu0 %vm4835_vm6, %v16784_v44 }
 0x669   : > { %12265 = vmatmul.mubr.msk.f32.gmra.mrb[70].mxu0 %vm4835_vm6, %v16785_v19 }
 0x66a   : > { %12267 = vmatprep.mubr.msk.f32.mxu0 %vm4835_vm6, %v16786_v53 }
 0x66d   : > { %12268 = vmatmul.mubr.msk.f32.gmra.mrb[72].mxu0 %vm4835_vm6, %v16787_v5 }
 0x66e   : > { %12270 = vmatprep.mubr.msk.f32.mxu0 %vm4835_vm6, %v16788_v15 }
 0x671   : > { %12271 = vmatmul.mubr.msk.f32.gmra.mrb[74].mxu0 %vm4835_vm6, %v16789_v10 }
 0x672   : > { %12273 = vmatprep.mubr.msk.f32.mxu0 %vm4835_vm6, %v16790_v54 }
 0x675   : > { %12274 = vmatmul.mubr.msk.f32.gmra.mrb[76].mxu0 %vm4835_vm6, %v16791_v55 }
 0x676   : > { %12276 = vmatprep.mubr.msk.f32.mxu0 %vm4835_vm6, %v16792_v20 }
 0x679   : > { %12277 = vmatmul.mubr.msk.f32.gmra.mrb[78].mxu0 %vm4835_vm6, %v16793_v34 }
 0x67a   : > { %12279 = vmatprep.mubr.msk.f32.mxu0 %vm4835_vm6, %v16794_v28 }
 0x67d   : > { %12280 = vmatmul.mubr.msk.f32.gmra.mrb[80].mxu0 %vm4835_vm6, %v16795_v30  ;;  %v16802_v30 = vld [vmem:[#allocation73_spill] sm:$0xff] }
 0x67e   : > { %12282 = vmatprep.mubr.msk.f32.mxu0 %vm4835_vm6, %v16796_v47  ;;  %v16803_v47 = vld [vmem:[#allocation74_spill] sm:$0xff] }
 0x681   : > { %12283 = vmatmul.mubr.msk.f32.gmra.mrb[82].mxu0 %vm4835_vm6, %v16797_v52  ;;  %v16804_v52 = vld [vmem:[#allocation75_spill] sm:$0xff] }
 0x682   : > { %12285 = vmatprep.mubr.msk.f32.mxu0 %vm4835_vm6, %v16798_v23 }
 0x685   : > { %12286 = vmatmul.mubr.msk.f32.gmra.mrb[84].mxu0 %vm4835_vm6, %v16799_v49  ;;  %v16805_v49 = vld [vmem:[#allocation77_spill] sm:$0xff] }
 0x686   : > { %12288 = vmatprep.mubr.msk.f32.mxu0 %vm4835_vm6, %v16800_v57  ;;  %v10515_v57 = vld [vmem:[%s13559_s22 + $0xf8] sm:$0xff] }
 0x689   : > { %12289 = vmatmul.mubr.msk.f32.gmra.mrb[86].mxu0 %vm4835_vm6, %v16801_v29  ;;  %v15762_v29 = vld [vmem:[#allocation3 + $0x209] sm:$0xff] }
 0x68a   : > { %12291 = vmatprep.mubr.msk.f32.mxu0 %vm4835_vm6, %v16802_v30  ;;  %16806 = vst [vmem:[#allocation42_spill] sm:$0xff] %v15762_v29  ;;  %v15766_v30 = vld [vmem:[#allocation3 + $0x211] sm:$0xff] }
 0x68d   : > { %12292 = vmatmul.mubr.msk.f32.gmra.mrb[88].mxu0 %vm4835_vm6, %v16803_v47  ;;  %v10514_v47 = vld [vmem:[%s13559_s22 + $0xf0] sm:$0xff] }
 0x68e   : > { %12294 = vmatprep.mubr.msk.f32.mxu0 %vm4835_vm6, %v16804_v52  ;;  %v10549_v52 = vld [vmem:[%s13559_s22 + $0x108] sm:$0xff] }
 0x691   : > { %12295 = vmatmul.mubr.msk.f32.gmra.mrb[90].mxu0 %vm4835_vm6, %v15541_v32  ;;  %v12639_v32 = vpack.c.bf16 %v10515_v57, %v10514_v47 }
 0x692   : > { %12297 = vmatprep.mubr.msk.f32.mxu0 %vm4835_vm6, %v16805_v49  ;;  %v10548_v49 = vld [vmem:[%s13559_s22 + $0x100] sm:$0xff] }
 0x695   : > { %12298 = vmatmul.mubr.msk.f32.gmra.mrb[92].mxu0 %vm4835_vm6, %v15549_v18 }
 0x696   : > { %12300 = vmatprep.mubr.msk.f32.mxu0 %vm4835_vm6, %v15762_v29  ;;  %v12643_v29 = vpack.c.bf16 %v10549_v52, %v10548_v49 }
 0x699   : > { %12301 = vmatmul.mubr.msk.f32.gmra.mrb[94].mxu0 %vm4835_vm6, %v15766_v30 }
 0x69a   : > { %12311 = vmatprep.mubr.msk.f32.mxu0 %vm4835_vm6, %v15310_v60  ;;  %v7567_v60 = vld [vmem:[#allocation3 + $0x227] sm:$0xff] }
 0x69d   : > { %12312 = vmatmul.mubr.msk.f32.vlgmr.msra.gmra.mrb[64].mxu0 %vm4835_vm6, %v15315_v62  ;;  %v7568_v62 = vld [vmem:[#allocation3 + $0x22f] sm:$0xff] }
 0x69e   : > { %12638 = vmatpush3.bf16.msra.mxu0 %v12635_v7  ;;  %12314 = vmatprep.mubr.msk.f32.mxu0 %vm4835_vm6, %v15319_v63  ;;  %v10550_v63 = vld [vmem:[%s13559_s22 + $0x110] sm:$0xff] }
 0x69f   : > { %12640 = vmatprep.subr.bf16.mxu0 %v12639_v32  ;;  %v8347_v7 = vld [vmem:[#allocation3 + $0x229] sm:$0xff] }
 0x6a1   : > { %12315 = vmatmul.mubr.msk.f32.gmra.mrb[66].mxu0 %vm4835_vm6, %v15323_v4  ;;  %v10551_v4 = vld [vmem:[%s13559_s22 + $0x118] sm:$0xff] }
 0x6a2   : > { %12317 = vmatprep.mubr.msk.f32.mxu0 %vm4835_vm6, %v15327_v11  ;;  %12642 = vmatpush3.bf16.msra.mxu0 %v12639_v32  ;;  %v7927_v11 = vld [vmem:[#allocation3 + $0x48] sm:$0xff]  ;;  %v7958_v32 = vld [vmem:[#allocation3 + $0x230] sm:$0xff] }
 0x6a3   : > { %12644 = vmatprep.subr.bf16.mxu0 %v12643_v29 }
 0x6a5   : > { %12318 = vmatmul.mubr.msk.f32.gmra.mrb[68].mxu0 %vm4835_vm6, %v15331_v33  ;;  %v8746_v33 = vld [vmem:[%s16807_s19] sm:$0xff] }
 0x6a6   : > { %12320 = vmatprep.mubr.msk.f32.mxu0 %vm4835_vm6, %v15335_v37  ;;  %12471 = vmatprep.subr.mxu1 %v8746_v33  ;;  %v12647_v37 = vpack.c.bf16 %v10551_v4, %v10550_v63 }
 0x6a7   : > { %12472 = vmatpush3.msra.mxu1 %v8746_v33 }
 0x6a9   : > { %12321 = vmatmul.mubr.msk.f32.gmra.mrb[70].mxu0 %vm4835_vm6, %v15339_v21  ;;  %v7928_v21 = vld [vmem:[#allocation3 + $0x50] sm:$0xff] }
 0x6aa   : > { %12323 = vmatprep.mubr.msk.f32.mxu0 %vm4835_vm6, %v15343_v25  ;;  %v7929_v25 = vld [vmem:[#allocation3 + $0x68] sm:$0xff] }
 0x6ad   : > { %12324 = vmatmul.mubr.msk.f32.gmra.mrb[72].mxu0 %vm4835_vm6, %v15347_v35  ;;  %v7930_v35 = vld [vmem:[#allocation3 + $0x70] sm:$0xff] }
 0x6ae   : > { %12326 = vmatprep.mubr.msk.f32.mxu0 %vm4835_vm6, %v15351_v41  ;;  %v7931_v41 = vld [vmem:[#allocation3 + $0x88] sm:$0xff] }
 0x6b1   : > { %12327 = vmatmul.mubr.msk.f32.gmra.mrb[74].mxu0 %vm4835_vm6, %v15355_v51  ;;  %v7932_v51 = vld [vmem:[#allocation3 + $0x90] sm:$0xff] }
 0x6b2   : > { %12329 = vmatprep.mubr.msk.f32.mxu0 %vm4835_vm6, %v15359_v3  ;;  %v7933_v3 = vld [vmem:[#allocation3 + $0xa8] sm:$0xff] }
 0x6b5   : > { %12330 = vmatmul.mubr.msk.f32.gmra.mrb[76].mxu0 %vm4835_vm6, %v15363_v42  ;;  %v7934_v42 = vld [vmem:[#allocation3 + $0xb0] sm:$0xff] }
 0x6b6   : > { %12332 = vmatprep.mubr.msk.f32.mxu0 %vm4835_vm6, %v15367_v61  ;;  %v7935_v61 = vld [vmem:[#allocation3 + $0xc8] sm:$0xff] }
 0x6b9   : > { %12333 = vmatmul.mubr.msk.f32.gmra.mrb[78].mxu0 %vm4835_vm6, %v15371_v27  ;;  %v7936_v27 = vld [vmem:[#allocation3 + $0xd0] sm:$0xff] }
 0x6ba   : > { %12335 = vmatprep.mubr.msk.f32.mxu0 %vm4835_vm6, %v15375_v43  ;;  %v7937_v43 = vld [vmem:[#allocation3 + $0xe8] sm:$0xff] }
 0x6bd   : > { %12336 = vmatmul.mubr.msk.f32.gmra.mrb[80].mxu0 %vm4835_vm6, %v15379_v50  ;;  %v7938_v50 = vld [vmem:[#allocation3 + $0xf0] sm:$0xff] }
 0x6be   : > { %12338 = vmatprep.mubr.msk.f32.mxu0 %vm4835_vm6, %v15383_v6  ;;  %v7939_v6 = vld [vmem:[#allocation3 + $0x108] sm:$0xff] }
 0x6c1   : > { %12339 = vmatmul.mubr.msk.f32.gmra.mrb[82].mxu0 %vm4835_vm6, %v15387_v59  ;;  %v7940_v59 = vld [vmem:[#allocation3 + $0x110] sm:$0xff] }
 0x6c2   : > { %12341 = vmatprep.mubr.msk.f32.mxu0 %vm4835_vm6, %v15391_v24  ;;  %v7941_v24 = vld [vmem:[#allocation3 + $0x128] sm:$0xff] }
 0x6c5   : > { %12342 = vmatmul.mubr.msk.f32.gmra.mrb[84].mxu0 %vm4835_vm6, %v15395_v9  ;;  %v7942_v9 = vld [vmem:[#allocation3 + $0x130] sm:$0xff] }
 0x6c6   : > { %12344 = vmatprep.mubr.msk.f32.mxu0 %vm4835_vm6, %v15399_v22  ;;  %v7943_v22 = vld [vmem:[#allocation3 + $0x148] sm:$0xff] }
 0x6c9   : > { %12345 = vmatmul.mubr.msk.f32.gmra.mrb[86].mxu0 %vm4835_vm6, %v15403_v0  ;;  %v7944_v0 = vld [vmem:[#allocation3 + $0x150] sm:$0xff] }
 0x6ca   : > { %12347 = vmatprep.mubr.msk.f32.mxu0 %vm4835_vm6, %v15407_v40  ;;  %v7945_v40 = vld [vmem:[#allocation3 + $0x168] sm:$0xff] }
 0x6cd   : > { %12348 = vmatmul.mubr.msk.f32.gmra.mrb[88].mxu0 %vm4835_vm6, %v15411_v56  ;;  %v7946_v56 = vld [vmem:[#allocation3 + $0x170] sm:$0xff] }
 0x6ce   : > { %12350 = vmatprep.mubr.msk.f32.mxu0 %vm4835_vm6, %v15415_v8  ;;  %v7947_v8 = vld [vmem:[#allocation3 + $0x188] sm:$0xff] }
 0x6d1   : > { %12351 = vmatmul.mubr.msk.f32.gmra.mrb[90].mxu0 %vm4835_vm6, %v15419_v46  ;;  %v7957_v46 = vld [vmem:[#allocation3 + $0x228] sm:$0xff] }
 0x6d2   : > { %12353 = vmatprep.mubr.msk.f32.mxu0 %vm4835_vm6, %v15618_v31  ;;  %v16808_v31 = vld [vmem:[#allocation61_spill] sm:$0xff] }
 0x6d5   : > { %12354 = vmatmul.mubr.msk.f32.gmra.mrb[92].mxu0 %vm4835_vm6, %v15622_v36  ;;  %v16809_v36 = vld [vmem:[#allocation62_spill] sm:$0xff] }
 0x6d6   : > { %12356 = vmatprep.mubr.msk.f32.mxu0 %vm4835_vm6, %v7567_v60 }
 0x6d9   : > { %12357 = vmatmul.mubr.msk.f32.gmra.mrb[94].mxu0 %vm4835_vm6, %v7568_v62 }
 0x6da   : > { %12367 = vmatprep.mubr.msk.f32.mxu0 %vm4835_vm6, %v7927_v11 }
 0x6dd   : > { %12368 = vmatmul.mubr.msk.f32.vlgmr.msra.gmra.mrb[64].mxu0 %vm4835_vm6, %v7928_v21 }
 0x6de   : > { %12646 = vmatpush3.bf16.msra.mxu0 %v12643_v29  ;;  %12370 = vmatprep.mubr.msk.f32.mxu0 %vm4835_vm6, %v7929_v25 }
 0x6df   : > { %12648 = vmatprep.subr.bf16.mxu0 %v12647_v37 }
 0x6e1   : > { %12371 = vmatmul.mubr.msk.f32.gmra.mrb[66].mxu0 %vm4835_vm6, %v7930_v35 }
 0x6e2   : > { %12373 = vmatprep.mubr.msk.f32.mxu0 %vm4835_vm6, %v7931_v41  ;;  %12650 = vmatpush3.bf16.msra.mxu0 %v12647_v37 }
 0x6e5   : > { %12374 = vmatmul.mubr.msk.f32.gmra.mrb[68].mxu0 %vm4835_vm6, %v7932_v51 }
 0x6e6   : > { %12376 = vmatprep.mubr.msk.f32.mxu0 %vm4835_vm6, %v7933_v3 }
 0x6e9   : > { %12377 = vmatmul.mubr.msk.f32.gmra.mrb[70].mxu0 %vm4835_vm6, %v7934_v42 }
 0x6ea   : > { %12379 = vmatprep.mubr.msk.f32.mxu0 %vm4835_vm6, %v7935_v61 }
 0x6ed   : > { %12380 = vmatmul.mubr.msk.f32.gmra.mrb[72].mxu0 %vm4835_vm6, %v7936_v27 }
 0x6ee   : > { %12382 = vmatprep.mubr.msk.f32.mxu0 %vm4835_vm6, %v7937_v43 }
 0x6f1   : > { %12383 = vmatmul.mubr.msk.f32.gmra.mrb[74].mxu0 %vm4835_vm6, %v7938_v50 }
 0x6f2   : > { %12385 = vmatprep.mubr.msk.f32.mxu0 %vm4835_vm6, %v7939_v6 }
 0x6f5   : > { %12386 = vmatmul.mubr.msk.f32.gmra.mrb[76].mxu0 %vm4835_vm6, %v7940_v59 }
 0x6f6   : > { %12388 = vmatprep.mubr.msk.f32.mxu0 %vm4835_vm6, %v7941_v24 }
 0x6f9   : > { %12389 = vmatmul.mubr.msk.f32.gmra.mrb[78].mxu0 %vm4835_vm6, %v7942_v9 }
 0x6fa   : > { %12391 = vmatprep.mubr.msk.f32.mxu0 %vm4835_vm6, %v7943_v22 }
 0x6fd   : > { %12392 = vmatmul.mubr.msk.f32.gmra.mrb[80].mxu0 %vm4835_vm6, %v7944_v0 }
 0x6fe   : > { %12394 = vmatprep.mubr.msk.f32.mxu0 %vm4835_vm6, %v7945_v40 }
 0x701   : > { %12395 = vmatmul.mubr.msk.f32.gmra.mrb[82].mxu0 %vm4835_vm6, %v7946_v56 }
 0x702   : > { %12397 = vmatprep.mubr.msk.f32.mxu0 %vm4835_vm6, %v7947_v8 }
 0x705   : > { %12398 = vmatmul.mubr.msk.f32.gmra.mrb[84].mxu0 %vm4835_vm6, %v16773_v1  ;;  %v16810_v1 = vld [vmem:[#allocation63_spill] sm:$0xff] }
 0x706   : > { %12400 = vmatprep.mubr.msk.f32.mxu0 %vm4835_vm6, %v16774_v14  ;;  %v16811_v14 = vld [vmem:[#allocation68_spill] sm:$0xff] }
 0x709   : > { %12401 = vmatmul.mubr.msk.f32.gmra.mrb[86].mxu0 %vm4835_vm6, %v16775_v45  ;;  %v16812_v45 = vld [vmem:[#allocation70_spill] sm:$0xff] }
 0x70a   : > { %12403 = vmatprep.mubr.msk.f32.mxu0 %vm4835_vm6, %v16776_v2  ;;  %v16813_v2 = vld [vmem:[#allocation72_spill] sm:$0xff] }
 0x70d   : > { %12404 = vmatmul.mubr.msk.f32.gmra.mrb[88].mxu0 %vm4835_vm6, %v16777_v16  ;;  %v16814_v16 = vld [vmem:[#allocation73_spill] sm:$0xff] }
 0x70e   : > { %12406 = vmatprep.mubr.msk.f32.mxu0 %vm4835_vm6, %v16778_v58  ;;  %v16815_v58 = vld [vmem:[#allocation74_spill] sm:$0xff] }
 0x711   : > { %12407 = vmatmul.mubr.msk.f32.gmra.mrb[90].mxu0 %vm4835_vm6, %v16779_v48  ;;  %v16816_v48 = vld [vmem:[#allocation75_spill] sm:$0xff] }
 0x712   : > { %12409 = vmatprep.mubr.msk.f32.mxu0 %vm4835_vm6, %v15690_v13  ;;  %v16817_v13 = vld [vmem:[#allocation76_spill] sm:$0xff] }
 0x715   : > { %12410 = vmatmul.mubr.msk.f32.gmra.mrb[92].mxu0 %vm4835_vm6, %v15694_v39  ;;  %v16818_v39 = vld [vmem:[#allocation77_spill] sm:$0xff] }
 0x716   : > { %12412 = vmatprep.mubr.msk.f32.mxu0 %vm4835_vm6, %v7957_v46 }
 0x719   : > { %12413 = vmatmul.mubr.msk.f32.gmra.mrb[94].mxu0 %vm4835_vm6, %v7958_v32 }
 0x71a   : > { %12423 = vmatprep.mubr.msk.f32.mxu0 %vm4835_vm6, %v16780_v17  ;;  %v16819_v17 = vld [vmem:[#allocation42_spill] sm:$0xff] }
 0x71d   : > { %12424 = vmatmul.mubr.msk.f32.vlgmr.msra.gmra.mrb[64].mxu0 %vm4835_vm6, %v16781_v26  ;;  %v8348_v26 = vld [vmem:[#allocation3 + $0x231] sm:$0xff] }
 0x71e   : > { %12426 = vmatprep.mubr.msk.f32.mxu0 %vm4835_vm6, %v16782_v38  ;;  %v9069_v38 = vld [vmem:[%s16820_s26] sm:$0xff] }
 0x71f   : > { %12521 = vmatprep.subr.mxu1 %v9069_v38 }
 0x721   : > { %12427 = vmatmul.mubr.msk.f32.gmra.mrb[66].mxu0 %vm4835_vm6, %v16783_v12 }
 0x722   : > { %12429 = vmatprep.mubr.msk.f32.mxu0 %vm4835_vm6, %v16784_v44 }
 0x725   : > { %12430 = vmatmul.mubr.msk.f32.gmra.mrb[68].mxu0 %vm4835_vm6, %v16785_v19 }
 0x726   : > { %12432 = vmatprep.mubr.msk.f32.mxu0 %vm4835_vm6, %v16786_v53 }
 0x729   : > { %12433 = vmatmul.mubr.msk.f32.gmra.mrb[70].mxu0 %vm4835_vm6, %v16787_v5 }
 0x72a   : > { %12435 = vmatprep.mubr.msk.f32.mxu0 %vm4835_vm6, %v16788_v15 }
 0x72d   : > { %12436 = vmatmul.mubr.msk.f32.gmra.mrb[72].mxu0 %vm4835_vm6, %v16789_v10 }
 0x72e   : > { %12438 = vmatprep.mubr.msk.f32.mxu0 %vm4835_vm6, %v16790_v54 }
 0x731   : > { %12439 = vmatmul.mubr.msk.f32.gmra.mrb[74].mxu0 %vm4835_vm6, %v16791_v55 }
 0x732   : > { %12441 = vmatprep.mubr.msk.f32.mxu0 %vm4835_vm6, %v16792_v20 }
 0x735   : > { %12442 = vmatmul.mubr.msk.f32.gmra.mrb[76].mxu0 %vm4835_vm6, %v16793_v34 }
 0x736   : > { %12444 = vmatprep.mubr.msk.f32.mxu0 %vm4835_vm6, %v16794_v28 }
 0x739   : > { %12445 = vmatmul.mubr.msk.f32.gmra.mrb[78].mxu0 %vm4835_vm6, %v16808_v31 }
 0x73a   : > { %12447 = vmatprep.mubr.msk.f32.mxu0 %vm4835_vm6, %v16809_v36 }
 0x73d   : > { %12448 = vmatmul.mubr.msk.f32.gmra.mrb[80].mxu0 %vm4835_vm6, %v16810_v1 }
 0x73e   : > { %12450 = vmatprep.mubr.msk.f32.mxu0 %vm4835_vm6, %v16798_v23 }
 0x741   : > { %12451 = vmatmul.mubr.msk.f32.gmra.mrb[82].mxu0 %vm4835_vm6, %v16811_v14 }
 0x742   : > { %12453 = vmatprep.mubr.msk.f32.mxu0 %vm4835_vm6, %v16812_v45 }
 0x745   : > { %12454 = vmatmul.mubr.msk.f32.gmra.mrb[84].mxu0 %vm4835_vm6, %v16813_v2 }
 0x746   : > { %12456 = vmatprep.mubr.msk.f32.mxu0 %vm4835_vm6, %v16814_v16 }
 0x749   : > { %12457 = vmatmul.mubr.msk.f32.gmra.mrb[86].mxu0 %vm4835_vm6, %v16815_v58 }
 0x74a   : > { %12459 = vmatprep.mubr.msk.f32.mxu0 %vm4835_vm6, %v16816_v48 }
 0x74d   : > { %12460 = vmatmul.mubr.msk.f32.gmra.mrb[88].mxu0 %vm4835_vm6, %v16817_v13 }
 0x74e   : > { %12462 = vmatprep.mubr.msk.f32.mxu0 %vm4835_vm6, %v16818_v39 }
 0x751   : > { %12463 = vmatmul.mubr.msk.f32.gmra.mrb[90].mxu0 %vm4835_vm6, %v15549_v18  ;;  %v15952_v18 = vld [vmem:[%s679_s29] ss:$0 sm:$0xff] }
 0x752   : > { %12465 = vmatprep.mubr.msk.f32.mxu0 %vm4835_vm6, %v16819_v17 }
 0x755   : > { %12466 = vmatmul.mubr.msk.f32.gmra.mrb[92].mxu0 %vm4835_vm6, %v15766_v30 }
 0x756   : > { %12468 = vmatprep.mubr.msk.f32.mxu0 %vm4835_vm6, %v8347_v7 }
 0x759   : > { %12469 = vmatmul.mubr.msk.f32.gmra.mrb[94].mxu0 %vm4835_vm6, %v8348_v26 }
 0x7f0   : > { %v12425_v12 = vpop.f32.mrb[64].mxu0 }
 0x7f1   : > { %v8516_v44 = vpop.f32.mrb[65].mxu0  ;;  %v15958_v53 = vadd.f32 %v12425_v12, %v15952_v18 }
 0x7f2   : > { %v15955_v19 = vadd.f32 %v15952_v18, %v8516_v44 }
 0x7f4   : > { %v12428_v5 = vpop.f32.mrb[66].mxu0  ;;  %12473 = vmatprep.mubr.msk.f32.mxu1 %vm8747_vm7, %v15955_v19 }
 0x7f5   : > { %v8526_v15 = vpop.f32.mrb[67].mxu0  ;;  %12474 = vmatmul.mubr.msk.f32.vlgmr.msra.gmra.mrb[32].mxu1 %vm8747_vm7, %v15958_v53  ;;  %v15968_v54 = vadd.f32 %v12428_v5, %v15952_v18 }
 0x7f6   : > { %v15965_v10 = vadd.f32 %v15952_v18, %v8526_v15  ;;  %12522 = vmatpush3.msra.mxu1 %v9069_v38 }
 0x7f8   : > { %v12431_v55 = vpop.f32.mrb[68].mxu0  ;;  %12476 = vmatprep.mubr.msk.f32.mxu1 %vm8747_vm7, %v15965_v10 }
 0x7f9   : > { %v8536_v20 = vpop.f32.mrb[69].mxu0  ;;  %12477 = vmatmul.mubr.msk.f32.gmra.mrb[34].mxu1 %vm8747_vm7, %v15968_v54  ;;  %v15978_v28 = vadd.f32 %v12431_v55, %v15952_v18 }
 0x7fa   : > { %v15975_v34 = vadd.f32 %v15952_v18, %v8536_v20 }
 0x7fc   : > { %v12434_v30 = vpop.f32.mrb[70].mxu0  ;;  %12479 = vmatprep.mubr.msk.f32.mxu1 %vm8747_vm7, %v15975_v34 }
 0x7fd   : > { %v8546_v47 = vpop.f32.mrb[71].mxu0  ;;  %12480 = vmatmul.mubr.msk.f32.gmra.mrb[36].mxu1 %vm8747_vm7, %v15978_v28  ;;  %v15988_v23 = vadd.f32 %v12434_v30, %v15952_v18 }
 0x7fe   : > { %v15985_v52 = vadd.f32 %v15952_v18, %v8546_v47 }
 0x800   : > { %v12437_v49 = vpop.f32.mrb[72].mxu0  ;;  %12482 = vmatprep.mubr.msk.f32.mxu1 %vm8747_vm7, %v15985_v52 }
 0x801   : > { %v8556_v57 = vpop.f32.mrb[73].mxu0  ;;  %12483 = vmatmul.mubr.msk.f32.gmra.mrb[38].mxu1 %vm8747_vm7, %v15988_v23  ;;  %v15998_v60 = vadd.f32 %v12437_v49, %v15952_v18 }
 0x802   : > { %v15995_v29 = vadd.f32 %v15952_v18, %v8556_v57 }
 0x804   : > { %v12440_v62 = vpop.f32.mrb[74].mxu0  ;;  %12485 = vmatprep.mubr.msk.f32.mxu1 %vm8747_vm7, %v15995_v29 }
 0x805   : > { %v8566_v63 = vpop.f32.mrb[75].mxu0  ;;  %12486 = vmatmul.mubr.msk.f32.gmra.mrb[40].mxu1 %vm8747_vm7, %v15998_v60  ;;  %v16008_v11 = vadd.f32 %v12440_v62, %v15952_v18 }
 0x806   : > { %v16005_v4 = vadd.f32 %v15952_v18, %v8566_v63 }
 0x808   : > { %v12443_v33 = vpop.f32.mrb[76].mxu0  ;;  %12488 = vmatprep.mubr.msk.f32.mxu1 %vm8747_vm7, %v16005_v4 }
 0x809   : > { %v8576_v37 = vpop.f32.mrb[77].mxu0  ;;  %12489 = vmatmul.mubr.msk.f32.gmra.mrb[42].mxu1 %vm8747_vm7, %v16008_v11  ;;  %v16018_v25 = vadd.f32 %v12443_v33, %v15952_v18 }
 0x80a   : > { %v16015_v21 = vadd.f32 %v15952_v18, %v8576_v37 }
 0x80c   : > { %v12446_v35 = vpop.f32.mrb[78].mxu0  ;;  %12491 = vmatprep.mubr.msk.f32.mxu1 %vm8747_vm7, %v16015_v21 }
 0x80d   : > { %v8586_v41 = vpop.f32.mrb[79].mxu0  ;;  %12492 = vmatmul.mubr.msk.f32.gmra.mrb[44].mxu1 %vm8747_vm7, %v16018_v25  ;;  %v16028_v3 = vadd.f32 %v12446_v35, %v15952_v18 }
 0x80e   : > { %v16025_v51 = vadd.f32 %v15952_v18, %v8586_v41 }
 0x810   : > { %v12449_v42 = vpop.f32.mrb[80].mxu0  ;;  %12494 = vmatprep.mubr.msk.f32.mxu1 %vm8747_vm7, %v16025_v51 }
 0x811   : > { %v8596_v61 = vpop.f32.mrb[81].mxu0  ;;  %12495 = vmatmul.mubr.msk.f32.gmra.mrb[46].mxu1 %vm8747_vm7, %v16028_v3  ;;  %v8731_v43 = vadd.f32 %v12449_v42, %v15952_v18 }
 0x812   : > { %v8730_v27 = vadd.f32 %v15952_v18, %v8596_v61 }
 0x814   : > { %v12452_v50 = vpop.f32.mrb[82].mxu0  ;;  %12497 = vmatprep.mubr.msk.f32.mxu1 %vm8747_vm7, %v8730_v27 }
 0x815   : > { %v8606_v6 = vpop.f32.mrb[83].mxu0  ;;  %12498 = vmatmul.mubr.msk.f32.gmra.mrb[48].mxu1 %vm8747_vm7, %v8731_v43  ;;  %v8733_v24 = vadd.f32 %v12452_v50, %v15952_v18 }
 0x816   : > { %v8732_v59 = vadd.f32 %v15952_v18, %v8606_v6 }
 0x818   : > { %v12455_v9 = vpop.f32.mrb[84].mxu0  ;;  %12500 = vmatprep.mubr.msk.f32.mxu1 %vm8747_vm7, %v8732_v59 }
 0x819   : > { %v8616_v22 = vpop.f32.mrb[85].mxu0  ;;  %12501 = vmatmul.mubr.msk.f32.gmra.mrb[50].mxu1 %vm8747_vm7, %v8733_v24  ;;  %v8735_v40 = vadd.f32 %v12455_v9, %v15952_v18 }
 0x81a   : > { %v8734_v0 = vadd.f32 %v15952_v18, %v8616_v22 }
 0x81c   : > { %v12458_v56 = vpop.f32.mrb[86].mxu0  ;;  %12503 = vmatprep.mubr.msk.f32.mxu1 %vm8747_vm7, %v8734_v0 }
 0x81d   : > { %v8626_v8 = vpop.f32.mrb[87].mxu0  ;;  %12504 = vmatmul.mubr.msk.f32.gmra.mrb[52].mxu1 %vm8747_vm7, %v8735_v40  ;;  %v8737_v32 = vadd.f32 %v12458_v56, %v15952_v18 }
 0x81e   : > { %v8736_v46 = vadd.f32 %v15952_v18, %v8626_v8 }
 0x820   : > { %v12461_v31 = vpop.f32.mrb[88].mxu0  ;;  %12506 = vmatprep.mubr.msk.f32.mxu1 %vm8747_vm7, %v8736_v46 }
 0x821   : > { %v8636_v36 = vpop.f32.mrb[89].mxu0  ;;  %12507 = vmatmul.mubr.msk.f32.gmra.mrb[54].mxu1 %vm8747_vm7, %v8737_v32  ;;  %v8739_v14 = vadd.f32 %v12461_v31, %v15952_v18 }
 0x822   : > { %v8738_v1 = vadd.f32 %v15952_v18, %v8636_v36 }
 0x824   : > { %v12464_v45 = vpop.f32.mrb[90].mxu0  ;;  %12509 = vmatprep.mubr.msk.f32.mxu1 %vm8747_vm7, %v8738_v1 }
 0x825   : > { %v8646_v2 = vpop.f32.mrb[91].mxu0  ;;  %12510 = vmatmul.mubr.msk.f32.gmra.mrb[56].mxu1 %vm8747_vm7, %v8739_v14  ;;  %v8741_v58 = vadd.f32 %v12464_v45, %v15952_v18 }
 0x826   : > { %v8740_v16 = vadd.f32 %v15952_v18, %v8646_v2 }
 0x828   : > { %v12467_v48 = vpop.f32.mrb[92].mxu0  ;;  %12512 = vmatprep.mubr.msk.f32.mxu1 %vm8747_vm7, %v8740_v16 }
 0x829   : > { %v8656_v13 = vpop.f32.mrb[93].mxu0  ;;  %12513 = vmatmul.mubr.msk.f32.gmra.mrb[58].mxu1 %vm8747_vm7, %v8741_v58  ;;  %v8743_v17 = vadd.f32 %v12467_v48, %v15952_v18 }
 0x82a   : > { %v8742_v39 = vadd.f32 %v15952_v18, %v8656_v13 }
 0x82c   : > { %v12470_v7 = vpop.f32.mrb[94].mxu0  ;;  %12515 = vmatprep.mubr.msk.f32.mxu1 %vm8747_vm7, %v8742_v39 }
 0x82d   : > { %v8666_v26 = vpop.f32.mrb[95].mxu0  ;;  %12516 = vmatmul.mubr.msk.f32.gmra.mrb[60].mxu1 %vm8747_vm7, %v8743_v17  ;;  %v8745_v12 = vadd.f32 %v12470_v7, %v15952_v18 }
 0x82e   : > { %v8744_v38 = vadd.f32 %v15952_v18, %v8666_v26 }
 0x830   : > { %12518 = vmatprep.mubr.msk.f32.mxu1 %vm8747_vm7, %v8744_v38 }
 0x831   : > { %12519 = vmatmul.mubr.msk.f32.gmra.mrb[62].mxu1 %vm8747_vm7, %v8745_v12 }
 0x832   : > { %12523 = vmatprep.mubr.msk.f32.mxu1 %vm8747_vm7, %v15955_v19 }
 0x835   : > { %12524 = vmatmul.mubr.msk.f32.vlgmr.msra.gmra.mrb[64].mxu1 %vm8747_vm7, %v15958_v53 }
 0x836   : > { %12526 = vmatprep.mubr.msk.f32.mxu1 %vm8747_vm7, %v15965_v10  ;;  %v16119_v10 = vld [vmem:[%s682_s6] ss:$0 sm:$0xff]  ;;  %s16853_s6 = sld [smem:[#allocation10_spill]] }
 0x839   : > { %12527 = vmatmul.mubr.msk.f32.gmra.mrb[66].mxu1 %vm8747_vm7, %v15968_v54 }
 0x83a   : > { %12529 = vmatprep.mubr.msk.f32.mxu1 %vm8747_vm7, %v15975_v34 }
 0x83d   : > { %12530 = vmatmul.mubr.msk.f32.gmra.mrb[68].mxu1 %vm8747_vm7, %v15978_v28 }
 0x83e   : > { %12532 = vmatprep.mubr.msk.f32.mxu1 %vm8747_vm7, %v15985_v52 }
 0x841   : > { %12533 = vmatmul.mubr.msk.f32.gmra.mrb[70].mxu1 %vm8747_vm7, %v15988_v23 }
 0x842   : > { %12535 = vmatprep.mubr.msk.f32.mxu1 %vm8747_vm7, %v15995_v29 }
 0x845   : > { %12536 = vmatmul.mubr.msk.f32.gmra.mrb[72].mxu1 %vm8747_vm7, %v15998_v60 }
 0x846   : > { %12538 = vmatprep.mubr.msk.f32.mxu1 %vm8747_vm7, %v16005_v4 }
 0x849   : > { %12539 = vmatmul.mubr.msk.f32.gmra.mrb[74].mxu1 %vm8747_vm7, %v16008_v11 }
 0x84a   : > { %12541 = vmatprep.mubr.msk.f32.mxu1 %vm8747_vm7, %v16015_v21 }
 0x84d   : > { %12542 = vmatmul.mubr.msk.f32.gmra.mrb[76].mxu1 %vm8747_vm7, %v16018_v25 }
 0x84e   : > { %12544 = vmatprep.mubr.msk.f32.mxu1 %vm8747_vm7, %v16025_v51 }
 0x851   : > { %12545 = vmatmul.mubr.msk.f32.gmra.mrb[78].mxu1 %vm8747_vm7, %v16028_v3 }
 0x852   : > { %12547 = vmatprep.mubr.msk.f32.mxu1 %vm8747_vm7, %v8730_v27 }
 0x855   : > { %12548 = vmatmul.mubr.msk.f32.gmra.mrb[80].mxu1 %vm8747_vm7, %v8731_v43 }
 0x856   : > { %12550 = vmatprep.mubr.msk.f32.mxu1 %vm8747_vm7, %v8732_v59 }
 0x859   : > { %12551 = vmatmul.mubr.msk.f32.gmra.mrb[82].mxu1 %vm8747_vm7, %v8733_v24 }
 0x85a   : > { %12553 = vmatprep.mubr.msk.f32.mxu1 %vm8747_vm7, %v8734_v0 }
 0x85d   : > { %12554 = vmatmul.mubr.msk.f32.gmra.mrb[84].mxu1 %vm8747_vm7, %v8735_v40 }
 0x85e   : > { %12556 = vmatprep.mubr.msk.f32.mxu1 %vm8747_vm7, %v8736_v46 }
 0x861   : > { %12557 = vmatmul.mubr.msk.f32.gmra.mrb[86].mxu1 %vm8747_vm7, %v8737_v32 }
 0x862   : > { %12559 = vmatprep.mubr.msk.f32.mxu1 %vm8747_vm7, %v8738_v1 }
 0x865   : > { %12560 = vmatmul.mubr.msk.f32.gmra.mrb[88].mxu1 %vm8747_vm7, %v8739_v14 }
 0x866   : > { %12562 = vmatprep.mubr.msk.f32.mxu1 %vm8747_vm7, %v8740_v16 }
 0x869   : > { %12563 = vmatmul.mubr.msk.f32.gmra.mrb[90].mxu1 %vm8747_vm7, %v8741_v58 }
 0x86a   : > { %12565 = vmatprep.mubr.msk.f32.mxu1 %vm8747_vm7, %v8742_v39 }
 0x86d   : > { %12566 = vmatmul.mubr.msk.f32.gmra.mrb[92].mxu1 %vm8747_vm7, %v8743_v17 }
 0x86e   : > { %12568 = vmatprep.mubr.msk.f32.mxu1 %vm8747_vm7, %v8744_v38 }
 0x871   : > { %12569 = vmatmul.mubr.msk.f32.gmra.mrb[94].mxu1 %vm8747_vm7, %v8745_v12 }
 0x8c8   : > { %v12475_v18 = vpop.f32.mrb[32].mxu1 }
 0x8c9   : > { %13208 = vtanh.f32 %v12475_v18  ;;  %v8910_v44 = vpop.f32.mrb[33].mxu1 }
 0x8ca   : > { %13210 = vtanh.f32 %v8910_v44 }
 0x8cc   : > { %v12478_v19 = vpop.f32.mrb[34].mxu1 }
 0x8cd   : > { %13212 = vtanh.f32 %v12478_v19  ;;  %v8920_v53 = vpop.f32.mrb[35].mxu1 }
 0x8ce   : > { %13214 = vtanh.f32 %v8920_v53 }
 0x8d0   : > { %v12481_v5 = vpop.f32.mrb[36].mxu1 }
 0x8d1   : > { %13216 = vtanh.f32 %v12481_v5  ;;  %v8930_v15 = vpop.f32.mrb[37].mxu1 }
 0x8d2   : > { %13218 = vtanh.f32 %v8930_v15 }
 0x8d3   : > { %v13209_v54 = vpop.eup %13208 }
 0x8d4   : > { %v13211_v55 = vpop.eup %13210  ;;  %v12484_v20 = vpop.f32.mrb[38].mxu1  ;;  %v16127_v52 = vmul.f32 %v13209_v54, %v16119_v10 }
 0x8d5   : > { %13220 = vtanh.f32 %v12484_v20  ;;  %v8940_v34 = vpop.f32.mrb[39].mxu1  ;;  %v16122_v28 = vmul.f32 %v13211_v55, %v16119_v10 }
 0x8d6   : > { %13222 = vtanh.f32 %v8940_v34  ;;  %v9529_v62 = vsel %vm948_vm5, %v16127_v52, 0.0 }
 0x8d7   : > { %v13213_v30 = vpop.eup %13212  ;;  %v9526_v47 = vsel %vm948_vm5, %v16122_v28, 0.0 }
 0x8d8   : > { %v13215_v23 = vpop.eup %13214  ;;  %9527 = vadd.xlane.f32.xlu0 %v9526_v47  ;;  %v12487_v49 = vpop.f32.mrb[40].mxu1  ;;  %v16137_v4 = vmul.f32 %v13213_v30, %v16119_v10 }
 0x8d9   : > { %v8950_v57 = vpop.f32.mrb[41].mxu1  ;;  %v16130_v29 = vmul.f32 %v13215_v23, %v16119_v10  ;;  %13224 = vtanh.f32 %v12487_v49 }
 0x8da   : > { %13226 = vtanh.f32 %v8950_v57  ;;  %v9535_v35 = vsel %vm948_vm5, %v16137_v4, 0.0 }
 0x8db   : > { %v13217_v60 = vpop.eup %13216  ;;  %v9532_v63 = vsel %vm948_vm5, %v16130_v29, 0.0 }
 0x8dc   : > { %v13219_v11 = vpop.eup %13218  ;;  %9530 = vadd.xlane.f32.xlu0 %v9529_v62  ;;  %9533 = vadd.xlane.f32.xlu1 %v9532_v63  ;;  %v12490_v33 = vpop.f32.mrb[42].mxu1  ;;  %v16147_v51 = vmul.f32 %v13217_v60, %v16119_v10  ;;  %v9400_v63 = vmul.f32 1.442695, %v16127_v52 }
 0x8dd   : > { %v8960_v37 = vpop.f32.mrb[43].mxu1  ;;  %v16140_v21 = vmul.f32 %v13219_v11, %v16119_v10  ;;  %13228 = vtanh.f32 %v12490_v33 }
 0x8de   : > { %13230 = vtanh.f32 %v8960_v37  ;;  %v9541_v43 = vsel %vm948_vm5, %v16147_v51, 0.0 }
 0x8df   : > { %v13221_v25 = vpop.eup %13220  ;;  %v9538_v41 = vsel %vm948_vm5, %v16140_v21, 0.0 }
 0x8e0   : > { %v13223_v3 = vpop.eup %13222  ;;  %9536 = vadd.xlane.f32.xlu1 %v9535_v35  ;;  %9539 = vadd.xlane.f32.xlu0 %v9538_v41  ;;  %v12493_v42 = vpop.f32.mrb[44].mxu1  ;;  %v16157_v6 = vmul.f32 %v13221_v25, %v16119_v10  ;;  %v9398_v41 = vmul.f32 1.442695, %v16122_v28 }
 0x8e1   : > { %v8970_v61 = vpop.f32.mrb[45].mxu1  ;;  %v16150_v27 = vmul.f32 %v13223_v3, %v16119_v10  ;;  %13232 = vtanh.f32 %v12493_v42 }
 0x8e2   : > { %13234 = vtanh.f32 %v8970_v61  ;;  %v9547_v40 = vsel %vm948_vm5, %v16157_v6, 0.0  ;;  %v9404_v61 = vmul.f32 1.442695, %v16137_v4 }
 0x8e3   : > { %v9544_v50 = vsel %vm948_vm5, %v16150_v27, 0.0  ;;  %v13225_v59 = vpop.eup %13224 }
 0x8e4   : > { %9542 = vadd.xlane.f32.xlu1 %v9541_v43  ;;  %9545 = vadd.xlane.f32.xlu0 %v9544_v50  ;;  %v12496_v24 = vpop.f32.mrb[46].mxu1  ;;  %v13227_v9 = vpop.eup %13226  ;;  %v16165_v56 = vmul.f32 %v13225_v59, %v16119_v10 }
 0x8e5   : > { %v8980_v22 = vpop.f32.mrb[47].mxu1  ;;  %13236 = vtanh.f32 %v12496_v24  ;;  %v16160_v0 = vmul.f32 %v13227_v9, %v16119_v10  ;;  %v9402_v9 = vmul.f32 1.442695, %v16130_v29 }
 0x8e6   : > { %13238 = vtanh.f32 %v8980_v22  ;;  %v9553_v14 = vsel %vm948_vm5, %v16165_v56, 0.0 }
 0x8e7   : > { %v13229_v8 = vpop.eup %13228  ;;  %v9550_v46 = vsel %vm948_vm5, %v16160_v0, 0.0 }
 0x8e8   : > { %9548 = vadd.xlane.f32.xlu1 %v9547_v40  ;;  %v12499_v32 = vpop.f32.mrb[48].mxu1  ;;  %v13231_v31 = vpop.eup %13230  ;;  %9551 = vadd.xlane.f32.xlu0 %v9550_v46  ;;  %v16175_v45 = vmul.f32 %v13229_v8, %v16119_v10 }
 0x8e9   : > { %v8990_v36 = vpop.f32.mrb[49].mxu1  ;;  %13240 = vtanh.f32 %v12499_v32  ;;  %v16170_v1 = vmul.f32 %v13231_v31, %v16119_v10 }
 0x8ea   : > { %13242 = vtanh.f32 %v8990_v36  ;;  %v9559_v17 = vsel %vm948_vm5, %v16175_v45, 0.0  ;;  %v9408_v36 = vmul.f32 1.442695, %v16147_v51 }
 0x8eb   : > { %v13233_v2 = vpop.eup %13232  ;;  %v9556_v16 = vsel %vm948_vm5, %v16170_v1, 0.0 }
 0x8ec   : > { %9554 = vadd.xlane.f32.xlu1 %v9553_v14  ;;  %v12502_v58 = vpop.f32.mrb[50].mxu1  ;;  %v13235_v48 = vpop.eup %13234  ;;  %9557 = vadd.xlane.f32.xlu0 %v9556_v16  ;;  %v16185_v7 = vmul.f32 %v13233_v2, %v16119_v10 }
 0x8ed   : > { %v9000_v13 = vpop.f32.mrb[51].mxu1  ;;  %13244 = vtanh.f32 %v12502_v58  ;;  %v16180_v39 = vmul.f32 %v13235_v48, %v16119_v10  ;;  %v9406_v58 = vmul.f32 1.442695, %v16140_v21 }
 0x8ee   : > { %13246 = vtanh.f32 %v9000_v13  ;;  %v9565_v53 = vsel %vm948_vm5, %v16185_v7, 0.0 }
 0x8ef   : > { %v13237_v26 = vpop.eup %13236  ;;  %v9562_v38 = vsel %vm948_vm5, %v16180_v39, 0.0 }
 0x8f0   : > { %9560 = vadd.xlane.f32.xlu1 %v9559_v17  ;;  %v12505_v12 = vpop.f32.mrb[52].mxu1  ;;  %v13239_v18 = vpop.eup %13238  ;;  %9563 = vadd.xlane.f32.xlu0 %v9562_v38  ;;  %v16195_v5 = vmul.f32 %v13237_v26, %v16119_v10 }
 0x8f1   : > { %v9010_v44 = vpop.f32.mrb[53].mxu1  ;;  %13248 = vtanh.f32 %v12505_v12  ;;  %v16190_v19 = vmul.f32 %v13239_v18, %v16119_v10  ;;  %v9412_v12 = vmul.f32 1.442695, %v16157_v6 }
 0x8f2   : > { %13250 = vtanh.f32 %v9010_v44  ;;  %v9571_v47 = vsel %vm948_vm5, %v16195_v5, 0.0 }
 0x8f3   : > { %v13241_v15 = vpop.eup %13240  ;;  %v9568_v54 = vsel %vm948_vm5, %v16190_v19, 0.0 }
 0x8f4   : > { %9566 = vadd.xlane.f32.xlu1 %v9565_v53  ;;  %v12508_v55 = vpop.f32.mrb[54].mxu1  ;;  %v13243_v20 = vpop.eup %13242  ;;  %9569 = vadd.xlane.f32.xlu0 %v9568_v54  ;;  %v16205_v23 = vmul.f32 %v13241_v15, %v16119_v10  ;;  %v9410_v53 = vmul.f32 1.442695, %v16150_v27  ;;  %v16821_v15 = vld [vmem:[#allocation12_spill] sm:$0xff] }
 0x8f5   : > { %v9020_v34 = vpop.f32.mrb[55].mxu1  ;;  %13252 = vtanh.f32 %v12508_v55  ;;  %v16200_v30 = vmul.f32 %v13243_v20, %v16119_v10 }
 0x8f6   : > { %13254 = vtanh.f32 %v9020_v34  ;;  %v9577_v37 = vsel %vm948_vm5, %v16205_v23, 0.0  ;;  %v16822_v34 = vld [vmem:[#allocation13_spill] sm:$0xff] }
 0x8f7   : > { %v13245_v49 = vpop.eup %13244  ;;  %v9574_v57 = vsel %vm948_vm5, %v16200_v30, 0.0 }
 0x8f8   : > { %9572 = vadd.xlane.f32.xlu1 %v9571_v47  ;;  %v12511_v60 = vpop.f32.mrb[56].mxu1  ;;  %v13247_v62 = vpop.eup %13246  ;;  %9575 = vadd.xlane.f32.xlu0 %v9574_v57  ;;  %v16216_v25 = vmul.f32 %v13245_v49, %v16119_v10 }
 0x8f9   : > { %v9030_v11 = vpop.f32.mrb[57].mxu1  ;;  %13256 = vtanh.f32 %v12511_v60  ;;  %v16211_v33 = vmul.f32 %v13247_v62, %v16119_v10 }
 0x8fa   : > { %13258 = vtanh.f32 %v9030_v11  ;;  %v9583_v59 = vsel %vm948_vm5, %v16216_v25, 0.0 }
 0x8fb   : > { %v13249_v35 = vpop.eup %13248  ;;  %v9580_v52 = vsel %vm948_vm5, %v16211_v33, 0.0  ;;  %13260 = vpow2.f32 %v9400_v63  ;;  %v9416_v63 = vmul.f32 1.442695, %v16165_v56  ;;  %v16824_v56 = vld [vmem:[#allocation15_spill] sm:$0xff] }
 0x8fc   : > { %9578 = vadd.xlane.f32.xlu1 %v9577_v37  ;;  %v12514_v3 = vpop.f32.mrb[58].mxu1  ;;  %v13251_v42 = vpop.eup %13250  ;;  %9581 = vadd.xlane.f32.xlu0 %v9580_v52  ;;  %v16228_v28 = vmul.f32 %v13249_v35, %v16119_v10  ;;  %v9414_v52 = vmul.f32 1.442695, %v16160_v0 }
 0x8fd   : > { %v9040_v43 = vpop.f32.mrb[59].mxu1  ;;  %13262 = vtanh.f32 %v12514_v3  ;;  %v16223_v50 = vmul.f32 %v13251_v42, %v16119_v10  ;;  %v16823_v3 = vld [vmem:[#allocation14_spill] sm:$0xff] }
 0x8fe   : > { %13264 = vtanh.f32 %v9040_v43  ;;  %v9589_v32 = vsel %vm948_vm5, %v16228_v28, 0.0 }
 0x8ff   : > { %v13253_v24 = vpop.eup %13252  ;;  %13266 = vpow2.f32 %v9398_v41  ;;  %v9586_v4 = vsel %vm948_vm5, %v16223_v50, 0.0 }
 0x900   : > { %9584 = vadd.xlane.f32.xlu1 %v9583_v59  ;;  %v12517_v22 = vpop.f32.mrb[60].mxu1  ;;  %v13255_v40 = vpop.eup %13254  ;;  %13268 = vpow2.f32 %v9404_v61  ;;  %9587 = vadd.xlane.f32.xlu0 %v9586_v4  ;;  %v16239_v31 = vmul.f32 %v13253_v24, %v16119_v10  ;;  %v9420_v4 = vmul.f32 1.442695, %v16175_v45  ;;  %v9418_v45 = vmul.f32 1.442695, %v16170_v1 }
 0x901   : > { %v9050_v8 = vpop.f32.mrb[61].mxu1  ;;  %13270 = vtanh.f32 %v12517_v22  ;;  %v16234_v46 = vmul.f32 %v13255_v40, %v16119_v10 }
 0x902   : > { %13272 = vtanh.f32 %v9050_v8  ;;  %v9595_v26 = vsel %vm948_vm5, %v16239_v31, 0.0 }
 0x903   : > { %v13257_v29 = vpop.eup %13256  ;;  %13274 = vpow2.f32 %v9402_v9  ;;  %v9592_v14 = vsel %vm948_vm5, %v16234_v46, 0.0 }
 0x904   : > { %9590 = vadd.xlane.f32.xlu1 %v9589_v32  ;;  %v12520_v2 = vpop.f32.mrb[62].mxu1  ;;  %v13259_v16 = vpop.eup %13258  ;;  %9593 = vadd.xlane.f32.xlu0 %v9592_v14  ;;  %v16251_v51 = vmul.f32 %v13257_v29, %v16119_v10 }
 0x905   : > { %13276 = vtanh.f32 %v12520_v2  ;;  %v9060_v48 = vpop.f32.mrb[63].mxu1  ;;  %v16246_v13 = vmul.f32 %v13259_v16, %v16119_v10  ;;  %v13261_v17 = vpop.eup %13260  ;;  %v16825_v2 = vld [vmem:[#allocation16_spill] sm:$0xff] }
 0x906   : > { %13278 = vtanh.f32 %v9060_v48  ;;  %v9601_v60 = vsel %vm948_vm5, %v16251_v51, 0.0 }
 0x907   : > { %v13263_v38 = vpop.eup %13262  ;;  %13280 = vpow2.f32 %v9408_v36  ;;  %v9598_v21 = vsel %vm948_vm5, %v16246_v13, 0.0 }
 0x908   : > { %9596 = vadd.xlane.f32.xlu1 %v9595_v26  ;;  %v12525_v18 = vpop.f32.mrb[64].mxu1  ;;  %v13265_v44 = vpop.eup %13264  ;;  %13282 = vpow2.f32 %v9406_v58  ;;  %9599 = vadd.xlane.f32.xlu0 %v9598_v21  ;;  %v16265_v62 = vmul.f32 %v13263_v38, %v16119_v10 }
 0x909   : > { %v9367_v54 = vadd.f32 %v12525_v18, %v16821_v15  ;;  %v9136_v55 = vpop.f32.mrb[65].mxu1  ;;  %v13267_v20 = vpop.eup %13266  ;;  %v16260_v49 = vmul.f32 %v13265_v44, %v16119_v10  ;;  %13284 = vpow2.f32 %v9412_v12  ;;  %v9424_v18 = vmul.f32 1.442695, %v16185_v7  ;;  %v16828_v7 = vld [vmem:[#allocation19_spill] sm:$0xff] }
 0x90a   : > { %v9366_v47 = vadd.f32 %v9136_v55, %v16822_v34  ;;  %v13269_v6 = vpop.eup %13268  ;;  %13286 = vpow2.f32 %v9410_v53  ;;  %v9607_v0 = vsel %vm948_vm5, %v16265_v62, 0.0 }
 0x90b   : > { %v9463_v57 = vmul.f32 %v13261_v17, %v9367_v54  ;;  %v13271_v27 = vpop.eup %13270  ;;  %v9604_v37 = vsel %vm948_vm5, %v16260_v49, 0.0  ;;  %13288 = vpow2.f32 %v9416_v63  ;;  %v16826_v17 = vld [vmem:[#allocation17_spill] sm:$0xff]  ;;  %v9422_v54 = vmul.f32 1.442695, %v16180_v39 }
 0x90c   : > { %v9462_v11 = vmul.f32 %v13267_v20, %v9366_v47  ;;  %9602 = vadd.xlane.f32.xlu1 %v9601_v60  ;;  %v12528_v35 = vpop.f32.mrb[66].mxu1  ;;  %v13273_v41 = vpop.eup %13272  ;;  %9605 = vadd.xlane.f32.xlu0 %v9604_v37  ;;  %v16284_v40 = vmul.f32 %v13271_v27, %v16119_v10  ;;  %13290 = vpow2.f32 %v9414_v52  ;;  %v9428_v39 = vmul.f32 1.442695, %v16195_v5  ;;  %v16829_v37 = vld [vmem:[#allocation20_spill] sm:$0xff] }
 0x90d   : > { %9495 = vst.msk [vmem:[%s13554_s12 + $0x8] sm:$0xff] %vm948_vm5, %v9463_v57  ;;  %v9369_v42 = vadd.f32 %v12528_v35, %v16823_v3  ;;  %v9146_v61 = vpop.f32.mrb[67].mxu1  ;;  %v13275_v43 = vpop.eup %13274  ;;  %v16278_v24 = vmul.f32 %v13273_v41, %v16119_v10  ;;  %13292 = vpow2.f32 %v9420_v4  ;;  %v16830_v3 = vld [vmem:[#allocation21_spill] sm:$0xff] }
 0x90e   : > { %9494 = vst.msk [vmem:[%s13554_s12] sm:$0xff] %vm948_vm5, %v9462_v11  ;;  %v9368_v59 = vadd.f32 %v9146_v61, %v16824_v56  ;;  %v9613_v1 = vsel %vm948_vm5, %v16284_v40, 0.0  ;;  %13294 = vpow2.f32 %v9418_v45  ;;  %v9426_v11 = vmul.f32 1.442695, %v16190_v19 }
 0x90f   : > { %v13277_v9 = vpop.eup %13276  ;;  %v9465_v22 = vmul.f32 %v13269_v6, %v9369_v42  ;;  %v9610_v32 = vsel %vm948_vm5, %v16278_v24, 0.0  ;;  %13296 = vpow2.f32 %v9424_v18  ;;  %v9430_v19 = vmul.f32 1.442695, %v16200_v30 }
 0x910   : > { %v9464_v8 = vmul.f32 %v13275_v43, %v9368_v59  ;;  %9608 = vadd.xlane.f32.xlu1 %v9607_v0  ;;  %v12531_v29 = vpop.f32.mrb[68].mxu1  ;;  %v16289_v36 = vmul.f32 %v13277_v9, %v16119_v10  ;;  %v13279_v14 = vpop.eup %13278  ;;  %9611 = vadd.xlane.f32.xlu0 %v9610_v32  ;;  %13298 = vpow2.f32 %v9422_v54  ;;  %v9432_v43 = vmul.f32 1.442695, %v16205_v23  ;;  %v16831_v9 = vld [vmem:[#allocation22_spill] sm:$0xff] }
 0x911   : > { %9497 = vst.msk [vmem:[%s13554_s12 + $0x18] sm:$0xff] %vm948_vm5, %v9465_v22  ;;  %v9371_v16 = vadd.f32 %v12531_v29, %v16825_v2  ;;  %v9156_v58 = vpop.f32.mrb[69].mxu1  ;;  %v13281_v48 = vpop.eup %13280  ;;  %v16299_v38 = vmul.f32 %v13279_v14, %v16119_v10  ;;  %v16827_v10 = vld [vmem:[#allocation18_spill] sm:$0xff]  ;;  %13300 = vpow2.f32 %v9428_v39  ;;  %v9436_v23 = vmul.f32 1.442695, %v16216_v25 }
 0x912   : > { %9496 = vst.msk [vmem:[%s13554_s12 + $0x10] sm:$0xff] %vm948_vm5, %v9464_v8  ;;  %v9370_v26 = vadd.f32 %v9156_v58, %v16826_v17  ;;  %v13283_v12 = vpop.eup %13282  ;;  %v9619_v60 = vsel %vm948_vm5, %v16289_v36, 0.0  ;;  %13302 = vpow2.f32 %v9426_v11  ;;  %v16832_v8 = vld [vmem:[#allocation23_spill] sm:$0xff]  ;;  %v9434_v30 = vmul.f32 1.442695, %v16211_v33 }
 0x913   : > { %v9467_v21 = vmul.f32 %v13281_v48, %v9371_v16  ;;  %v9616_v53 = vsel %vm948_vm5, %v16299_v38, 0.0  ;;  %v13285_v34 = vpop.eup %13284  ;;  %13304 = vpow2.f32 %v9432_v43  ;;  %v16833_v16 = vld [vmem:[#allocation24_spill] sm:$0xff]  ;;  %v9440_v25 = vmul.f32 1.442695, %v16228_v28  ;;  %v16840_v43 = vld [vmem:[#allocation31_spill] sm:$0xff] }
 0x914   : > { %v9466_v44 = vmul.f32 %v13283_v12, %v9370_v26  ;;  %9614 = vadd.xlane.f32.xlu1 %v9613_v1  ;;  %v12534_v15 = vpop.f32.mrb[70].mxu1  ;;  %9617 = vadd.xlane.f32.xlu0 %v9616_v53  ;;  %v13287_v6 = vpop.eup %13286  ;;  %13306 = vpow2.f32 %v9430_v19  ;;  %v16834_v26 = vld [vmem:[#allocation25_spill] sm:$0xff]  ;;  %v9438_v33 = vmul.f32 1.442695, %v16223_v50  ;;  %v16835_v53 = vld [vmem:[#allocation26_spill] sm:$0xff] }
 0x915   : > { %9499 = vst.msk [vmem:[%s13554_s12 + $0x28] sm:$0xff] %vm948_vm5, %v9467_v21  ;;  %v9373_v55 = vadd.f32 %v12534_v15, %v16827_v10  ;;  %v9166_v20 = vpop.f32.mrb[71].mxu1  ;;  %v13289_v52 = vpop.eup %13288  ;;  %13308 = vpow2.f32 %v9436_v23  ;;  %v9444_v28 = vmul.f32 1.442695, %v16239_v31  ;;  %v9442_v50 = vmul.f32 1.442695, %v16234_v46 }
 0x916   : > { %9498 = vst.msk [vmem:[%s13554_s12 + $0x20] sm:$0xff] %vm948_vm5, %v9466_v44  ;;  %v9372_v47 = vadd.f32 %v9166_v20, %v16828_v7  ;;  %v13291_v61 = vpop.eup %13290  ;;  %13310 = vpow2.f32 %v9434_v30  ;;  %v9448_v31 = vmul.f32 1.442695, %v16251_v51  ;;  %v9446_v46 = vmul.f32 1.442695, %v16246_v13 }
 0x917   : > { %v9469_v57 = vmul.f32 %v13285_v34, %v9373_v55  ;;  %v13293_v0 = vpop.eup %13292  ;;  %v16836_v55 = vld [vmem:[#allocation27_spill] sm:$0xff]  ;;  %13312 = vpow2.f32 %v9440_v25  ;;  %v9452_v51 = vmul.f32 1.442695, %v16265_v62  ;;  %v9450_v13 = vmul.f32 1.442695, %v16260_v49 }
 0x918   : > { %v9468_v27 = vmul.f32 %v13287_v6, %v9372_v47  ;;  %9620 = vadd.xlane.f32.xlu1 %v9619_v60  ;;  %v12537_v63 = vpop.f32.mrb[72].mxu1  ;;  %v13295_v29 = vpop.eup %13294  ;;  %13314 = vpow2.f32 %v9438_v33  ;;  %v16845_v33 = vld [vmem:[#allocation36_spill] sm:$0xff] }
 0x919   : > { %9501 = vst.msk [vmem:[%s13554_s12 + $0x38] sm:$0xff] %vm948_vm5, %v9469_v57  ;;  %v9375_v35 = vadd.f32 %v12537_v63, %v16829_v37  ;;  %v9176_v41 = vpop.f32.mrb[73].mxu1  ;;  %v13297_v17 = vpop.eup %13296  ;;  %v16837_v57 = vld [vmem:[#allocation28_spill] sm:$0xff]  ;;  %v16838_v63 = vld [vmem:[#allocation29_spill] sm:$0xff]  ;;  %13316 = vpow2.f32 %v9444_v28 }
 0x91a   : > { %9500 = vst.msk [vmem:[%s13554_s12 + $0x30] sm:$0xff] %vm948_vm5, %v9468_v27  ;;  %v9374_v42 = vadd.f32 %v9176_v41, %v16830_v3  ;;  %v13299_v21 = vpop.eup %13298  ;;  %13318 = vpow2.f32 %v9442_v50  ;;  %v16839_v3 = vld [vmem:[#allocation30_spill] sm:$0xff]  ;;  %v16848_v50 = vld [vmem:[#allocation39_spill] sm:$0xff] }
 0x91b   : > { %v9471_v5 = vmul.f32 %v13289_v52, %v9375_v35  ;;  %v13301_v10 = vpop.eup %13300  ;;  %13320 = vpow2.f32 %v9448_v31 }
 0x91c   : > { %v9470_v56 = vmul.f32 %v13291_v61, %v9374_v42  ;;  %v12540_v59 = vpop.f32.mrb[74].mxu1  ;;  %v13303_v34 = vpop.eup %13302  ;;  %13322 = vpow2.f32 %v9446_v46 }
 0x91d   : > { %9503 = vst.msk [vmem:[%s13554_s12 + $0x48] sm:$0xff] %vm948_vm5, %v9471_v5  ;;  %v9377_v4 = vadd.f32 %v12540_v59, %v16831_v9  ;;  %v9186_v22 = vpop.f32.mrb[75].mxu1  ;;  %v13305_v27 = vpop.eup %13304  ;;  %13324 = vpow2.f32 %v9452_v51 }
 0x91e   : > { %9502 = vst.msk [vmem:[%s13554_s12 + $0x40] sm:$0xff] %vm948_vm5, %v9470_v56  ;;  %v9376_v32 = vadd.f32 %v9186_v22, %v16832_v8  ;;  %v13307_v37 = vpop.eup %13306  ;;  %v16841_v22 = vld [vmem:[#allocation32_spill] sm:$0xff]  ;;  %13326 = vpow2.f32 %v9450_v13 }
 0x91f   : > { %v9473_v14 = vmul.f32 %v13293_v0, %v9377_v4  ;;  %v13309_v5 = vpop.eup %13308 }
 0x920   : > { %v9472_v45 = vmul.f32 %v13295_v29, %v9376_v32  ;;  %v12543_v2 = vpop.f32.mrb[76].mxu1  ;;  %v13311_v59 = vpop.eup %13310  ;;  %v13377_v32 = vmov 0  }
 0x921   : > { %9505 = vst.msk [vmem:[%s13554_s12 + $0x58] sm:$0xff] %vm948_vm5, %v9473_v14  ;;  %v9379_v58 = vadd.f32 %v12543_v2, %v16833_v16  ;;  %v9196_v48 = vpop.f32.mrb[77].mxu1  ;;  %13207 = vset.pattern.permute.xlu0 %v13377_v32  ;;  %v13313_v29 = vpop.eup %13312  ;;  %v16842_v14 = vld [vmem:[#allocation33_spill] sm:$0xff]  ;;  %v9456_v2 = vmul.f32 1.442695, %v16284_v40 }
 0x922   : > { %9504 = vst.msk [vmem:[%s13554_s12 + $0x50] sm:$0xff] %vm948_vm5, %v9472_v45  ;;  %v9378_v12 = vadd.f32 %v9196_v48, %v16834_v26  ;;  %v13315_v62 = vpop.eup %13314  ;;  %v9454_v16 = vmul.f32 1.442695, %v16278_v24  ;;  %v9460_v40 = vmul.f32 1.442695, %v16289_v36 }
 0x923   : > { %v9475_v1 = vmul.f32 %v13297_v17, %v9379_v58  ;;  %v16843_v58 = vld [vmem:[#allocation34_spill] sm:$0xff]  ;;  %v13317_v26 = vpop.eup %13316  ;;  %13328 = vpow2.f32 %v9456_v2  ;;  %v9458_v24 = vmul.f32 1.442695, %v16299_v38 }
 0x924   : > { %v9474_v18 = vmul.f32 %v13299_v21, %v9378_v12  ;;  %v12546_v44 = vpop.f32.mrb[78].mxu1  ;;  %v16844_v12 = vld [vmem:[#allocation35_spill] sm:$0xff]  ;;  %13330 = vpow2.f32 %v9454_v16  ;;  %v16847_v38 = vld [vmem:[#allocation38_spill] sm:$0xff] }
 0x925   : > { %9507 = vst.msk [vmem:[%s13554_s12 + $0x68] sm:$0xff] %vm948_vm5, %v9475_v1  ;;  %v9381_v15 = vadd.f32 %v12546_v44, %v16835_v53  ;;  %v9206_v54 = vpop.f32.mrb[79].mxu1  ;;  %v13319_v1 = vpop.eup %13318  ;;  %13332 = vpow2.f32 %v9460_v40 }
 0x926   : > { %9506 = vst.msk [vmem:[%s13554_s12 + $0x60] sm:$0xff] %vm948_vm5, %v9474_v18  ;;  %v9380_v20 = vadd.f32 %v9206_v54, %v16836_v55  ;;  %v13321_v54 = vpop.eup %13320  ;;  %13334 = vpow2.f32 %v9458_v24 }
 0x927   : > { %v9477_v7 = vmul.f32 %v13301_v10, %v9381_v15  ;;  %v16846_v10 = vld [vmem:[#allocation37_spill] sm:$0xff] }
 0x928   : > { %v9476_v47 = vmul.f32 %v13303_v34, %v9380_v20  ;;  %v12549_v6 = vpop.f32.mrb[80].mxu1  ;;  %v13323_v20 = vpop.eup %13322 }
 0x929   : > { %9509 = vst.msk [vmem:[%s13554_s12 + $0x78] sm:$0xff] %vm948_vm5, %v9477_v7  ;;  %v9383_v60 = vadd.f32 %v12549_v6, %v16837_v57  ;;  %v9216_v39 = vpop.f32.mrb[81].mxu1  ;;  %v13325_v6 = vpop.eup %13324 }
 0x92a   : > { %9508 = vst.msk [vmem:[%s13554_s12 + $0x70] sm:$0xff] %vm948_vm5, %v9476_v47  ;;  %v9382_v11 = vadd.f32 %v9216_v39, %v16838_v63 }
 0x92b   : > { %v9479_v35 = vmul.f32 %v13305_v27, %v9383_v60  ;;  %v13327_v60 = vpop.eup %13326 }
 0x92c   : > { %v9478_v41 = vmul.f32 %v13307_v37, %v9382_v11  ;;  %v12552_v52 = vpop.f32.mrb[82].mxu1  ;;  %v16849_v11 = vld [vmem:[#allocation40_spill] sm:$0xff] }
 0x92d   : > { %9511 = vst.msk [vmem:[%s13554_s12 + $0x88] sm:$0xff] %vm948_vm5, %v9479_v35  ;;  %v9385_v42 = vadd.f32 %v12552_v52, %v16839_v3  ;;  %v9226_v61 = vpop.f32.mrb[83].mxu1  ;;  %v13329_v31 = vpop.eup %13328 }
 0x92e   : > { %9510 = vst.msk [vmem:[%s13554_s12 + $0x80] sm:$0xff] %vm948_vm5, %v9478_v41  ;;  %v9384_v56 = vadd.f32 %v9226_v61, %v16840_v43  ;;  %v16850_v41 = vld [vmem:[#allocation41_spill] sm:$0xff]  ;;  %v13331_v46 = vpop.eup %13330 }
 0x92f   : > { %v9481_v19 = vmul.f32 %v13309_v5, %v9385_v42  ;;  %v16851_v5 = vld [vmem:[#allocation44_spill] sm:$0xff] }
 0x930   : > { %v9480_v9 = vmul.f32 %v13311_v59, %v9384_v56  ;;  %v12555_v4 = vpop.f32.mrb[84].mxu1  ;;  %v13333_v59 = vpop.eup %13332 }
 0x931   : > { %9513 = vst.msk [vmem:[%s13554_s12 + $0x98] sm:$0xff] %vm948_vm5, %v9481_v19  ;;  %v9387_v0 = vadd.f32 %v12555_v4, %v16841_v22  ;;  %v9236_v8 = vpop.f32.mrb[85].mxu1  ;;  %v16852_v19 = vld [vmem:[#allocation45_spill] sm:$0xff] }
 0x932   : > { %9512 = vst.msk [vmem:[%s13554_s12 + $0x90] sm:$0xff] %vm948_vm5, %v9480_v9  ;;  %v9386_v23 = vadd.f32 %v9236_v8, %v16842_v14  ;;  %v13335_v9 = vpop.eup %13334 }
 0x933   : > { %v9483_v45 = vmul.f32 %v13313_v29, %v9387_v0 }
 0x934   : > { %v9482_v49 = vmul.f32 %v13315_v62, %v9386_v23  ;;  %v12558_v30 = vpop.f32.mrb[86].mxu1 }
 0x935   : > { %9515 = vst.msk [vmem:[%s13554_s12 + $0xa8] sm:$0xff] %vm948_vm5, %v9483_v45  ;;  %v9389_v48 = vadd.f32 %v12558_v30, %v16843_v58  ;;  %v9246_v17 = vpop.f32.mrb[87].mxu1 }
 0x936   : > { %9514 = vst.msk [vmem:[%s13554_s12 + $0xa0] sm:$0xff] %vm948_vm5, %v9482_v49  ;;  %v9388_v21 = vadd.f32 %v9246_v17, %v16844_v12 }
 0x937   : > { %v9485_v25 = vmul.f32 %v13317_v26, %v9389_v48 }
 0x938   : > { %v9484_v18 = vmul.f32 %v13319_v1, %v9388_v21  ;;  %v12561_v44 = vpop.f32.mrb[88].mxu1 }
 0x939   : > { %9517 = vst.msk [vmem:[%s13554_s12 + $0xb8] sm:$0xff] %vm948_vm5, %v9485_v25  ;;  %v9391_v53 = vadd.f32 %v12561_v44, %v16845_v33  ;;  %v9256_v15 = vpop.f32.mrb[89].mxu1 }
 0x93a   : > { %9516 = vst.msk [vmem:[%s13554_s12 + $0xb0] sm:$0xff] %vm948_vm5, %v9484_v18  ;;  %v9390_v55 = vadd.f32 %v9256_v15, %v16846_v10 }
 0x93b   : > { %v9487_v36 = vmul.f32 %v13321_v54, %v9391_v53 }
 0x93c   : > { %v9486_v34 = vmul.f32 %v13323_v20, %v9390_v55  ;;  %v12564_v7 = vpop.f32.mrb[90].mxu1 }
 0x93d   : > { %9519 = vst.msk [vmem:[%s13554_s12 + $0xc8] sm:$0xff] %vm948_vm5, %v9487_v36  ;;  %v9393_v28 = vadd.f32 %v12564_v7, %v16847_v38  ;;  %v9266_v47 = vpop.f32.mrb[91].mxu1 }
 0x93e   : > { %9518 = vst.msk [vmem:[%s13554_s12 + $0xc0] sm:$0xff] %vm948_vm5, %v9486_v34  ;;  %v9392_v57 = vadd.f32 %v9266_v47, %v16848_v50 }
 0x93f   : > { %v9489_v39 = vmul.f32 %v13325_v6, %v9393_v28 }
 0x940   : > { %v9488_v27 = vmul.f32 %v13327_v60, %v9392_v57  ;;  %v12567_v63 = vpop.f32.mrb[92].mxu1 }
 0x941   : > { %9521 = vst.msk [vmem:[%s13554_s12 + $0xd8] sm:$0xff] %vm948_vm5, %v9489_v39  ;;  %v9395_v37 = vadd.f32 %v12567_v63, %v16849_v11  ;;  %v9276_v35 = vpop.f32.mrb[93].mxu1 }
 0x942   : > { %9520 = vst.msk [vmem:[%s13554_s12 + $0xd0] sm:$0xff] %vm948_vm5, %v9488_v27  ;;  %v9394_v52 = vadd.f32 %v9276_v35, %v16850_v41 }
 0x943   : > { %v9491_v3 = vmul.f32 %v13329_v31, %v9395_v37 }
 0x944   : > { %v9490_v42 = vmul.f32 %v13331_v46, %v9394_v52  ;;  %v12570_v61 = vpop.f32.mrb[94].mxu1 }
 0x945   : > { %9523 = vst.msk [vmem:[%s13554_s12 + $0xe8] sm:$0xff] %vm948_vm5, %v9491_v3  ;;  %v9397_v43 = vadd.f32 %v12570_v61, %v16851_v5  ;;  %v9286_v56 = vpop.f32.mrb[95].mxu1 }
 0x946   : > { %9522 = vst.msk [vmem:[%s13554_s12 + $0xe0] sm:$0xff] %vm948_vm5, %v9490_v42  ;;  %v9396_v51 = vadd.f32 %v9286_v56, %v16852_v19 }
 0x947   : > { %v9493_v4 = vmul.f32 %v13333_v59, %v9397_v43 }
 0x948   : > { %v9492_v13 = vmul.f32 %v13335_v9, %v9396_v51 }
 0x949   : > { %9525 = vst.msk [vmem:[%s13554_s12 + $0xf8] sm:$0xff] %vm948_vm5, %v9493_v4 }
 0x94a   : > { %9524 = vst.msk [vmem:[%s13554_s12 + $0xf0] sm:$0xff] %vm948_vm5, %v9492_v13 }
 0x965   : > { %v9528_v22 = vpop.xlane.xlu0 %9527 }
 0x969   : > { %v9531_v0 = vpop.xlane.xlu0 %9530  ;;  %v9534_v8 = vpop.xlane.xlu1 %9533 }
 0x96a   : > { %v9622_v32 = vadd.f32 %v9531_v0, %v9528_v22 }
 0x96c   : > { %v9623_v29 = vadd.f32 %v9622_v32, %v9534_v8 }
 0x96d   : > { %v9537_v14 = vpop.xlane.xlu1 %9536  ;;  %v9540_v23 = vpop.xlane.xlu0 %9539 }
 0x96e   : > { %v9624_v62 = vadd.f32 %v9623_v29, %v9537_v14  ;;  %v9660_v29 = vld [vmem:[%s16854_s0] sm:$0x1] }
 0x970   : > { %v9625_v45 = vadd.f32 %v9624_v62, %v9540_v23  ;;  %v9667_v62 = vlaneseq }
 0x971   : > { %v9543_v2 = vpop.xlane.xlu1 %9542  ;;  %v9546_v49 = vpop.xlane.xlu0 %9545 }
 0x972   : > { %v9626_v30 = vadd.f32 %v9625_v45, %v9543_v2  ;;  %v9668_v45 = vshrl.u32 %v9667_v62, 7 }
 0x974   : > { %v9627_v16 = vadd.f32 %v9626_v30, %v9546_v49  ;;  %v9669_v2 = vsub.s32 0, %v9668_v45  ;;  %v9659_v49 = vld [vmem:[%s16853_s6] sm:$0x1] }
 0x975   : > { %v9549_v58 = vpop.xlane.xlu1 %9548  ;;  %v9552_v17 = vpop.xlane.xlu0 %9551 }
 0x976   : > { %v9628_v48 = vadd.f32 %v9627_v16, %v9549_v58 }
 0x978   : > { %v9629_v26 = vadd.f32 %v9628_v48, %v9552_v17 }
 0x979   : > { %v9555_v12 = vpop.xlane.xlu1 %9554  ;;  %v9558_v1 = vpop.xlane.xlu0 %9557 }
 0x97a   : > { %v9630_v21 = vadd.f32 %v9629_v26, %v9555_v12 }
 0x97c   : > { %v9631_v25 = vadd.f32 %v9630_v21, %v9558_v1 }
 0x97d   : > { %v9561_v40 = vpop.xlane.xlu1 %9560  ;;  %v9564_v44 = vpop.xlane.xlu0 %9563 }
 0x97e   : > { %v9632_v18 = vadd.f32 %v9631_v25, %v9561_v40 }
 0x980   : > { %v9633_v24 = vadd.f32 %v9632_v18, %v9564_v44 }
 0x981   : > { %v9567_v33 = vpop.xlane.xlu1 %9566  ;;  %v9570_v15 = vpop.xlane.xlu0 %9569 }
 0x982   : > { %v9634_v53 = vadd.f32 %v9633_v24, %v9567_v33 }
 0x984   : > { %v9635_v54 = vadd.f32 %v9634_v53, %v9570_v15 }
 0x985   : > { %v9573_v10 = vpop.xlane.xlu1 %9572  ;;  %v9576_v20 = vpop.xlane.xlu0 %9575 }
 0x986   : > { %v9636_v55 = vadd.f32 %v9635_v54, %v9573_v10 }
 0x988   : > { %v9637_v36 = vadd.f32 %v9636_v55, %v9576_v20 }
 0x989   : > { %v9579_v34 = vpop.xlane.xlu1 %9578  ;;  %v9582_v38 = vpop.xlane.xlu0 %9581 }
 0x98a   : > { %v9638_v7 = vadd.f32 %v9637_v36, %v9579_v34 }
 0x98c   : > { %v9639_v28 = vadd.f32 %v9638_v7, %v9582_v38 }
 0x98d   : > { %v9585_v47 = vpop.xlane.xlu1 %9584  ;;  %v9588_v50 = vpop.xlane.xlu0 %9587 }
 0x98e   : > { %v9640_v6 = vadd.f32 %v9639_v28, %v9585_v47 }
 0x990   : > { %v9641_v57 = vadd.f32 %v9640_v6, %v9588_v50 }
 0x991   : > { %v9591_v60 = vpop.xlane.xlu1 %9590  ;;  %v9594_v27 = vpop.xlane.xlu0 %9593 }
 0x992   : > { %v9642_v39 = vadd.f32 %v9641_v57, %v9591_v60 }
 0x994   : > { %v9643_v63 = vadd.f32 %v9642_v39, %v9594_v27 }
 0x995   : > { %v9597_v11 = vpop.xlane.xlu1 %9596  ;;  %v9600_v35 = vpop.xlane.xlu0 %9599 }
 0x996   : > { %v9644_v37 = vadd.f32 %v9643_v63, %v9597_v11 }
 0x998   : > { %v9645_v31 = vadd.f32 %v9644_v37, %v9600_v35 }
 0x999   : > { %v9603_v41 = vpop.xlane.xlu1 %9602  ;;  %v9606_v46 = vpop.xlane.xlu0 %9605 }
 0x99a   : > { %v9646_v52 = vadd.f32 %v9645_v31, %v9603_v41 }
 0x99c   : > { %v9647_v3 = vadd.f32 %v9646_v52, %v9606_v46 }
 0x99d   : > { %v9609_v42 = vpop.xlane.xlu1 %9608  ;;  %v9612_v5 = vpop.xlane.xlu0 %9611 }
 0x99e   : > { %v9648_v61 = vadd.f32 %v9647_v3, %v9609_v42 }
 0x9a0   : > { %v9649_v43 = vadd.f32 %v9648_v61, %v9612_v5 }
 0x9a1   : > { %v9615_v56 = vpop.xlane.xlu1 %9614  ;;  %v9618_v19 = vpop.xlane.xlu0 %9617 }
 0x9a2   : > { %v9650_v59 = vadd.f32 %v9649_v43, %v9615_v56 }
 0x9a4   : > { %v9651_v51 = vadd.f32 %v9650_v59, %v9618_v19 }
 0x9a5   : > { %v9621_v9 = vpop.xlane.xlu1 %9620 }
 0x9a6   : > { %v9652_v4 = vadd.f32 %v9651_v51, %v9621_v9 }
 0x9a8   : > { %v9653_v13 = vrot.slane %v9652_v4, 4 }
 0x9aa   : > { %v9654_v22 = vadd.f32 %v9653_v13, %v9652_v4 }
 0x9ac   : > { %v9655_v0 = vrot.slane %v9654_v22, 2 }
 0x9ae   : > { %v9656_v8 = vadd.f32 %v9655_v0, %v9654_v22 }
 0x9b0   : > { %v9657_v32 = vrot.slane %v9656_v8, 1 }
 0x9b2   : > { %v9658_v14 = vadd.f32 %v9657_v32, %v9656_v8 }
 0x9b4   : > { %v9661_v23 = vadd.f32 %v9660_v29, %v9658_v14 }
 0x9b6   : > { %9664 = vperm.xlu0 %13207, %v9661_v23  }
 0xa35   : > { %v9665_v30 = vpop.permute.xlu0 %9664 }
 0xa36   : > { %v9670_v16 = vrot.slane %v9665_v30, %v9669_v2 }
 0xa38   : > { %v9671_v58 = vadd.f32 %v9670_v16, %v9659_v49 }
 0xa3a   : > { %9672 = vst [vmem:[%s16853_s6] sm:$0x1] %v9671_v58 }
 0xa3b PF: > { %s16855_s17 = sld [smem:[#allocation7_spill]]  ;;  %s16856_s18 = sld [smem:[#allocation5_spill]] }
 0xa3c   : > { %s16857_s19 = sld [smem:[#allocation6_spill]]  ;;  %s16858_s20 = sld [smem:[#allocation8_spill]] }
 0xa3d   : > { %s16859_s21 = sld [smem:[#allocation9_spill]] }
 0xa41   : > { %s26_s22 = sadd.s32 1, %s16855_s17  }
 0xa42   : > { %p23_p8 = scmp.ge.s32.totalorder %s26_s22, 6  }
 0xa44   :  { %25 = sbr.rel (!%p23_p8) target bundleno = 7 (0x7), region = 175 }

</bundles_post_ra>
